<compile_context>
chip_gen: v7x
topology: tpu7x:2x2x1
jax: 0.10.0
libtpu: 0.0.40
codegen_flags: <defaults>
</compile_context>

<pallas_src>
import functools

import jax
import jax.numpy as jnp
from jax.experimental import pallas as pl
from jax.experimental.pallas import tpu as pltpu

BN_EPS = 1e-5
LANES = 128


def _round_up(x, m):
    return (x + m - 1) // m * m


def _vmem_limit_bytes():
    """Per-generation scoped-VMEM limit: ~96 MiB on 128-MiB parts (v5e/v6e), 48 MiB on v7x."""
    try:
        cap = int(pltpu.get_tpu_info().vmem_capacity_bytes)
    except Exception:
        cap = 64 * 1024 * 1024
    if cap >= 128 * 1024 * 1024:
        return 96 * 1024 * 1024
    return 48 * 1024 * 1024


# --------------------------------------------------------------------------------------
# Conv pass: direct 3x3 conv (kw folded into K -> 3 MXU dots) + BN partial statistics.
# Optionally fuses the previous stage's BN affine + ReLU into the window build.
# --------------------------------------------------------------------------------------

def _conv3x3_stats_kernel(*refs, th, ww, nh, apply_act):
    if apply_act:
        x_ref, top_ref, bot_ref, w_ref, sc_ref, sh_ref, h_ref, stats_ref = refs
    else:
        x_ref, top_ref, bot_ref, w_ref, h_ref, stats_ref = refs
    cp_in = x_ref.shape[-1]
    cp_out = h_ref.shape[-1]
    hi = pl.program_id(1)

    def _act(v):
        # fused BN1 affine + ReLU of the previous stage (applied before spatial zero-pad)
        if not apply_act:
            return v
        return jnp.maximum(v.astype(jnp.float32) * sc_ref[0] + sh_ref[0],
                           0.0).astype(jnp.bfloat16)

    # bf16 window (th+2, ww, cp_in).  Halo rows are clamp-fetched neighbour rows; when
    # they fall outside the image they are zeroed (== conv2d's spatial zero padding).
    mid = _act(x_ref[0])                                               # (th, ww, cp_in)
    top = _act(top_ref[0]) * (hi > 0).astype(mid.dtype)                # (1,  ww, cp_in)
    bot = _act(bot_ref[0]) * (hi < nh - 1).astype(mid.dtype)           # (1,  ww, cp_in)
    win = jnp.concatenate([top, mid, bot], axis=0)                     # (th+2, ww, cp_in)

    # zero-pad the width (conv padding=1), then fold kw into the contraction: K = 3*cp_in
    zcol = jnp.zeros((th + 2, 1, cp_in), win.dtype)
    wwin = jnp.concatenate([zcol, win, zcol], axis=1)                  # (th+2, ww+2, cp_in)
    wide = jnp.concatenate(
        [wwin[:, 0:ww], wwin[:, 1:ww + 1], wwin[:, 2:ww + 2]], axis=-1)  # (th+2, ww, 3cp_in)

    acc = jnp.zeros((th * ww, cp_out), jnp.float32)
    for dy in range(3):                                                # 3 MXU dots, K=3*cp_in
        lhs = wide[dy:dy + th].reshape(th * ww, 3 * cp_in)
        acc = acc + jnp.dot(lhs, w_ref[dy], preferred_element_type=jnp.float32)

    h_ref[...] = acc.reshape(1, th, ww, cp_out).astype(h_ref.dtype)
    # per-tile BN partials: row 0 = sum, row 1 = sum of squares (8-row block keeps the
    # (8,128) store layout simple; stats HBM traffic is negligible).
    stats_ref[...] = jnp.concatenate(
        [jnp.sum(acc, axis=0, keepdims=True),
         jnp.sum(acc * acc, axis=0, keepdims=True),
         jnp.zeros((6, cp_out), jnp.float32)], axis=0)


def _conv3x3_stats(x, w3, scale, shift, *, th, apply_act, h_dtype, vmem_limit):
    n, hh, ww, cp_in = x.shape
    cp_out = w3.shape[-1]
    nh = hh // th
    kernel = functools.partial(_conv3x3_stats_kernel, th=th, ww=ww, nh=nh,
                               apply_act=apply_act)
    in_specs = [
        # main row block: output rows [hi*th, hi*th+th)
        pl.BlockSpec((1, th, ww, cp_in), lambda ni, hi: (ni, hi, 0, 0)),
        # 1-row top / bottom halo blocks (clamped; zeroed in-kernel when out of range)
        pl.BlockSpec((1, 1, ww, cp_in),
                     lambda ni, hi: (ni, jnp.maximum(hi * th - 1, 0), 0, 0)),
        pl.BlockSpec((1, 1, ww, cp_in),
                     lambda ni, hi: (ni, jnp.minimum((hi + 1) * th, hh - 1), 0, 0)),
        # kw-folded weights: (3, 3*cp_in, cp_out)
        pl.BlockSpec((3, 3 * cp_in, cp_out), lambda ni, hi: (0, 0, 0)),
    ]
    args = [x, x, x, w3]
    if apply_act:
        in_specs += [pl.BlockSpec((1, cp_in), lambda ni, hi: (0, 0)),
                     pl.BlockSpec((1, cp_in), lambda ni, hi: (0, 0))]
        args += [scale, shift]
    return pl.pallas_call(
        kernel,
        grid=(n, nh),
        in_specs=in_specs,
        out_specs=[
            pl.BlockSpec((1, th, ww, cp_out), lambda ni, hi: (ni, hi, 0, 0)),
            pl.BlockSpec((8, cp_out), lambda ni, hi: (ni * nh + hi, 0)),
        ],
        out_shape=[
            jax.ShapeDtypeStruct((n, hh, ww, cp_out), h_dtype),
            jax.ShapeDtypeStruct((n * nh * 8, cp_out), jnp.float32),
        ],
        compiler_params=pltpu.CompilerParams(
            dimension_semantics=("parallel", "parallel"),
            vmem_limit_bytes=vmem_limit),
    )(*args)


# --------------------------------------------------------------------------------------
# BN stat combine (tiny, plain JAX) and finalize pass: BN2 affine + residual + ReLU
# --------------------------------------------------------------------------------------

def _bn_scale_shift(stats, gamma, beta, m):
    s = stats.reshape(-1, 8, stats.shape[-1])
    total = jnp.sum(s[:, 0, :], axis=0)
    total_sq = jnp.sum(s[:, 1, :], axis=0)
    mean = total / m
    var = jnp.maximum(total_sq / m - mean * mean, 0.0)   # biased (training-mode) variance
    inv = jax.lax.rsqrt(var + BN_EPS)
    scale = gamma * inv
    shift = beta - mean * scale
    return scale.reshape(1, -1), shift.reshape(1, -1)


def _bn_add_relu_kernel(h_ref, res_ref, scale_ref, shift_ref, out_ref):
    y = h_ref[...] * scale_ref[...] + shift_ref[...]
    res = res_ref[...].astype(jnp.float32)
    cp_out = y.shape[-1]
    cp_res = res.shape[-1]
    if cp_res < cp_out:     # residual channel pad (F.pad of the identity) folded in-kernel
        res = jnp.concatenate(
            [res, jnp.zeros(res.shape[:-1] + (cp_out - cp_res,), jnp.float32)], axis=-1)
    elif cp_res > cp_out:
        res = res[:, :cp_out]
    out_ref[...] = jnp.maximum(y + res, 0.0).astype(out_ref.dtype)


def _pick_row_tile(m, max_rows):
    """Largest multiple-of-8 divisor of m within the byte-budgeted row cap."""
    if m % 8 != 0:
        return m                      # degenerate shape: single full block stays layout-legal
    cap = min(m, max(8, (max_rows // 8) * 8), 32768)
    best, d = 8, 8
    while d <= cap:
        if m % d == 0:
            best = d
        d += 8
    return best


def _bn_add_relu(h_pre, res, scale, shift, *, vmem_limit, out_dtype=jnp.float32):
    m, cp_out = h_pre.shape
    cp_res = res.shape[-1]
    bytes_per_row = 2 * (4 * cp_out + 4 * cp_res + 4 * cp_out)   # double-buffered streams
    tm = _pick_row_tile(m, (vmem_limit // 2) // bytes_per_row)
    return pl.pallas_call(
        _bn_add_relu_kernel,
        grid=(m // tm,),
        in_specs=[
            pl.BlockSpec((tm, cp_out), lambda i: (i, 0)),
            pl.BlockSpec((tm, cp_res), lambda i: (i, 0)),
            pl.BlockSpec((1, cp_out), lambda i: (0, 0)),
            pl.BlockSpec((1, cp_out), lambda i: (0, 0)),
        ],
        out_specs=pl.BlockSpec((tm, cp_out), lambda i: (i, 0)),
        out_shape=jax.ShapeDtypeStruct((m, cp_out), out_dtype),
        compiler_params=pltpu.CompilerParams(
            dimension_semantics=("parallel",),
            vmem_limit_bytes=vmem_limit),
    )(h_pre, res, scale, shift)


# --------------------------------------------------------------------------------------
# Parameters / forward
# --------------------------------------------------------------------------------------

def init_params(key, in_channels, out_channels, hidden_dim):
    k1, k2 = jax.random.split(key, 2)
    # Conv weights in HWIO (a PyTorch OIHW weight maps via w.transpose(2, 3, 1, 0)).
    # Conv biases omitted: with training-mode BatchNorm directly after each conv the bias
    # is exactly cancelled by the batch-mean subtraction.
    w1 = jax.random.normal(k1, (3, 3, in_channels, hidden_dim), jnp.float32) * 0.1
    w2 = jax.random.normal(k2, (3, 3, hidden_dim, out_channels), jnp.float32) * 0.1
    return dict(
        w1=w1, w2=w2,
        g1=jnp.ones((hidden_dim,), jnp.float32),
        be1=jnp.zeros((hidden_dim,), jnp.float32),
        g2=jnp.ones((out_channels,), jnp.float32),
        be2=jnp.zeros((out_channels,), jnp.float32),
    )


def _pad_weight(w, cp_in, cp_out):
    kh, kw, cin, cout = w.shape
    wpad = jnp.zeros((kh, kw, cp_in, cp_out), jnp.float32).at[:, :, :cin, :cout].set(w)
    # fold kw into the contraction dim (dx-major) to match the in-kernel `wide` operand
    return wpad.reshape(kh, kw * cp_in, cp_out).astype(jnp.bfloat16)


def _pad_vec(v, cp, fill):
    return jnp.full((cp,), fill, jnp.float32).at[: v.shape[0]].set(v)


def _pick_conv_row_tile(hh, ww, cp_in, cp_out, h_bytes, budget):
    """Largest th dividing hh whose rough per-tile VMEM footprint fits the byte budget."""
    best = 1
    for th in range(1, hh + 1):
        if hh % th:
            continue
        need = ((th + 2) * (ww + 2) * cp_in * 2                 # bf16 padded window
                + (th + 2) * ww * 3 * cp_in * 2                 # kw-folded MXU operand
                + th * ww * cp_out * 4                          # f32 accumulator
                + 2 * th * ww * (cp_in * 2 + cp_out * h_bytes)  # dbl-buffered in/out blocks
                + 2 * 9 * cp_in * cp_out * 2)                   # dbl-buffered weights
        if need <= budget:
            best = th
    return best


def resnet_block_forward(x_nchw, params):
    n, cin, hh, ww = x_nchw.shape
    hidden = params["w1"].shape[-1]
    cout = params["w2"].shape[-1]

    cp_in = _round_up(cin, LANES)
    cp_hid = _round_up(hidden, LANES)
    cp_out = _round_up(cout, LANES)

    vmem_limit = _vmem_limit_bytes()
    budget = vmem_limit // 2
    m = n * hh * ww

    # NCHW -> NHWC, lane-pad channels.  bf16 copy feeds conv1's MXU, f32 copy is the exact
    # residual (skip) path.  No spatial padding copies: boundaries are handled in-kernel.
    x_nhwc = jnp.transpose(x_nchw, (0, 2, 3, 1)).astype(jnp.float32)
    x_lp = jnp.pad(x_nhwc, ((0, 0), (0, 0), (0, 0), (0, cp_in - cin)))
    x_bf = x_lp.astype(jnp.bfloat16)

    w1p = _pad_weight(params["w1"], cp_in, cp_hid)
    w2p = _pad_weight(params["w2"], cp_hid, cp_out)
    g1p, be1p = _pad_vec(params["g1"], cp_hid, 1.0), _pad_vec(params["be1"], cp_hid, 0.0)
    g2p, be2p = _pad_vec(params["g2"], cp_out, 1.0), _pad_vec(params["be2"], cp_out, 0.0)

    # ---- pass 1: conv1 + BN1 partial stats (h1 kept bf16: largest intermediate) ----
    th1 = _pick_conv_row_tile(hh, ww, cp_in, cp_hid, 2, budget)
    h1_pre, st1 = _conv3x3_stats(x_bf, w1p, None, None, th=th1, apply_act=False,
                                 h_dtype=jnp.bfloat16, vmem_limit=vmem_limit)
    sc1, sh1 = _bn_scale_shift(st1, g1p, be1p, m)

    # ---- pass 2: fused BN1 affine + ReLU -> conv2 + BN2 partial stats (h2 f32) ----
    th2 = _pick_conv_row_tile(hh, ww, cp_hid, cp_out, 4, budget)
    h2_pre, st2 = _conv3x3_stats(h1_pre, w2p, sc1, sh1, th=th2, apply_act=True,
                                 h_dtype=jnp.float32, vmem_limit=vmem_limit)
    sc2, sh2 = _bn_scale_shift(st2, g2p, be2p, m)

    # ---- pass 3: BN2 affine + residual (channel pad in-kernel, f32 skip path) + ReLU ----
    out = _bn_add_relu(h2_pre.reshape(m, cp_out), x_lp.reshape(m, cp_in), sc2, sh2,
                       vmem_limit=vmem_limit)
    out = out.reshape(n, hh, ww, cp_out)[:, :, :, :cout]
    return jnp.transpose(out, (0, 3, 1, 2))                     # NHWC -> NCHW


if __name__ == "__main__":
    key = jax.random.PRNGKey(0)
    kx, kp = jax.random.split(key)
    N, Cin, H, W = 2, 4, 16, 16
    hidden_dim, Cout = 32, 8            # Cout != Cin exercises the residual channel pad
    x = jax.random.normal(kx, (N, Cin, H, W), jnp.float32)
    params = init_params(kp, Cin, Cout, hidden_dim)

    fwd = jax.jit(resnet_block_forward)
    y = fwd(x, params)
    jax.block_until_ready(y)
    assert y.shape == (N, Cout, H, W), y.shape
    assert bool(jnp.all(y >= 0.0))      # final ReLU
    print("KERNEL_OK")
</pallas_src>

<mosaic_0001>
module attributes {stable_mosaic.version = 11 : i64} {
  func.func @_conv3x3_stats_kernel(%arg0: i32, %arg1: i32, %arg2: memref<1x16x16x128xbf16, #tpu.memory_space<vmem>>, %arg3: memref<1x1x16x128xbf16, #tpu.memory_space<vmem>>, %arg4: memref<1x1x16x128xbf16, #tpu.memory_space<vmem>>, %arg5: memref<3x384x128xbf16, #tpu.memory_space<vmem>>, %arg6: memref<1x16x16x128xbf16, #tpu.memory_space<vmem>>, %arg7: memref<8x128xf32, #tpu.memory_space<vmem>>) attributes {dimension_semantics = [#tpu.dimension_semantics<parallel>, #tpu.dimension_semantics<parallel>], iteration_bounds = array<i64: 2, 1>, scalar_prefetch = 0 : i64, scratch_operands = 0 : i64, tpu.core_type = #tpu.core_type<tc>, window_params = [{transform_indices = @transform_0, window_bounds = array<i64: 1, 16, 16, 128>}, {transform_indices = @transform_1, window_bounds = array<i64: 1, 1, 16, 128>}, {transform_indices = @transform_2, window_bounds = array<i64: 1, 1, 16, 128>}, {pipeline_mode = #tpu.pipeline_mode<synchronous>, transform_indices = @transform_3, window_bounds = array<i64: 3, 384, 128>}, {transform_indices = @transform_4, window_bounds = array<i64: 1, 16, 16, 128>}, {transform_indices = @transform_5, window_bounds = array<i64: 8, 128>}]} {
    %c0 = arith.constant 0 : index
    %c0_0 = arith.constant 0 : index
    %c0_1 = arith.constant 0 : index
    %c0_2 = arith.constant 0 : index
    %0 = vector.load %arg2[%c0, %c0_0, %c0_1, %c0_2] : memref<1x16x16x128xbf16, #tpu.memory_space<vmem>>, vector<1x16x16x128xbf16>
    %1 = vector.shape_cast %0 : vector<1x16x16x128xbf16> to vector<16x16x128xbf16>
    %c0_3 = arith.constant 0 : index
    %c0_4 = arith.constant 0 : index
    %c0_5 = arith.constant 0 : index
    %c0_6 = arith.constant 0 : index
    %2 = vector.load %arg3[%c0_3, %c0_4, %c0_5, %c0_6] : memref<1x1x16x128xbf16, #tpu.memory_space<vmem>>, vector<1x1x16x128xbf16>
    %3 = vector.shape_cast %2 : vector<1x1x16x128xbf16> to vector<1x16x128xbf16>
    %c0_i32 = arith.constant 0 : i32
    %4 = arith.cmpi sgt, %arg1, %c0_i32 : i32
    %5 = arith.extui %4 : i1 to i32
    %6 = arith.sitofp %5 : i32 to f32
    %7 = arith.truncf %6 : f32 to bf16
    %8 = vector.broadcast %7 : bf16 to vector<1x16x128xbf16>
    %9 = arith.mulf %3, %8 : vector<1x16x128xbf16>
    %c0_7 = arith.constant 0 : index
    %c0_8 = arith.constant 0 : index
    %c0_9 = arith.constant 0 : index
    %c0_10 = arith.constant 0 : index
    %10 = vector.load %arg4[%c0_7, %c0_8, %c0_9, %c0_10] : memref<1x1x16x128xbf16, #tpu.memory_space<vmem>>, vector<1x1x16x128xbf16>
    %11 = vector.shape_cast %10 : vector<1x1x16x128xbf16> to vector<1x16x128xbf16>
    %c0_i32_11 = arith.constant 0 : i32
    %12 = arith.cmpi slt, %arg1, %c0_i32_11 : i32
    %13 = arith.extui %12 : i1 to i32
    %14 = arith.sitofp %13 : i32 to f32
    %15 = arith.truncf %14 : f32 to bf16
    %16 = vector.broadcast %15 : bf16 to vector<1x16x128xbf16>
    %17 = arith.mulf %11, %16 : vector<1x16x128xbf16>
    %18 = tpu.concatenate %9, %1, %17 in 0 : vector<1x16x128xbf16>, vector<16x16x128xbf16>, vector<1x16x128xbf16> -> vector<18x16x128xbf16>
    %cst = arith.constant 0.000000e+00 : bf16
    %19 = vector.broadcast %cst : bf16 to vector<18x1x128xbf16>
    %20 = tpu.concatenate %19, %18, %19 in 1 : vector<18x1x128xbf16>, vector<18x16x128xbf16>, vector<18x1x128xbf16> -> vector<18x18x128xbf16>
    %21 = vector.extract_strided_slice %20 {offsets = [0, 0, 0], sizes = [18, 16, 128], strides = [1, 1, 1]} : vector<18x18x128xbf16> to vector<18x16x128xbf16>
    %22 = vector.extract_strided_slice %20 {offsets = [0, 1, 0], sizes = [18, 16, 128], strides = [1, 1, 1]} : vector<18x18x128xbf16> to vector<18x16x128xbf16>
    %23 = vector.extract_strided_slice %20 {offsets = [0, 2, 0], sizes = [18, 16, 128], strides = [1, 1, 1]} : vector<18x18x128xbf16> to vector<18x16x128xbf16>
    %24 = tpu.concatenate %21, %22, %23 in 2 : vector<18x16x128xbf16>, vector<18x16x128xbf16>, vector<18x16x128xbf16> -> vector<18x16x384xbf16>
    %cst_12 = arith.constant 0.000000e+00 : f32
    %25 = vector.broadcast %cst_12 : f32 to vector<256x128xf32>
    %26 = vector.extract_strided_slice %24 {offsets = [0, 0, 0], sizes = [16, 16, 384], strides = [1, 1, 1]} : vector<18x16x384xbf16> to vector<16x16x384xbf16>
    %27 = vector.shape_cast %26 : vector<16x16x384xbf16> to vector<256x384xbf16>
    %c0_13 = arith.constant 0 : index
    %c0_14 = arith.constant 0 : index
    %c0_15 = arith.constant 0 : index
    %28 = vector.load %arg5[%c0_13, %c0_14, %c0_15] : memref<3x384x128xbf16, #tpu.memory_space<vmem>>, vector<1x384x128xbf16>
    %29 = vector.shape_cast %28 : vector<1x384x128xbf16> to vector<384x128xbf16>
    %cst_16 = arith.constant dense<0.000000e+00> : vector<256x128xf32>
    %30 = tpu.matmul %27, %29, %cst_16 {dimension_numbers = #tpu.dot_dimension_numbers<[1], [0], [0], [1], [0, 0, 1, 1], [], []>} : vector<256x384xbf16>, vector<384x128xbf16>, vector<256x128xf32> -> vector<256x128xf32>
    %31 = arith.addf %25, %30 : vector<256x128xf32>
    %32 = vector.extract_strided_slice %24 {offsets = [1, 0, 0], sizes = [16, 16, 384], strides = [1, 1, 1]} : vector<18x16x384xbf16> to vector<16x16x384xbf16>
    %33 = vector.shape_cast %32 : vector<16x16x384xbf16> to vector<256x384xbf16>
    %c1 = arith.constant 1 : index
    %c0_17 = arith.constant 0 : index
    %c0_18 = arith.constant 0 : index
    %34 = vector.load %arg5[%c1, %c0_17, %c0_18] : memref<3x384x128xbf16, #tpu.memory_space<vmem>>, vector<1x384x128xbf16>
    %35 = vector.shape_cast %34 : vector<1x384x128xbf16> to vector<384x128xbf16>
    %cst_19 = arith.constant dense<0.000000e+00> : vector<256x128xf32>
    %36 = tpu.matmul %33, %35, %cst_19 {dimension_numbers = #tpu.dot_dimension_numbers<[1], [0], [0], [1], [0, 0, 1, 1], [], []>} : vector<256x384xbf16>, vector<384x128xbf16>, vector<256x128xf32> -> vector<256x128xf32>
    %37 = arith.addf %31, %36 : vector<256x128xf32>
    %38 = vector.extract_strided_slice %24 {offsets = [2, 0, 0], sizes = [16, 16, 384], strides = [1, 1, 1]} : vector<18x16x384xbf16> to vector<16x16x384xbf16>
    %39 = vector.shape_cast %38 : vector<16x16x384xbf16> to vector<256x384xbf16>
    %c2 = arith.constant 2 : index
    %c0_20 = arith.constant 0 : index
    %c0_21 = arith.constant 0 : index
    %40 = vector.load %arg5[%c2, %c0_20, %c0_21] : memref<3x384x128xbf16, #tpu.memory_space<vmem>>, vector<1x384x128xbf16>
    %41 = vector.shape_cast %40 : vector<1x384x128xbf16> to vector<384x128xbf16>
    %cst_22 = arith.constant dense<0.000000e+00> : vector<256x128xf32>
    %42 = tpu.matmul %39, %41, %cst_22 {dimension_numbers = #tpu.dot_dimension_numbers<[1], [0], [0], [1], [0, 0, 1, 1], [], []>} : vector<256x384xbf16>, vector<384x128xbf16>, vector<256x128xf32> -> vector<256x128xf32>
    %43 = arith.addf %37, %42 : vector<256x128xf32>
    %44 = vector.shape_cast %43 : vector<256x128xf32> to vector<1x16x16x128xf32>
    %45 = arith.truncf %44 : vector<1x16x16x128xf32> to vector<1x16x16x128xbf16>
    %c0_23 = arith.constant 0 : index
    %c0_24 = arith.constant 0 : index
    %c0_25 = arith.constant 0 : index
    %c0_26 = arith.constant 0 : index
    %46 = vector.load %arg6[%c0_23, %c0_24, %c0_25, %c0_26] : memref<1x16x16x128xbf16, #tpu.memory_space<vmem>>, vector<1x16x16x128xbf16>
    tpu.vector_store %arg6[%c0_23, %c0_24, %c0_25, %c0_26], %45 {strides = array<i32>} : memref<1x16x16x128xbf16, #tpu.memory_space<vmem>>, vector<1x16x16x128xbf16>,
    %cst_27 = arith.constant dense<0.000000e+00> : vector<128xf32>
    %47 = vector.multi_reduction <add>, %43, %cst_27 [0] : vector<256x128xf32> to vector<128xf32>
    %48 = vector.shape_cast %47 : vector<128xf32> to vector<1x128xf32>
    %49 = arith.mulf %43, %43 : vector<256x128xf32>
    %cst_28 = arith.constant dense<0.000000e+00> : vector<128xf32>
    %50 = vector.multi_reduction <add>, %49, %cst_28 [0] : vector<256x128xf32> to vector<128xf32>
    %51 = vector.shape_cast %50 : vector<128xf32> to vector<1x128xf32>
    %cst_29 = arith.constant 0.000000e+00 : f32
    %52 = vector.broadcast %cst_29 : f32 to vector<6x128xf32>
    %53 = tpu.concatenate %48, %51, %52 in 0 : vector<1x128xf32>, vector<1x128xf32>, vector<6x128xf32> -> vector<8x128xf32>
    %c0_30 = arith.constant 0 : index
    %c0_31 = arith.constant 0 : index
    %54 = vector.load %arg7[%c0_30, %c0_31] : memref<8x128xf32, #tpu.memory_space<vmem>>, vector<8x128xf32>
    tpu.vector_store %arg7[%c0_30, %c0_31], %53 {strides = array<i32>} : memref<8x128xf32, #tpu.memory_space<vmem>>, vector<8x128xf32>,
    return
  }
  func.func @transform_0(%arg0: i32, %arg1: i32) -> (i32, i32, i32, i32) {
    %c0_i32 = arith.constant 0 : i32
    %c0_i32_0 = arith.constant 0 : i32
    %c0_i32_1 = arith.constant 0 : i32
    return %arg0, %arg1, %c0_i32, %c0_i32_0 : i32, i32, i32, i32
  }
  func.func @transform_1(%arg0: i32, %arg1: i32) -> (i32, i32, i32, i32) {
    %c16_i32 = arith.constant 16 : i32
    %0 = arith.muli %arg1, %c16_i32 : i32
    %c1_i32 = arith.constant 1 : i32
    %1 = arith.subi %0, %c1_i32 : i32
    %c0_i32 = arith.constant 0 : i32
    %2 = arith.maxsi %1, %c0_i32 : i32
    %c0_i32_0 = arith.constant 0 : i32
    %c0_i32_1 = arith.constant 0 : i32
    %c0_i32_2 = arith.constant 0 : i32
    return %arg0, %2, %c0_i32_0, %c0_i32_1 : i32, i32, i32, i32
  }
  func.func @transform_2(%arg0: i32, %arg1: i32) -> (i32, i32, i32, i32) {
    %c1_i32 = arith.constant 1 : i32
    %0 = arith.addi %arg1, %c1_i32 : i32
    %c16_i32 = arith.constant 16 : i32
    %1 = arith.muli %0, %c16_i32 : i32
    %c15_i32 = arith.constant 15 : i32
    %2 = arith.minsi %1, %c15_i32 : i32
    %c0_i32 = arith.constant 0 : i32
    %c0_i32_0 = arith.constant 0 : i32
    %c0_i32_1 = arith.constant 0 : i32
    return %arg0, %2, %c0_i32, %c0_i32_0 : i32, i32, i32, i32
  }
  func.func @transform_3(%arg0: i32, %arg1: i32) -> (i32, i32, i32) {
    %c0_i32 = arith.constant 0 : i32
    %c0_i32_0 = arith.constant 0 : i32
    %c0_i32_1 = arith.constant 0 : i32
    %c0_i32_2 = arith.constant 0 : i32
    return %c0_i32, %c0_i32_0, %c0_i32_1 : i32, i32, i32
  }
  func.func @transform_4(%arg0: i32, %arg1: i32) -> (i32, i32, i32, i32) {
    %c0_i32 = arith.constant 0 : i32
    %c0_i32_0 = arith.constant 0 : i32
    %c0_i32_1 = arith.constant 0 : i32
    return %arg0, %arg1, %c0_i32, %c0_i32_0 : i32, i32, i32, i32
  }
  func.func @transform_5(%arg0: i32, %arg1: i32) -> (i32, i32) {
    %c1_i32 = arith.constant 1 : i32
    %0 = arith.muli %arg0, %c1_i32 : i32
    %1 = arith.addi %0, %arg1 : i32
    %c0_i32 = arith.constant 0 : i32
    %c0_i32_0 = arith.constant 0 : i32
    return %1, %c0_i32 : i32, i32
  }
}

module attributes {stable_mosaic.version = 11 : i64} {
  func.func @_conv3x3_stats_kernel(%arg0: i32, %arg1: i32, %arg2: memref<1x16x16x128xbf16, #tpu.memory_space<vmem>>, %arg3: memref<1x1x16x128xbf16, #tpu.memory_space<vmem>>, %arg4: memref<1x1x16x128xbf16, #tpu.memory_space<vmem>>, %arg5: memref<3x384x128xbf16, #tpu.memory_space<vmem>>, %arg6: memref<1x128xf32, #tpu.memory_space<vmem>>, %arg7: memref<1x128xf32, #tpu.memory_space<vmem>>, %arg8: memref<1x16x16x128xf32, #tpu.memory_space<vmem>>, %arg9: memref<8x128xf32, #tpu.memory_space<vmem>>) attributes {dimension_semantics = [#tpu.dimension_semantics<parallel>, #tpu.dimension_semantics<parallel>], iteration_bounds = array<i64: 2, 1>, scalar_prefetch = 0 : i64, scratch_operands = 0 : i64, tpu.core_type = #tpu.core_type<tc>, window_params = [{transform_indices = @transform_0, window_bounds = array<i64: 1, 16, 16, 128>}, {transform_indices = @transform_1, window_bounds = array<i64: 1, 1, 16, 128>}, {transform_indices = @transform_2, window_bounds = array<i64: 1, 1, 16, 128>}, {pipeline_mode = #tpu.pipeline_mode<synchronous>, transform_indices = @transform_3, window_bounds = array<i64: 3, 384, 128>}, {pipeline_mode = #tpu.pipeline_mode<synchronous>, transform_indices = @transform_4, window_bounds = array<i64: 1, 128>}, {pipeline_mode = #tpu.pipeline_mode<synchronous>, transform_indices = @transform_5, window_bounds = array<i64: 1, 128>}, {transform_indices = @transform_6, window_bounds = array<i64: 1, 16, 16, 128>}, {transform_indices = @transform_7, window_bounds = array<i64: 8, 128>}]} {
    %c0 = arith.constant 0 : index
    %c0_0 = arith.constant 0 : index
    %c0_1 = arith.constant 0 : index
    %c0_2 = arith.constant 0 : index
    %0 = vector.load %arg2[%c0, %c0_0, %c0_1, %c0_2] : memref<1x16x16x128xbf16, #tpu.memory_space<vmem>>, vector<1x16x16x128xbf16>
    %1 = vector.shape_cast %0 : vector<1x16x16x128xbf16> to vector<16x16x128xbf16>
    %2 = arith.extf %1 : vector<16x16x128xbf16> to vector<16x16x128xf32>
    %c0_3 = arith.constant 0 : index
    %c0_4 = arith.constant 0 : index
    %3 = vector.load %arg6[%c0_3, %c0_4] : memref<1x128xf32, #tpu.memory_space<vmem>>, vector<1x128xf32>
    %4 = vector.shape_cast %3 : vector<1x128xf32> to vector<128xf32>
    %5 = vector.shape_cast %4 : vector<128xf32> to vector<1x1x128xf32>
    %6 = vector.broadcast %5 : vector<1x1x128xf32> to vector<16x16x128xf32>
    %7 = arith.mulf %2, %6 : vector<16x16x128xf32>
    %c0_5 = arith.constant 0 : index
    %c0_6 = arith.constant 0 : index
    %8 = vector.load %arg7[%c0_5, %c0_6] : memref<1x128xf32, #tpu.memory_space<vmem>>, vector<1x128xf32>
    %9 = vector.shape_cast %8 : vector<1x128xf32> to vector<128xf32>
    %10 = vector.shape_cast %9 : vector<128xf32> to vector<1x1x128xf32>
    %11 = vector.broadcast %10 : vector<1x1x128xf32> to vector<16x16x128xf32>
    %12 = arith.addf %7, %11 : vector<16x16x128xf32>
    %cst = arith.constant 0.000000e+00 : f32
    %13 = vector.broadcast %cst : f32 to vector<16x16x128xf32>
    %14 = arith.maximumf %12, %13 : vector<16x16x128xf32>
    %15 = arith.truncf %14 : vector<16x16x128xf32> to vector<16x16x128xbf16>
    %c0_7 = arith.constant 0 : index
    %c0_8 = arith.constant 0 : index
    %c0_9 = arith.constant 0 : index
    %c0_10 = arith.constant 0 : index
    %16 = vector.load %arg3[%c0_7, %c0_8, %c0_9, %c0_10] : memref<1x1x16x128xbf16, #tpu.memory_space<vmem>>, vector<1x1x16x128xbf16>
    %17 = vector.shape_cast %16 : vector<1x1x16x128xbf16> to vector<1x16x128xbf16>
    %18 = arith.extf %17 : vector<1x16x128xbf16> to vector<1x16x128xf32>
    %c0_11 = arith.constant 0 : index
    %c0_12 = arith.constant 0 : index
    %19 = vector.load %arg6[%c0_11, %c0_12] : memref<1x128xf32, #tpu.memory_space<vmem>>, vector<1x128xf32>
    %20 = vector.shape_cast %19 : vector<1x128xf32> to vector<128xf32>
    %21 = vector.shape_cast %20 : vector<128xf32> to vector<1x1x128xf32>
    %22 = vector.broadcast %21 : vector<1x1x128xf32> to vector<1x16x128xf32>
    %23 = arith.mulf %18, %22 : vector<1x16x128xf32>
    %c0_13 = arith.constant 0 : index
    %c0_14 = arith.constant 0 : index
    %24 = vector.load %arg7[%c0_13, %c0_14] : memref<1x128xf32, #tpu.memory_space<vmem>>, vector<1x128xf32>
    %25 = vector.shape_cast %24 : vector<1x128xf32> to vector<128xf32>
    %26 = vector.shape_cast %25 : vector<128xf32> to vector<1x1x128xf32>
    %27 = vector.broadcast %26 : vector<1x1x128xf32> to vector<1x16x128xf32>
    %28 = arith.addf %23, %27 : vector<1x16x128xf32>
    %cst_15 = arith.constant 0.000000e+00 : f32
    %29 = vector.broadcast %cst_15 : f32 to vector<1x16x128xf32>
    %30 = arith.maximumf %28, %29 : vector<1x16x128xf32>
    %31 = arith.truncf %30 : vector<1x16x128xf32> to vector<1x16x128xbf16>
    %c0_i32 = arith.constant 0 : i32
    %32 = arith.cmpi sgt, %arg1, %c0_i32 : i32
    %33 = arith.extui %32 : i1 to i32
    %34 = arith.sitofp %33 : i32 to f32
    %35 = arith.truncf %34 : f32 to bf16
    %36 = vector.broadcast %35 : bf16 to vector<1x16x128xbf16>
    %37 = arith.mulf %31, %36 : vector<1x16x128xbf16>
    %c0_16 = arith.constant 0 : index
    %c0_17 = arith.constant 0 : index
    %c0_18 = arith.constant 0 : index
    %c0_19 = arith.constant 0 : index
    %38 = vector.load %arg4[%c0_16, %c0_17, %c0_18, %c0_19] : memref<1x1x16x128xbf16, #tpu.memory_space<vmem>>, vector<1x1x16x128xbf16>
    %39 = vector.shape_cast %38 : vector<1x1x16x128xbf16> to vector<1x16x128xbf16>
    %40 = arith.extf %39 : vector<1x16x128xbf16> to vector<1x16x128xf32>
    %c0_20 = arith.constant 0 : index
    %c0_21 = arith.constant 0 : index
    %41 = vector.load %arg6[%c0_20, %c0_21] : memref<1x128xf32, #tpu.memory_space<vmem>>, vector<1x128xf32>
    %42 = vector.shape_cast %41 : vector<1x128xf32> to vector<128xf32>
    %43 = vector.shape_cast %42 : vector<128xf32> to vector<1x1x128xf32>
    %44 = vector.broadcast %43 : vector<1x1x128xf32> to vector<1x16x128xf32>
    %45 = arith.mulf %40, %44 : vector<1x16x128xf32>
    %c0_22 = arith.constant 0 : index
    %c0_23 = arith.constant 0 : index
    %46 = vector.load %arg7[%c0_22, %c0_23] : memref<1x128xf32, #tpu.memory_space<vmem>>, vector<1x128xf32>
    %47 = vector.shape_cast %46 : vector<1x128xf32> to vector<128xf32>
    %48 = vector.shape_cast %47 : vector<128xf32> to vector<1x1x128xf32>
    %49 = vector.broadcast %48 : vector<1x1x128xf32> to vector<1x16x128xf32>
    %50 = arith.addf %45, %49 : vector<1x16x128xf32>
    %cst_24 = arith.constant 0.000000e+00 : f32
    %51 = vector.broadcast %cst_24 : f32 to vector<1x16x128xf32>
    %52 = arith.maximumf %50, %51 : vector<1x16x128xf32>
    %53 = arith.truncf %52 : vector<1x16x128xf32> to vector<1x16x128xbf16>
    %c0_i32_25 = arith.constant 0 : i32
    %54 = arith.cmpi slt, %arg1, %c0_i32_25 : i32
    %55 = arith.extui %54 : i1 to i32
    %56 = arith.sitofp %55 : i32 to f32
    %57 = arith.truncf %56 : f32 to bf16
    %58 = vector.broadcast %57 : bf16 to vector<1x16x128xbf16>
    %59 = arith.mulf %53, %58 : vector<1x16x128xbf16>
    %60 = tpu.concatenate %37, %15, %59 in 0 : vector<1x16x128xbf16>, vector<16x16x128xbf16>, vector<1x16x128xbf16> -> vector<18x16x128xbf16>
    %cst_26 = arith.constant 0.000000e+00 : bf16
    %61 = vector.broadcast %cst_26 : bf16 to vector<18x1x128xbf16>
    %62 = tpu.concatenate %61, %60, %61 in 1 : vector<18x1x128xbf16>, vector<18x16x128xbf16>, vector<18x1x128xbf16> -> vector<18x18x128xbf16>
    %63 = vector.extract_strided_slice %62 {offsets = [0, 0, 0], sizes = [18, 16, 128], strides = [1, 1, 1]} : vector<18x18x128xbf16> to vector<18x16x128xbf16>
    %64 = vector.extract_strided_slice %62 {offsets = [0, 1, 0], sizes = [18, 16, 128], strides = [1, 1, 1]} : vector<18x18x128xbf16> to vector<18x16x128xbf16>
    %65 = vector.extract_strided_slice %62 {offsets = [0, 2, 0], sizes = [18, 16, 128], strides = [1, 1, 1]} : vector<18x18x128xbf16> to vector<18x16x128xbf16>
    %66 = tpu.concatenate %63, %64, %65 in 2 : vector<18x16x128xbf16>, vector<18x16x128xbf16>, vector<18x16x128xbf16> -> vector<18x16x384xbf16>
    %cst_27 = arith.constant 0.000000e+00 : f32
    %67 = vector.broadcast %cst_27 : f32 to vector<256x128xf32>
    %68 = vector.extract_strided_slice %66 {offsets = [0, 0, 0], sizes = [16, 16, 384], strides = [1, 1, 1]} : vector<18x16x384xbf16> to vector<16x16x384xbf16>
    %69 = vector.shape_cast %68 : vector<16x16x384xbf16> to vector<256x384xbf16>
    %c0_28 = arith.constant 0 : index
    %c0_29 = arith.constant 0 : index
    %c0_30 = arith.constant 0 : index
    %70 = vector.load %arg5[%c0_28, %c0_29, %c0_30] : memref<3x384x128xbf16, #tpu.memory_space<vmem>>, vector<1x384x128xbf16>
    %71 = vector.shape_cast %70 : vector<1x384x128xbf16> to vector<384x128xbf16>
    %cst_31 = arith.constant dense<0.000000e+00> : vector<256x128xf32>
    %72 = tpu.matmul %69, %71, %cst_31 {dimension_numbers = #tpu.dot_dimension_numbers<[1], [0], [0], [1], [0, 0, 1, 1], [], []>} : vector<256x384xbf16>, vector<384x128xbf16>, vector<256x128xf32> -> vector<256x128xf32>
    %73 = arith.addf %67, %72 : vector<256x128xf32>
    %74 = vector.extract_strided_slice %66 {offsets = [1, 0, 0], sizes = [16, 16, 384], strides = [1, 1, 1]} : vector<18x16x384xbf16> to vector<16x16x384xbf16>
    %75 = vector.shape_cast %74 : vector<16x16x384xbf16> to vector<256x384xbf16>
    %c1 = arith.constant 1 : index
    %c0_32 = arith.constant 0 : index
    %c0_33 = arith.constant 0 : index
    %76 = vector.load %arg5[%c1, %c0_32, %c0_33] : memref<3x384x128xbf16, #tpu.memory_space<vmem>>, vector<1x384x128xbf16>
    %77 = vector.shape_cast %76 : vector<1x384x128xbf16> to vector<384x128xbf16>
    %cst_34 = arith.constant dense<0.000000e+00> : vector<256x128xf32>
    %78 = tpu.matmul %75, %77, %cst_34 {dimension_numbers = #tpu.dot_dimension_numbers<[1], [0], [0], [1], [0, 0, 1, 1], [], []>} : vector<256x384xbf16>, vector<384x128xbf16>, vector<256x128xf32> -> vector<256x128xf32>
    %79 = arith.addf %73, %78 : vector<256x128xf32>
    %80 = vector.extract_strided_slice %66 {offsets = [2, 0, 0], sizes = [16, 16, 384], strides = [1, 1, 1]} : vector<18x16x384xbf16> to vector<16x16x384xbf16>
    %81 = vector.shape_cast %80 : vector<16x16x384xbf16> to vector<256x384xbf16>
    %c2 = arith.constant 2 : index
    %c0_35 = arith.constant 0 : index
    %c0_36 = arith.constant 0 : index
    %82 = vector.load %arg5[%c2, %c0_35, %c0_36] : memref<3x384x128xbf16, #tpu.memory_space<vmem>>, vector<1x384x128xbf16>
    %83 = vector.shape_cast %82 : vector<1x384x128xbf16> to vector<384x128xbf16>
    %cst_37 = arith.constant dense<0.000000e+00> : vector<256x128xf32>
    %84 = tpu.matmul %81, %83, %cst_37 {dimension_numbers = #tpu.dot_dimension_numbers<[1], [0], [0], [1], [0, 0, 1, 1], [], []>} : vector<256x384xbf16>, vector<384x128xbf16>, vector<256x128xf32> -> vector<256x128xf32>
    %85 = arith.addf %79, %84 : vector<256x128xf32>
    %86 = vector.shape_cast %85 : vector<256x128xf32> to vector<1x16x16x128xf32>
    %c0_38 = arith.constant 0 : index
    %c0_39 = arith.constant 0 : index
    %c0_40 = arith.constant 0 : index
    %c0_41 = arith.constant 0 : index
    %87 = vector.load %arg8[%c0_38, %c0_39, %c0_40, %c0_41] : memref<1x16x16x128xf32, #tpu.memory_space<vmem>>, vector<1x16x16x128xf32>
    tpu.vector_store %arg8[%c0_38, %c0_39, %c0_40, %c0_41], %86 {strides = array<i32>} : memref<1x16x16x128xf32, #tpu.memory_space<vmem>>, vector<1x16x16x128xf32>,
    %cst_42 = arith.constant dense<0.000000e+00> : vector<128xf32>
    %88 = vector.multi_reduction <add>, %85, %cst_42 [0] : vector<256x128xf32> to vector<128xf32>
    %89 = vector.shape_cast %88 : vector<128xf32> to vector<1x128xf32>
    %90 = arith.mulf %85, %85 : vector<256x128xf32>
    %cst_43 = arith.constant dense<0.000000e+00> : vector<128xf32>
    %91 = vector.multi_reduction <add>, %90, %cst_43 [0] : vector<256x128xf32> to vector<128xf32>
    %92 = vector.shape_cast %91 : vector<128xf32> to vector<1x128xf32>
    %cst_44 = arith.constant 0.000000e+00 : f32
    %93 = vector.broadcast %cst_44 : f32 to vector<6x128xf32>
    %94 = tpu.concatenate %89, %92, %93 in 0 : vector<1x128xf32>, vector<1x128xf32>, vector<6x128xf32> -> vector<8x128xf32>
    %c0_45 = arith.constant 0 : index
    %c0_46 = arith.constant 0 : index
    %95 = vector.load %arg9[%c0_45, %c0_46] : memref<8x128xf32, #tpu.memory_space<vmem>>, vector<8x128xf32>
    tpu.vector_store %arg9[%c0_45, %c0_46], %94 {strides = array<i32>} : memref<8x128xf32, #tpu.memory_space<vmem>>, vector<8x128xf32>,
    return
  }
  func.func @transform_0(%arg0: i32, %arg1: i32) -> (i32, i32, i32, i32) {
    %c0_i32 = arith.constant 0 : i32
    %c0_i32_0 = arith.constant 0 : i32
    %c0_i32_1 = arith.constant 0 : i32
    return %arg0, %arg1, %c0_i32, %c0_i32_0 : i32, i32, i32, i32
  }
  func.func @transform_1(%arg0: i32, %arg1: i32) -> (i32, i32, i32, i32) {
    %c16_i32 = arith.constant 16 : i32
    %0 = arith.muli %arg1, %c16_i32 : i32
    %c1_i32 = arith.constant 1 : i32
    %1 = arith.subi %0, %c1_i32 : i32
    %c0_i32 = arith.constant 0 : i32
    %2 = arith.maxsi %1, %c0_i32 : i32
    %c0_i32_0 = arith.constant 0 : i32
    %c0_i32_1 = arith.constant 0 : i32
    %c0_i32_2 = arith.constant 0 : i32
    return %arg0, %2, %c0_i32_0, %c0_i32_1 : i32, i32, i32, i32
  }
  func.func @transform_2(%arg0: i32, %arg1: i32) -> (i32, i32, i32, i32) {
    %c1_i32 = arith.constant 1 : i32
    %0 = arith.addi %arg1, %c1_i32 : i32
    %c16_i32 = arith.constant 16 : i32
    %1 = arith.muli %0, %c16_i32 : i32
    %c15_i32 = arith.constant 15 : i32
    %2 = arith.minsi %1, %c15_i32 : i32
    %c0_i32 = arith.constant 0 : i32
    %c0_i32_0 = arith.constant 0 : i32
    %c0_i32_1 = arith.constant 0 : i32
    return %arg0, %2, %c0_i32, %c0_i32_0 : i32, i32, i32, i32
  }
  func.func @transform_3(%arg0: i32, %arg1: i32) -> (i32, i32, i32) {
    %c0_i32 = arith.constant 0 : i32
    %c0_i32_0 = arith.constant 0 : i32
    %c0_i32_1 = arith.constant 0 : i32
    %c0_i32_2 = arith.constant 0 : i32
    return %c0_i32, %c0_i32_0, %c0_i32_1 : i32, i32, i32
  }
  func.func @transform_4(%arg0: i32, %arg1: i32) -> (i32, i32) {
    %c0_i32 = arith.constant 0 : i32
    %c0_i32_0 = arith.constant 0 : i32
    %c0_i32_1 = arith.constant 0 : i32
    return %c0_i32, %c0_i32_0 : i32, i32
  }
  func.func @transform_5(%arg0: i32, %arg1: i32) -> (i32, i32) {
    %c0_i32 = arith.constant 0 : i32
    %c0_i32_0 = arith.constant 0 : i32
    %c0_i32_1 = arith.constant 0 : i32
    return %c0_i32, %c0_i32_0 : i32, i32
  }
  func.func @transform_6(%arg0: i32, %arg1: i32) -> (i32, i32, i32, i32) {
    %c0_i32 = arith.constant 0 : i32
    %c0_i32_0 = arith.constant 0 : i32
    %c0_i32_1 = arith.constant 0 : i32
    return %arg0, %arg1, %c0_i32, %c0_i32_0 : i32, i32, i32, i32
  }
  func.func @transform_7(%arg0: i32, %arg1: i32) -> (i32, i32) {
    %c1_i32 = arith.constant 1 : i32
    %0 = arith.muli %arg0, %c1_i32 : i32
    %1 = arith.addi %0, %arg1 : i32
    %c0_i32 = arith.constant 0 : i32
    %c0_i32_0 = arith.constant 0 : i32
    return %1, %c0_i32 : i32, i32
  }
}

module attributes {stable_mosaic.version = 11 : i64} {
  func.func @_bn_add_relu_kernel(%arg0: i32, %arg1: memref<512x128xf32, #tpu.memory_space<vmem>>, %arg2: memref<512x128xf32, #tpu.memory_space<vmem>>, %arg3: memref<1x128xf32, #tpu.memory_space<vmem>>, %arg4: memref<1x128xf32, #tpu.memory_space<vmem>>, %arg5: memref<512x128xf32, #tpu.memory_space<vmem>>) attributes {dimension_semantics = [#tpu.dimension_semantics<parallel>], iteration_bounds = array<i64: 1>, scalar_prefetch = 0 : i64, scratch_operands = 0 : i64, tpu.core_type = #tpu.core_type<tc>, window_params = [{transform_indices = @transform_0, window_bounds = array<i64: 512, 128>}, {transform_indices = @transform_1, window_bounds = array<i64: 512, 128>}, {pipeline_mode = #tpu.pipeline_mode<synchronous>, transform_indices = @transform_2, window_bounds = array<i64: 1, 128>}, {pipeline_mode = #tpu.pipeline_mode<synchronous>, transform_indices = @transform_3, window_bounds = array<i64: 1, 128>}, {transform_indices = @transform_4, window_bounds = array<i64: 512, 128>}]} {
    %c0 = arith.constant 0 : index
    %c0_0 = arith.constant 0 : index
    %0 = vector.load %arg1[%c0, %c0_0] : memref<512x128xf32, #tpu.memory_space<vmem>>, vector<512x128xf32>
    %c0_1 = arith.constant 0 : index
    %c0_2 = arith.constant 0 : index
    %1 = vector.load %arg3[%c0_1, %c0_2] : memref<1x128xf32, #tpu.memory_space<vmem>>, vector<1x128xf32>
    %2 = vector.broadcast %1 : vector<1x128xf32> to vector<512x128xf32>
    %3 = arith.mulf %0, %2 : vector<512x128xf32>
    %c0_3 = arith.constant 0 : index
    %c0_4 = arith.constant 0 : index
    %4 = vector.load %arg4[%c0_3, %c0_4] : memref<1x128xf32, #tpu.memory_space<vmem>>, vector<1x128xf32>
    %5 = vector.broadcast %4 : vector<1x128xf32> to vector<512x128xf32>
    %6 = arith.addf %3, %5 : vector<512x128xf32>
    %c0_5 = arith.constant 0 : index
    %c0_6 = arith.constant 0 : index
    %7 = vector.load %arg2[%c0_5, %c0_6] : memref<512x128xf32, #tpu.memory_space<vmem>>, vector<512x128xf32>
    %8 = arith.addf %6, %7 : vector<512x128xf32>
    %cst = arith.constant 0.000000e+00 : f32
    %9 = vector.broadcast %cst : f32 to vector<512x128xf32>
    %10 = arith.maximumf %8, %9 : vector<512x128xf32>
    %c0_7 = arith.constant 0 : index
    %c0_8 = arith.constant 0 : index
    %11 = vector.load %arg5[%c0_7, %c0_8] : memref<512x128xf32, #tpu.memory_space<vmem>>, vector<512x128xf32>
    tpu.vector_store %arg5[%c0_7, %c0_8], %10 {strides = array<i32>} : memref<512x128xf32, #tpu.memory_space<vmem>>, vector<512x128xf32>,
    return
  }
  func.func @transform_0(%arg0: i32) -> (i32, i32) {
    %c0_i32 = arith.constant 0 : i32
    %c0_i32_0 = arith.constant 0 : i32
    return %arg0, %c0_i32 : i32, i32
  }
  func.func @transform_1(%arg0: i32) -> (i32, i32) {
    %c0_i32 = arith.constant 0 : i32
    %c0_i32_0 = arith.constant 0 : i32
    return %arg0, %c0_i32 : i32, i32
  }
  func.func @transform_2(%arg0: i32) -> (i32, i32) {
    %c0_i32 = arith.constant 0 : i32
    %c0_i32_0 = arith.constant 0 : i32
    %c0_i32_1 = arith.constant 0 : i32
    return %c0_i32, %c0_i32_0 : i32, i32
  }
  func.func @transform_3(%arg0: i32) -> (i32, i32) {
    %c0_i32 = arith.constant 0 : i32
    %c0_i32_0 = arith.constant 0 : i32
    %c0_i32_1 = arith.constant 0 : i32
    return %c0_i32, %c0_i32_0 : i32, i32
  }
  func.func @transform_4(%arg0: i32) -> (i32, i32) {
    %c0_i32 = arith.constant 0 : i32
    %c0_i32_0 = arith.constant 0 : i32
    return %arg0, %c0_i32 : i32, i32
  }
}

</mosaic_0001>

<bundles_post_ra>
// kernel: resnet_block_forward.5
= control target key start
LH: loop header
LB: loop body
LE: loop exit
PB: predicated region body
PF: predicated region fallthrough
CT: control target
= control target key end

     0   :  { %s1224_s0 = inlined_call_operand.vmem [shape: f32[512,128], index: 0, kind: input, shape index: {}]   ;;  %s1225_s1 = inlined_call_operand.vmem [shape: f32[512,128], index: 1, kind: input, shape index: {}]   ;;  %s1226_s2 = inlined_call_operand.vmem [shape: f32[1,128], index: 2, kind: input, shape index: {}]   ;;  %s1227_s3 = inlined_call_operand.vmem [shape: f32[1,128], index: 3, kind: input, shape index: {}]   ;;  %s1228_s4 = inlined_call_operand.vmem [shape: f32[512,128], index: 4, kind: output, shape index: {}]  }
   0x1   :  { %v17_v0 = vld [vmem:[%s1224_s0] sm:$0xff]  ;;  %v18_v4 = vld [vmem:[%s1224_s0 + $0x8] sm:$0xff]  ;;  %v19_v7 = vld [vmem:[%s1224_s0 + $0x10] sm:$0xff] }
   0x2   :  { %v516_v1 = vld [vmem:[%s1226_s2] ss:$0 sm:$0xff]  ;;  %v20_v8 = vld [vmem:[%s1224_s0 + $0x18] sm:$0xff]  ;;  %v224_v10 = vld [vmem:[%s1225_s1 + $0x8] sm:$0xff] }
   0x3   :  { %v521_v2 = vld [vmem:[%s1227_s3] ss:$0 sm:$0xff]  ;;  %v88_v3 = vmul.f32 %v516_v1, %v17_v0  ;;  %v89_v6 = vmul.f32 %v516_v1, %v18_v4  ;;  %v90_v11 = vmul.f32 %v516_v1, %v19_v7  ;;  %v225_v12 = vld [vmem:[%s1225_s1 + $0x10] sm:$0xff]  ;;  %v91_v13 = vmul.f32 %v516_v1, %v20_v8  ;;  %v226_v16 = vld [vmem:[%s1225_s1 + $0x18] sm:$0xff] }
   0x4   :  { %v223_v5 = vld [vmem:[%s1225_s1] sm:$0xff]  ;;  %v22_v18 = vld [vmem:[%s1224_s0 + $0x28] sm:$0xff]  ;;  %v23_v19 = vld [vmem:[%s1224_s0 + $0x30] sm:$0xff] }
   0x5   :  { %v159_v9 = vadd.f32 %v521_v2, %v88_v3  ;;  %v21_v14 = vld [vmem:[%s1224_s0 + $0x20] sm:$0xff]  ;;  %v160_v15 = vadd.f32 %v521_v2, %v89_v6  ;;  %v161_v21 = vadd.f32 %v521_v2, %v90_v11  ;;  %v162_v22 = vadd.f32 %v521_v2, %v91_v13  ;;  %v24_v25 = vld [vmem:[%s1224_s0 + $0x38] sm:$0xff]  ;;  %v228_v28 = vld [vmem:[%s1225_s1 + $0x28] sm:$0xff] }
   0x6   :  { %v92_v17 = vmul.f32 %v516_v1, %v21_v14  ;;  %v227_v23 = vld [vmem:[%s1225_s1 + $0x20] sm:$0xff]  ;;  %v93_v24 = vmul.f32 %v516_v1, %v22_v18  ;;  %v94_v29 = vmul.f32 %v516_v1, %v23_v19  ;;  %v95_v30 = vmul.f32 %v516_v1, %v24_v25  ;;  %v229_v36 = vld [vmem:[%s1225_s1 + $0x30] sm:$0xff]  ;;  %v230_v37 = vld [vmem:[%s1225_s1 + $0x38] sm:$0xff] }
   0x7   :  { %v287_v20 = vadd.f32 %v223_v5, %v159_v9  ;;  %v288_v26 = vadd.f32 %v224_v10, %v160_v15  ;;  %v25_v31 = vld [vmem:[%s1224_s0 + $0x40] sm:$0xff]  ;;  %v289_v33 = vadd.f32 %v225_v12, %v161_v21  ;;  %v290_v34 = vadd.f32 %v226_v16, %v162_v22  ;;  %v26_v38 = vld [vmem:[%s1224_s0 + $0x48] sm:$0xff]  ;;  %v27_v43 = vld [vmem:[%s1224_s0 + $0x50] sm:$0xff] }
   0x8   :  { %v163_v27 = vadd.f32 %v521_v2, %v92_v17  ;;  %v164_v35 = vadd.f32 %v521_v2, %v93_v24  ;;  %v165_v41 = vadd.f32 %v521_v2, %v94_v29  ;;  %v166_v42 = vadd.f32 %v521_v2, %v95_v30  ;;  %v28_v44 = vld [vmem:[%s1224_s0 + $0x58] sm:$0xff]  ;;  %v29_v49 = vld [vmem:[%s1224_s0 + $0x60] sm:$0xff]  ;;  %v30_v55 = vld [vmem:[%s1224_s0 + $0x68] sm:$0xff] }
   0x9   :  { %v351_v32 = vmax.f32 %v287_v20, 0.0  ;;  %v352_v39 = vmax.f32 %v288_v26, 0.0  ;;  %v353_v45 = vmax.f32 %v289_v33, 0.0  ;;  %v354_v46 = vmax.f32 %v290_v34, 0.0  ;;  %v231_v53 = vld [vmem:[%s1225_s1 + $0x40] sm:$0xff]  ;;  %v232_v58 = vld [vmem:[%s1225_s1 + $0x48] sm:$0xff] }
   0xa   :  { %v291_v40 = vadd.f32 %v227_v23, %v163_v27  ;;  %v292_v47 = vadd.f32 %v228_v28, %v164_v35  ;;  %v96_v48 = vmul.f32 %v516_v1, %v25_v31  ;;  %v293_v51 = vadd.f32 %v229_v36, %v165_v41  ;;  %v31_v61 = vld [vmem:[%s1224_s0 + $0x70] sm:$0xff]  ;;  %v32_v62 = vld [vmem:[%s1224_s0 + $0x78] sm:$0xff]  ;;  %v235_v10 = vld [vmem:[%s1225_s1 + $0x60] sm:$0xff] }
   0xb   :  { %415 = vst [vmem:[%s1228_s4] sm:$0xff] %v351_v32  ;;  %416 = vst [vmem:[%s1228_s4 + $0x8] sm:$0xff] %v352_v39  ;;  %v294_v52 = vadd.f32 %v230_v37, %v166_v42  ;;  %v97_v54 = vmul.f32 %v516_v1, %v26_v38  ;;  %v98_v59 = vmul.f32 %v516_v1, %v27_v43  ;;  %v233_v4 = vld [vmem:[%s1225_s1 + $0x50] sm:$0xff]  ;;  %v234_v5 = vld [vmem:[%s1225_s1 + $0x58] sm:$0xff] }
   0xc   :  { %v355_v50 = vmax.f32 %v291_v40, 0.0  ;;  %417 = vst [vmem:[%s1228_s4 + $0x10] sm:$0xff] %v353_v45  ;;  %418 = vst [vmem:[%s1228_s4 + $0x18] sm:$0xff] %v354_v46  ;;  %v356_v56 = vmax.f32 %v292_v47, 0.0  ;;  %v167_v57 = vadd.f32 %v521_v2, %v96_v48  ;;  %v99_v60 = vmul.f32 %v516_v1, %v28_v44  ;;  %v236_v14 = vld [vmem:[%s1225_s1 + $0x68] sm:$0xff]  ;;  %v33_v17 = vld [vmem:[%s1224_s0 + $0x80] sm:$0xff] }
   0xd   :  { %v357_v63 = vmax.f32 %v293_v51, 0.0  ;;  %v358_v0 = vmax.f32 %v294_v52, 0.0  ;;  %v168_v3 = vadd.f32 %v521_v2, %v97_v54  ;;  %v100_v6 = vmul.f32 %v516_v1, %v29_v49  ;;  %v237_v22 = vld [vmem:[%s1225_s1 + $0x70] sm:$0xff]  ;;  %v238_v23 = vld [vmem:[%s1225_s1 + $0x78] sm:$0xff]  ;;  %v34_v24 = vld [vmem:[%s1224_s0 + $0x88] sm:$0xff] }
   0xe   :  { %419 = vst [vmem:[%s1228_s4 + $0x20] sm:$0xff] %v355_v50  ;;  %420 = vst [vmem:[%s1228_s4 + $0x28] sm:$0xff] %v356_v56  ;;  %v295_v7 = vadd.f32 %v231_v53, %v167_v57  ;;  %v169_v8 = vadd.f32 %v521_v2, %v98_v59  ;;  %v170_v9 = vadd.f32 %v521_v2, %v99_v60  ;;  %v35_v29 = vld [vmem:[%s1224_s0 + $0x90] sm:$0xff]  ;;  %v36_v30 = vld [vmem:[%s1224_s0 + $0x98] sm:$0xff] }
   0xf   :  { %v101_v11 = vmul.f32 %v516_v1, %v30_v55  ;;  %421 = vst [vmem:[%s1228_s4 + $0x30] sm:$0xff] %v357_v63  ;;  %422 = vst [vmem:[%s1228_s4 + $0x38] sm:$0xff] %v358_v0  ;;  %v296_v12 = vadd.f32 %v232_v58, %v168_v3  ;;  %v171_v13 = vadd.f32 %v521_v2, %v100_v6  ;;  %v37_v35 = vld [vmem:[%s1224_s0 + $0xa0] sm:$0xff]  ;;  %v38_v41 = vld [vmem:[%s1224_s0 + $0xa8] sm:$0xff] }
  0x10   :  { %v102_v15 = vmul.f32 %v516_v1, %v31_v61  ;;  %v103_v16 = vmul.f32 %v516_v1, %v32_v62  ;;  %v359_v18 = vmax.f32 %v295_v7, 0.0  ;;  %v297_v19 = vadd.f32 %v233_v4, %v169_v8  ;;  %v239_v39 = vld [vmem:[%s1225_s1 + $0x80] sm:$0xff]  ;;  %v240_v44 = vld [vmem:[%s1225_s1 + $0x88] sm:$0xff]  ;;  %v39_v47 = vld [vmem:[%s1224_s0 + $0xb0] sm:$0xff] }
  0x11   :  { %v298_v20 = vadd.f32 %v234_v5, %v170_v9  ;;  %v172_v21 = vadd.f32 %v521_v2, %v101_v11  ;;  %v360_v25 = vmax.f32 %v296_v12, 0.0  ;;  %v299_v26 = vadd.f32 %v235_v10, %v171_v13  ;;  %v40_v48 = vld [vmem:[%s1224_s0 + $0xb8] sm:$0xff]  ;;  %v241_v52 = vld [vmem:[%s1225_s1 + $0x90] sm:$0xff]  ;;  %v243_v58 = vld [vmem:[%s1225_s1 + $0xa0] sm:$0xff] }
  0x12   :  { %v173_v27 = vadd.f32 %v521_v2, %v102_v15  ;;  %v174_v28 = vadd.f32 %v521_v2, %v103_v16  ;;  %423 = vst [vmem:[%s1228_s4 + $0x40] sm:$0xff] %v359_v18  ;;  %v361_v31 = vmax.f32 %v297_v19, 0.0  ;;  %v104_v34 = vmul.f32 %v516_v1, %v33_v17  ;;  %v242_v53 = vld [vmem:[%s1225_s1 + $0x98] sm:$0xff]  ;;  %v244_v62 = vld [vmem:[%s1225_s1 + $0xa8] sm:$0xff]  ;;  %v41_v3 = vld [vmem:[%s1224_s0 + $0xc0] sm:$0xff] }
  0x13   :  { %v362_v32 = vmax.f32 %v298_v20, 0.0  ;;  %v300_v33 = vadd.f32 %v236_v14, %v172_v21  ;;  %424 = vst [vmem:[%s1228_s4 + $0x48] sm:$0xff] %v360_v25  ;;  %v363_v36 = vmax.f32 %v299_v26, 0.0  ;;  %v105_v40 = vmul.f32 %v516_v1, %v34_v24  ;;  %v245_v8 = vld [vmem:[%s1225_s1 + $0xb0] sm:$0xff]  ;;  %v246_v9 = vld [vmem:[%s1225_s1 + $0xb8] sm:$0xff]  ;;  %v42_v10 = vld [vmem:[%s1224_s0 + $0xc8] sm:$0xff] }
  0x14   :  { %v301_v37 = vadd.f32 %v237_v22, %v173_v27  ;;  %v302_v38 = vadd.f32 %v238_v23, %v174_v28  ;;  %425 = vst [vmem:[%s1228_s4 + $0x50] sm:$0xff] %v361_v31  ;;  %v175_v43 = vadd.f32 %v521_v2, %v104_v34  ;;  %v106_v45 = vmul.f32 %v516_v1, %v35_v29  ;;  %v43_v15 = vld [vmem:[%s1224_s0 + $0xd0] sm:$0xff]  ;;  %v44_v16 = vld [vmem:[%s1224_s0 + $0xd8] sm:$0xff]  ;;  %v45_v21 = vld [vmem:[%s1224_s0 + $0xe0] sm:$0xff] }
  0x15   :  { %426 = vst [vmem:[%s1228_s4 + $0x58] sm:$0xff] %v362_v32  ;;  %v364_v42 = vmax.f32 %v300_v33, 0.0  ;;  %v107_v46 = vmul.f32 %v516_v1, %v36_v30  ;;  %427 = vst [vmem:[%s1228_s4 + $0x60] sm:$0xff] %v363_v36  ;;  %v176_v51 = vadd.f32 %v521_v2, %v105_v40  ;;  %v108_v54 = vmul.f32 %v516_v1, %v37_v35  ;;  %v247_v25 = vld [vmem:[%s1225_s1 + $0xc0] sm:$0xff]  ;;  %v46_v27 = vld [vmem:[%s1224_s0 + $0xe8] sm:$0xff] }
  0x16   :  { %v365_v49 = vmax.f32 %v301_v37, 0.0  ;;  %v366_v50 = vmax.f32 %v302_v38, 0.0  ;;  %v303_v55 = vadd.f32 %v239_v39, %v175_v43  ;;  %v177_v56 = vadd.f32 %v521_v2, %v106_v45  ;;  %v248_v30 = vld [vmem:[%s1225_s1 + $0xc8] sm:$0xff]  ;;  %v47_v33 = vld [vmem:[%s1224_s0 + $0xf0] sm:$0xff]  ;;  %v48_v34 = vld [vmem:[%s1224_s0 + $0xf8] sm:$0xff] }
  0x17   :  { %428 = vst [vmem:[%s1228_s4 + $0x68] sm:$0xff] %v364_v42  ;;  %v178_v57 = vadd.f32 %v521_v2, %v107_v46  ;;  %v109_v59 = vmul.f32 %v516_v1, %v38_v41  ;;  %v304_v60 = vadd.f32 %v240_v44, %v176_v51  ;;  %v179_v61 = vadd.f32 %v521_v2, %v108_v54  ;;  %v249_v38 = vld [vmem:[%s1225_s1 + $0xd0] sm:$0xff]  ;;  %v250_v39 = vld [vmem:[%s1225_s1 + $0xd8] sm:$0xff]  ;;  %v251_v44 = vld [vmem:[%s1225_s1 + $0xe0] sm:$0xff] }
  0x18   :  { %429 = vst [vmem:[%s1228_s4 + $0x70] sm:$0xff] %v365_v49  ;;  %430 = vst [vmem:[%s1228_s4 + $0x78] sm:$0xff] %v366_v50  ;;  %v110_v63 = vmul.f32 %v516_v1, %v39_v47  ;;  %v111_v0 = vmul.f32 %v516_v1, %v40_v48  ;;  %v367_v4 = vmax.f32 %v303_v55, 0.0  ;;  %v305_v5 = vadd.f32 %v241_v52, %v177_v56  ;;  %v252_v48 = vld [vmem:[%s1225_s1 + $0xe8] sm:$0xff]  ;;  %v49_v51 = vld [vmem:[%s1224_s0 + $0x100] sm:$0xff] }
  0x19   :  { %v306_v6 = vadd.f32 %v242_v53, %v178_v57  ;;  %v180_v7 = vadd.f32 %v521_v2, %v109_v59  ;;  %v368_v11 = vmax.f32 %v304_v60, 0.0  ;;  %v307_v12 = vadd.f32 %v243_v58, %v179_v61  ;;  %v253_v56 = vld [vmem:[%s1225_s1 + $0xf0] sm:$0xff]  ;;  %v254_v57 = vld [vmem:[%s1225_s1 + $0xf8] sm:$0xff]  ;;  %v50_v58 = vld [vmem:[%s1224_s0 + $0x108] sm:$0xff] }
  0x1a   :  { %v181_v13 = vadd.f32 %v521_v2, %v110_v63  ;;  %v182_v14 = vadd.f32 %v521_v2, %v111_v0  ;;  %431 = vst [vmem:[%s1228_s4 + $0x80] sm:$0xff] %v367_v4  ;;  %v369_v17 = vmax.f32 %v305_v5, 0.0  ;;  %v112_v20 = vmul.f32 %v516_v1, %v41_v3  ;;  %v51_v63 = vld [vmem:[%s1224_s0 + $0x110] sm:$0xff]  ;;  %v52_v0 = vld [vmem:[%s1224_s0 + $0x118] sm:$0xff] }
  0x1b   :  { %v370_v18 = vmax.f32 %v306_v6, 0.0  ;;  %v308_v19 = vadd.f32 %v244_v62, %v180_v7  ;;  %432 = vst [vmem:[%s1228_s4 + $0x88] sm:$0xff] %v368_v11  ;;  %v371_v22 = vmax.f32 %v307_v12, 0.0  ;;  %v113_v26 = vmul.f32 %v516_v1, %v42_v10  ;;  %v53_v7 = vld [vmem:[%s1224_s0 + $0x120] sm:$0xff] }
  0x1c   :  { %v309_v23 = vadd.f32 %v245_v8, %v181_v13  ;;  %v310_v24 = vadd.f32 %v246_v9, %v182_v14  ;;  %433 = vst [vmem:[%s1228_s4 + $0x90] sm:$0xff] %v369_v17  ;;  %v183_v29 = vadd.f32 %v521_v2, %v112_v20  ;;  %v114_v31 = vmul.f32 %v516_v1, %v43_v15  ;;  %v255_v11 = vld [vmem:[%s1225_s1 + $0x100] sm:$0xff]  ;;  %v54_v13 = vld [vmem:[%s1224_s0 + $0x128] sm:$0xff]  ;;  %v56_v20 = vld [vmem:[%s1224_s0 + $0x138] sm:$0xff] }
  0x1d   :  { %434 = vst [vmem:[%s1228_s4 + $0x98] sm:$0xff] %v370_v18  ;;  %v372_v28 = vmax.f32 %v308_v19, 0.0  ;;  %v115_v32 = vmul.f32 %v516_v1, %v44_v16  ;;  %435 = vst [vmem:[%s1228_s4 + $0xa0] sm:$0xff] %v371_v22  ;;  %v184_v37 = vadd.f32 %v521_v2, %v113_v26  ;;  %v116_v40 = vmul.f32 %v516_v1, %v45_v21  ;;  %v256_v16 = vld [vmem:[%s1225_s1 + $0x108] sm:$0xff]  ;;  %v55_v19 = vld [vmem:[%s1224_s0 + $0x130] sm:$0xff] }
  0x1e   :  { %v373_v35 = vmax.f32 %v309_v23, 0.0  ;;  %v374_v36 = vmax.f32 %v310_v24, 0.0  ;;  %v311_v41 = vadd.f32 %v247_v25, %v183_v29  ;;  %v185_v42 = vadd.f32 %v521_v2, %v114_v31  ;;  %v257_v24 = vld [vmem:[%s1225_s1 + $0x110] sm:$0xff]  ;;  %v258_v25 = vld [vmem:[%s1225_s1 + $0x118] sm:$0xff] }
  0x1f   :  { %436 = vst [vmem:[%s1228_s4 + $0xa8] sm:$0xff] %v372_v28  ;;  %v186_v43 = vadd.f32 %v521_v2, %v115_v32  ;;  %v117_v45 = vmul.f32 %v516_v1, %v46_v27  ;;  %v312_v46 = vadd.f32 %v248_v30, %v184_v37  ;;  %v187_v47 = vadd.f32 %v521_v2, %v116_v40  ;;  %v259_v30 = vld [vmem:[%s1225_s1 + $0x120] sm:$0xff] }
  0x20   :  { %437 = vst [vmem:[%s1228_s4 + $0xb0] sm:$0xff] %v373_v35  ;;  %438 = vst [vmem:[%s1228_s4 + $0xb8] sm:$0xff] %v374_v36  ;;  %v118_v49 = vmul.f32 %v516_v1, %v47_v33  ;;  %v119_v50 = vmul.f32 %v516_v1, %v48_v34  ;;  %v375_v52 = vmax.f32 %v311_v41, 0.0  ;;  %v313_v53 = vadd.f32 %v249_v38, %v185_v42  ;;  %v260_v34 = vld [vmem:[%s1225_s1 + $0x128] sm:$0xff]  ;;  %v57_v37 = vld [vmem:[%s1224_s0 + $0x140] sm:$0xff] }
  0x21   :  { %v314_v54 = vadd.f32 %v250_v39, %v186_v43  ;;  %v188_v55 = vadd.f32 %v521_v2, %v117_v45  ;;  %v376_v59 = vmax.f32 %v312_v46, 0.0  ;;  %v315_v60 = vadd.f32 %v251_v44, %v187_v47  ;;  %v261_v42 = vld [vmem:[%s1225_s1 + $0x130] sm:$0xff]  ;;  %v262_v43 = vld [vmem:[%s1225_s1 + $0x138] sm:$0xff]  ;;  %v58_v44 = vld [vmem:[%s1224_s0 + $0x148] sm:$0xff] }
  0x22   :  { %v189_v61 = vadd.f32 %v521_v2, %v118_v49  ;;  %v190_v62 = vadd.f32 %v521_v2, %v119_v50  ;;  %439 = vst [vmem:[%s1228_s4 + $0xc0] sm:$0xff] %v375_v52  ;;  %v377_v3 = vmax.f32 %v313_v53, 0.0  ;;  %v120_v6 = vmul.f32 %v516_v1, %v49_v51  ;;  %v59_v49 = vld [vmem:[%s1224_s0 + $0x150] sm:$0xff]  ;;  %v60_v50 = vld [vmem:[%s1224_s0 + $0x158] sm:$0xff] }
  0x23   :  { %v378_v4 = vmax.f32 %v314_v54, 0.0  ;;  %v316_v5 = vadd.f32 %v252_v48, %v188_v55  ;;  %440 = vst [vmem:[%s1228_s4 + $0xc8] sm:$0xff] %v376_v59  ;;  %v379_v8 = vmax.f32 %v315_v60, 0.0  ;;  %v121_v12 = vmul.f32 %v516_v1, %v50_v58  ;;  %v61_v55 = vld [vmem:[%s1224_s0 + $0x160] sm:$0xff] }
  0x24   :  { %v317_v9 = vadd.f32 %v253_v56, %v189_v61  ;;  %v318_v10 = vadd.f32 %v254_v57, %v190_v62  ;;  %441 = vst [vmem:[%s1228_s4 + $0xd0] sm:$0xff] %v377_v3  ;;  %v191_v15 = vadd.f32 %v521_v2, %v120_v6  ;;  %v122_v17 = vmul.f32 %v516_v1, %v51_v63  ;;  %v263_v59 = vld [vmem:[%s1225_s1 + $0x140] sm:$0xff]  ;;  %v62_v61 = vld [vmem:[%s1224_s0 + $0x168] sm:$0xff]  ;;  %v64_v6 = vld [vmem:[%s1224_s0 + $0x178] sm:$0xff] }
  0x25   :  { %442 = vst [vmem:[%s1228_s4 + $0xd8] sm:$0xff] %v378_v4  ;;  %v380_v14 = vmax.f32 %v316_v5, 0.0  ;;  %v123_v18 = vmul.f32 %v516_v1, %v52_v0  ;;  %443 = vst [vmem:[%s1228_s4 + $0xe0] sm:$0xff] %v379_v8  ;;  %v192_v23 = vadd.f32 %v521_v2, %v121_v12  ;;  %v124_v26 = vmul.f32 %v516_v1, %v53_v7  ;;  %v264_v0 = vld [vmem:[%s1225_s1 + $0x148] sm:$0xff]  ;;  %v63_v5 = vld [vmem:[%s1224_s0 + $0x170] sm:$0xff] }
  0x26   :  { %v381_v21 = vmax.f32 %v317_v9, 0.0  ;;  %v382_v22 = vmax.f32 %v318_v10, 0.0  ;;  %v319_v27 = vadd.f32 %v255_v11, %v191_v15  ;;  %v193_v28 = vadd.f32 %v521_v2, %v122_v17  ;;  %v265_v10 = vld [vmem:[%s1225_s1 + $0x150] sm:$0xff]  ;;  %v266_v11 = vld [vmem:[%s1225_s1 + $0x158] sm:$0xff] }
  0x27   :  { %444 = vst [vmem:[%s1228_s4 + $0xe8] sm:$0xff] %v380_v14  ;;  %v194_v29 = vadd.f32 %v521_v2, %v123_v18  ;;  %v125_v31 = vmul.f32 %v516_v1, %v54_v13  ;;  %v320_v32 = vadd.f32 %v256_v16, %v192_v23  ;;  %v195_v33 = vadd.f32 %v521_v2, %v124_v26  ;;  %v267_v16 = vld [vmem:[%s1225_s1 + $0x160] sm:$0xff] }
  0x28   :  { %445 = vst [vmem:[%s1228_s4 + $0xf0] sm:$0xff] %v381_v21  ;;  %446 = vst [vmem:[%s1228_s4 + $0xf8] sm:$0xff] %v382_v22  ;;  %v126_v35 = vmul.f32 %v516_v1, %v55_v19  ;;  %v127_v36 = vmul.f32 %v516_v1, %v56_v20  ;;  %v383_v38 = vmax.f32 %v319_v27, 0.0  ;;  %v321_v39 = vadd.f32 %v257_v24, %v193_v28  ;;  %v268_v20 = vld [vmem:[%s1225_s1 + $0x168] sm:$0xff]  ;;  %v65_v23 = vld [vmem:[%s1224_s0 + $0x180] sm:$0xff] }
  0x29   :  { %v322_v40 = vadd.f32 %v258_v25, %v194_v29  ;;  %v196_v41 = vadd.f32 %v521_v2, %v125_v31  ;;  %v384_v45 = vmax.f32 %v320_v32, 0.0  ;;  %v323_v46 = vadd.f32 %v259_v30, %v195_v33  ;;  %v269_v28 = vld [vmem:[%s1225_s1 + $0x170] sm:$0xff]  ;;  %v270_v29 = vld [vmem:[%s1225_s1 + $0x178] sm:$0xff]  ;;  %v66_v30 = vld [vmem:[%s1224_s0 + $0x188] sm:$0xff] }
  0x2a   :  { %v197_v47 = vadd.f32 %v521_v2, %v126_v35  ;;  %v198_v48 = vadd.f32 %v521_v2, %v127_v36  ;;  %447 = vst [vmem:[%s1228_s4 + $0x100] sm:$0xff] %v383_v38  ;;  %v385_v51 = vmax.f32 %v321_v39, 0.0  ;;  %v128_v54 = vmul.f32 %v516_v1, %v57_v37  ;;  %v67_v35 = vld [vmem:[%s1224_s0 + $0x190] sm:$0xff]  ;;  %v68_v36 = vld [vmem:[%s1224_s0 + $0x198] sm:$0xff] }
  0x2b   :  { %v386_v52 = vmax.f32 %v322_v40, 0.0  ;;  %v324_v53 = vadd.f32 %v260_v34, %v196_v41  ;;  %448 = vst [vmem:[%s1228_s4 + $0x108] sm:$0xff] %v384_v45  ;;  %v387_v56 = vmax.f32 %v323_v46, 0.0  ;;  %v129_v60 = vmul.f32 %v516_v1, %v58_v44  ;;  %v69_v41 = vld [vmem:[%s1224_s0 + $0x1a0] sm:$0xff] }
  0x2c   :  { %v325_v57 = vadd.f32 %v261_v42, %v197_v47  ;;  %v326_v58 = vadd.f32 %v262_v43, %v198_v48  ;;  %449 = vst [vmem:[%s1228_s4 + $0x110] sm:$0xff] %v385_v51  ;;  %v199_v63 = vadd.f32 %v521_v2, %v128_v54  ;;  %v130_v3 = vmul.f32 %v516_v1, %v59_v49  ;;  %v271_v45 = vld [vmem:[%s1225_s1 + $0x180] sm:$0xff]  ;;  %v70_v47 = vld [vmem:[%s1224_s0 + $0x1a8] sm:$0xff]  ;;  %v72_v54 = vld [vmem:[%s1224_s0 + $0x1b8] sm:$0xff] }
  0x2d   :  { %450 = vst [vmem:[%s1228_s4 + $0x118] sm:$0xff] %v386_v52  ;;  %v388_v62 = vmax.f32 %v324_v53, 0.0  ;;  %v131_v4 = vmul.f32 %v516_v1, %v60_v50  ;;  %451 = vst [vmem:[%s1228_s4 + $0x120] sm:$0xff] %v387_v56  ;;  %v200_v9 = vadd.f32 %v521_v2, %v129_v60  ;;  %v132_v12 = vmul.f32 %v516_v1, %v61_v55  ;;  %v272_v50 = vld [vmem:[%s1225_s1 + $0x188] sm:$0xff]  ;;  %v71_v53 = vld [vmem:[%s1224_s0 + $0x1b0] sm:$0xff] }
  0x2e   :  { %v389_v7 = vmax.f32 %v325_v57, 0.0  ;;  %v390_v8 = vmax.f32 %v326_v58, 0.0  ;;  %v327_v13 = vadd.f32 %v263_v59, %v199_v63  ;;  %v201_v14 = vadd.f32 %v521_v2, %v130_v3  ;;  %v273_v58 = vld [vmem:[%s1225_s1 + $0x190] sm:$0xff]  ;;  %v274_v59 = vld [vmem:[%s1225_s1 + $0x198] sm:$0xff] }
  0x2f   :  { %452 = vst [vmem:[%s1228_s4 + $0x128] sm:$0xff] %v388_v62  ;;  %v202_v15 = vadd.f32 %v521_v2, %v131_v4  ;;  %v133_v17 = vmul.f32 %v516_v1, %v62_v61  ;;  %v328_v18 = vadd.f32 %v264_v0, %v200_v9  ;;  %v203_v19 = vadd.f32 %v521_v2, %v132_v12  ;;  %v275_v0 = vld [vmem:[%s1225_s1 + $0x1a0] sm:$0xff] }
  0x30   :  { %453 = vst [vmem:[%s1228_s4 + $0x130] sm:$0xff] %v389_v7  ;;  %454 = vst [vmem:[%s1228_s4 + $0x138] sm:$0xff] %v390_v8  ;;  %v134_v21 = vmul.f32 %v516_v1, %v63_v5  ;;  %v135_v22 = vmul.f32 %v516_v1, %v64_v6  ;;  %v391_v24 = vmax.f32 %v327_v13, 0.0  ;;  %v329_v25 = vadd.f32 %v265_v10, %v201_v14  ;;  %v276_v6 = vld [vmem:[%s1225_s1 + $0x1a8] sm:$0xff]  ;;  %v73_v9 = vld [vmem:[%s1224_s0 + $0x1c0] sm:$0xff] }
  0x31   :  { %v330_v26 = vadd.f32 %v266_v11, %v202_v15  ;;  %v204_v27 = vadd.f32 %v521_v2, %v133_v17  ;;  %v392_v31 = vmax.f32 %v328_v18, 0.0  ;;  %v331_v32 = vadd.f32 %v267_v16, %v203_v19  ;;  %v277_v14 = vld [vmem:[%s1225_s1 + $0x1b0] sm:$0xff]  ;;  %v278_v15 = vld [vmem:[%s1225_s1 + $0x1b8] sm:$0xff]  ;;  %v74_v16 = vld [vmem:[%s1224_s0 + $0x1c8] sm:$0xff] }
  0x32   :  { %v205_v33 = vadd.f32 %v521_v2, %v134_v21  ;;  %v206_v34 = vadd.f32 %v521_v2, %v135_v22  ;;  %455 = vst [vmem:[%s1228_s4 + $0x140] sm:$0xff] %v391_v24  ;;  %v393_v37 = vmax.f32 %v329_v25, 0.0  ;;  %v136_v40 = vmul.f32 %v516_v1, %v65_v23  ;;  %v75_v21 = vld [vmem:[%s1224_s0 + $0x1d0] sm:$0xff]  ;;  %v76_v22 = vld [vmem:[%s1224_s0 + $0x1d8] sm:$0xff] }
  0x33   :  { %v394_v38 = vmax.f32 %v330_v26, 0.0  ;;  %v332_v39 = vadd.f32 %v268_v20, %v204_v27  ;;  %456 = vst [vmem:[%s1228_s4 + $0x148] sm:$0xff] %v392_v31  ;;  %v395_v42 = vmax.f32 %v331_v32, 0.0  ;;  %v137_v46 = vmul.f32 %v516_v1, %v66_v30  ;;  %v77_v27 = vld [vmem:[%s1224_s0 + $0x1e0] sm:$0xff] }
  0x34   :  { %v333_v43 = vadd.f32 %v269_v28, %v205_v33  ;;  %v334_v44 = vadd.f32 %v270_v29, %v206_v34  ;;  %457 = vst [vmem:[%s1228_s4 + $0x150] sm:$0xff] %v393_v37  ;;  %v207_v49 = vadd.f32 %v521_v2, %v136_v40  ;;  %v138_v51 = vmul.f32 %v516_v1, %v67_v35  ;;  %v279_v31 = vld [vmem:[%s1225_s1 + $0x1c0] sm:$0xff]  ;;  %v78_v33 = vld [vmem:[%s1224_s0 + $0x1e8] sm:$0xff]  ;;  %v80_v40 = vld [vmem:[%s1224_s0 + $0x1f8] sm:$0xff] }
  0x35   :  { %458 = vst [vmem:[%s1228_s4 + $0x158] sm:$0xff] %v394_v38  ;;  %v396_v48 = vmax.f32 %v332_v39, 0.0  ;;  %v139_v52 = vmul.f32 %v516_v1, %v68_v36  ;;  %459 = vst [vmem:[%s1228_s4 + $0x160] sm:$0xff] %v395_v42  ;;  %v208_v57 = vadd.f32 %v521_v2, %v137_v46  ;;  %v140_v60 = vmul.f32 %v516_v1, %v69_v41  ;;  %v280_v36 = vld [vmem:[%s1225_s1 + $0x1c8] sm:$0xff]  ;;  %v79_v39 = vld [vmem:[%s1224_s0 + $0x1f0] sm:$0xff] }
  0x36   :  { %v397_v55 = vmax.f32 %v333_v43, 0.0  ;;  %v398_v56 = vmax.f32 %v334_v44, 0.0  ;;  %v335_v61 = vadd.f32 %v271_v45, %v207_v49  ;;  %v209_v62 = vadd.f32 %v521_v2, %v138_v51  ;;  %v281_v44 = vld [vmem:[%s1225_s1 + $0x1d0] sm:$0xff]  ;;  %v282_v45 = vld [vmem:[%s1225_s1 + $0x1d8] sm:$0xff] }
  0x37   :  { %460 = vst [vmem:[%s1228_s4 + $0x168] sm:$0xff] %v396_v48  ;;  %v210_v63 = vadd.f32 %v521_v2, %v139_v52  ;;  %v141_v3 = vmul.f32 %v516_v1, %v70_v47  ;;  %v336_v4 = vadd.f32 %v272_v50, %v208_v57  ;;  %v211_v5 = vadd.f32 %v521_v2, %v140_v60  ;;  %v283_v50 = vld [vmem:[%s1225_s1 + $0x1e0] sm:$0xff] }
  0x38   :  { %461 = vst [vmem:[%s1228_s4 + $0x170] sm:$0xff] %v397_v55  ;;  %462 = vst [vmem:[%s1228_s4 + $0x178] sm:$0xff] %v398_v56  ;;  %v142_v7 = vmul.f32 %v516_v1, %v71_v53  ;;  %v143_v8 = vmul.f32 %v516_v1, %v72_v54  ;;  %v399_v10 = vmax.f32 %v335_v61, 0.0  ;;  %v337_v11 = vadd.f32 %v273_v58, %v209_v62  ;;  %v284_v54 = vld [vmem:[%s1225_s1 + $0x1e8] sm:$0xff]  ;;  %v285_v61 = vld [vmem:[%s1225_s1 + $0x1f0] sm:$0xff] }
  0x39   :  { %v338_v12 = vadd.f32 %v274_v59, %v210_v63  ;;  %v212_v13 = vadd.f32 %v521_v2, %v141_v3  ;;  %v400_v17 = vmax.f32 %v336_v4, 0.0  ;;  %v339_v18 = vadd.f32 %v275_v0, %v211_v5  ;;  %v286_v62 = vld [vmem:[%s1225_s1 + $0x1f8] sm:$0xff] }
  0x3a   :  { %v213_v19 = vadd.f32 %v521_v2, %v142_v7  ;;  %v214_v20 = vadd.f32 %v521_v2, %v143_v8  ;;  %463 = vst [vmem:[%s1228_s4 + $0x180] sm:$0xff] %v399_v10  ;;  %v401_v23 = vmax.f32 %v337_v11, 0.0  ;;  %v144_v26 = vmul.f32 %v516_v1, %v73_v9 }
  0x3b   :  { %v402_v24 = vmax.f32 %v338_v12, 0.0  ;;  %v340_v25 = vadd.f32 %v276_v6, %v212_v13  ;;  %464 = vst [vmem:[%s1228_s4 + $0x188] sm:$0xff] %v400_v17  ;;  %v403_v28 = vmax.f32 %v339_v18, 0.0  ;;  %v145_v32 = vmul.f32 %v516_v1, %v74_v16 }
  0x3c   :  { %v341_v29 = vadd.f32 %v277_v14, %v213_v19  ;;  %v342_v30 = vadd.f32 %v278_v15, %v214_v20  ;;  %465 = vst [vmem:[%s1228_s4 + $0x190] sm:$0xff] %v401_v23  ;;  %v215_v35 = vadd.f32 %v521_v2, %v144_v26  ;;  %v146_v37 = vmul.f32 %v516_v1, %v75_v21 }
  0x3d   :  { %466 = vst [vmem:[%s1228_s4 + $0x198] sm:$0xff] %v402_v24  ;;  %v404_v34 = vmax.f32 %v340_v25, 0.0  ;;  %v147_v38 = vmul.f32 %v516_v1, %v76_v22  ;;  %467 = vst [vmem:[%s1228_s4 + $0x1a0] sm:$0xff] %v403_v28  ;;  %v216_v43 = vadd.f32 %v521_v2, %v145_v32  ;;  %v148_v46 = vmul.f32 %v516_v1, %v77_v27 }
  0x3e   :  { %v405_v41 = vmax.f32 %v341_v29, 0.0  ;;  %v406_v42 = vmax.f32 %v342_v30, 0.0  ;;  %v343_v47 = vadd.f32 %v279_v31, %v215_v35  ;;  %v217_v48 = vadd.f32 %v521_v2, %v146_v37 }
  0x3f   :  { %468 = vst [vmem:[%s1228_s4 + $0x1a8] sm:$0xff] %v404_v34  ;;  %v218_v49 = vadd.f32 %v521_v2, %v147_v38  ;;  %v149_v51 = vmul.f32 %v516_v1, %v78_v33  ;;  %v344_v52 = vadd.f32 %v280_v36, %v216_v43  ;;  %v219_v53 = vadd.f32 %v521_v2, %v148_v46 }
  0x40   :  { %469 = vst [vmem:[%s1228_s4 + $0x1b0] sm:$0xff] %v405_v41  ;;  %470 = vst [vmem:[%s1228_s4 + $0x1b8] sm:$0xff] %v406_v42  ;;  %v150_v55 = vmul.f32 %v516_v1, %v79_v39  ;;  %v151_v56 = vmul.f32 %v516_v1, %v80_v40  ;;  %v407_v57 = vmax.f32 %v343_v47, 0.0  ;;  %v345_v58 = vadd.f32 %v281_v44, %v217_v48 }
  0x41   :  { %v346_v59 = vadd.f32 %v282_v45, %v218_v49  ;;  %v220_v60 = vadd.f32 %v521_v2, %v149_v51  ;;  %v408_v63 = vmax.f32 %v344_v52, 0.0  ;;  %v347_v0 = vadd.f32 %v283_v50, %v219_v53 }
  0x42   :  { %v221_v3 = vadd.f32 %v521_v2, %v150_v55  ;;  %v222_v4 = vadd.f32 %v521_v2, %v151_v56  ;;  %471 = vst [vmem:[%s1228_s4 + $0x1c0] sm:$0xff] %v407_v57  ;;  %v409_v1 = vmax.f32 %v345_v58, 0.0 }
  0x43   :  { %v410_v5 = vmax.f32 %v346_v59, 0.0  ;;  %v348_v6 = vadd.f32 %v284_v54, %v220_v60  ;;  %472 = vst [vmem:[%s1228_s4 + $0x1c8] sm:$0xff] %v408_v63  ;;  %v411_v7 = vmax.f32 %v347_v0, 0.0 }
  0x44   :  { %v349_v8 = vadd.f32 %v285_v61, %v221_v3  ;;  %v350_v9 = vadd.f32 %v286_v62, %v222_v4  ;;  %473 = vst [vmem:[%s1228_s4 + $0x1d0] sm:$0xff] %v409_v1 }
  0x45   :  { %474 = vst [vmem:[%s1228_s4 + $0x1d8] sm:$0xff] %v410_v5  ;;  %v412_v2 = vmax.f32 %v348_v6, 0.0  ;;  %475 = vst [vmem:[%s1228_s4 + $0x1e0] sm:$0xff] %v411_v7 }
  0x46   :  { %v413_v10 = vmax.f32 %v349_v8, 0.0  ;;  %v414_v11 = vmax.f32 %v350_v9, 0.0 }
  0x47   :  { %476 = vst [vmem:[%s1228_s4 + $0x1e8] sm:$0xff] %v412_v2 }
  0x48   :  { %477 = vst [vmem:[%s1228_s4 + $0x1f0] sm:$0xff] %v413_v10  ;;  %478 = vst [vmem:[%s1228_s4 + $0x1f8] sm:$0xff] %v414_v11 }

// kernel: resnet_block_forward.3
= control target key start
LH: loop header
LB: loop body
LE: loop exit
PB: predicated region body
PF: predicated region fallthrough
CT: control target
= control target key end

     0   :  { %s4399_s18 = smov 0   ;;  %s4401_s19 = smov 0   ;;  %s5554_s0 = inlined_call_operand.vmem [shape: bf16[2,16,16,128], index: 0, kind: input, shape index: {}, may-alias: {0,1,2}]   ;;  %s5555_s1 = inlined_call_operand.vmem [shape: bf16[2,16,16,128], index: 1, kind: input, shape index: {}, may-alias: {0,1,2}]   ;;  %s5556_s2 = inlined_call_operand.vmem [shape: bf16[2,16,16,128], index: 2, kind: input, shape index: {}, may-alias: {0,1,2}]   ;;  %s5557_s3 = inlined_call_operand.vmem [shape: bf16[3,384,128], index: 3, kind: input, shape index: {}]   ;;  %s5558_s4 = inlined_call_operand.vmem [shape: bf16[2,16,16,128], index: 4, kind: output, shape index: {0}]   ;;  %s5559_s5 = inlined_call_operand.vmem [shape: f32[16,128], index: 5, kind: output, shape index: {1}]  }
   0x1   :  { %s4403_s20 = smov 0  }
   0x2 LB: > { %s28_s21 = sadd.s32 1, %s4363_s19  ;;  %p3142_p0 = scmp.ge.s32.totalorder %s4367_s20, 1  ;;  %s4367_s20 = sphi %s4403_s20, %s16_s20   ;;  %s4363_s19 = sphi %s4401_s19, %s5572_s19   ;;  %s4359_s18 = sphi %s4399_s18, %s5571_s18  }
   0x3   : > { %p30_p1 = scmp.ge.s32.totalorder %s28_s21, 2  ;;  %p278_p2 = scmp.lt.s32.totalorder %s4367_s20, 3 }
   0x5   : > { %s5574_s21 = smov (%p30_p1, %s28_s21), 0  ;;  %p279_p3 = pnand %p3142_p0, %p278_p2 }
   0x7   : > { %282 = sbr.rel (%p279_p3) target bundleno = 578 (0x242), region = 36 }
   0xe   : > { %v4257_v0 = vld [vmem:[%s5557_s3 + $0x100] sm:$0xff]   ;;  %v4260_v3 = vld [vmem:[%s5557_s3 + $0x108] sm:$0xff]   ;;  %v4263_v6 = vld [vmem:[%s5557_s3 + $0x110] sm:$0xff]   ;;  %p348_p4 = scmp.lt.s32.totalorder %s4359_s18, 1  ;;  %vm736_vm0 = vcmask 1040384   ;;  %vm1046_vm2 = vcmask 1046528  }
   0xf   : > { %v4425_v1 = vld [vmem:[%s5557_s3 + $0x140] sm:$0xff]   ;;  %3505 = vmatprep.subr.bf16.mxu0 %v4257_v0  ;;  %v4438_v4 = vld [vmem:[%s5557_s3 + $0x148] sm:$0xff]   ;;  %v4450_v7 = vld [vmem:[%s5557_s3 + $0x150] sm:$0xff]   ;;  %vm737_vm1 = vsmask.f32 256  ;;  %vm2963_vm5 = vcmask 1041408  }
  0x10   : > { %v4259_v2 = vld [vmem:[%s5557_s3 + $0xc0] sm:$0xff]   ;;  %4057 = vmatprep.subr.bf16.mxu1 %v4425_v1  ;;  %v4262_v5 = vld [vmem:[%s5557_s3 + $0xc8] sm:$0xff]   ;;  %v4265_v8 = vld [vmem:[%s5557_s3 + $0xd0] sm:$0xff]   ;;  %s5576_s18 = smov (!%p348_p4, %s4359_s18), 1  ;;  %vm775_vm4 = vsmask.f32 7424 }
  0x11   : > { %3506 = vmatpush3.bf16.msra.mxu0 %v4259_v2  ;;  %4065 = vmatpush3.bf16.msra.mxu1 %v4425_v1  ;;  %v4266_v9 = vld [vmem:[%s5557_s3 + $0x118] sm:$0xff]   ;;  %v4269_v12 = vld [vmem:[%s5557_s3 + $0x120] sm:$0xff]   ;;  %v4272_v15 = vld [vmem:[%s5557_s3 + $0x128] sm:$0xff]   ;;  %s4496_s10 = sshll.u32 %s5576_s18, 7 }
  0x12   : > { %3507 = vmatprep.subr.bf16.mxu0 %v4260_v3  ;;  %4058 = vmatprep.subr.bf16.mxu1 %v4438_v4  ;;  %v4463_v10 = vld [vmem:[%s5557_s3 + $0x158] sm:$0xff]   ;;  %v4477_v13 = vld [vmem:[%s5557_s3 + $0x160] sm:$0xff]   ;;  %v4493_v16 = vld [vmem:[%s5557_s3 + $0x168] sm:$0xff]   ;;  %s4515_s23 = scalar_lea.vmem %s5554_s0, %s4496_s10  ;;  %s370_s26 = scalar_lea.vmem %s5555_s1, %s4496_s10 }
  0x13   : > { %v4268_v11 = vld [vmem:[%s5557_s3 + $0xd8] sm:$0xff]   ;;  %v4271_v14 = vld [vmem:[%s5557_s3 + $0xe0] sm:$0xff]   ;;  %v4274_v17 = vld [vmem:[%s5557_s3 + $0xe8] sm:$0xff]   ;;  %s3375_s7 = sadd.s32 120, %s4496_s10  ;;  %s5469_s14 = scalar_lea.vmem %s5558_s4, %s4496_s10 }
  0x14   : > { %v4275_v18 = vld [vmem:[%s5557_s3 + $0x130] sm:$0xff]   ;;  %v4281_v21 = vld [vmem:[%s4515_s23] sm:$0xff]   ;;  %v4278_v22 = vld [vmem:[%s5557_s3 + $0x138] sm:$0xff]   ;;  %s387_s11 = scalar_lea.vmem %s5556_s2, %s3375_s7  ;;  %s3151_s10 = sshll.u32 %s5576_s18, 3 }
  0x15   : > { %3508 = vmatpush3.bf16.msra.mxu0 %v4262_v5  ;;  %4066 = vmatpush3.bf16.msra.mxu1 %v4438_v4  ;;  %v4509_v19 = vld [vmem:[%s5557_s3 + $0x170] sm:$0xff]   ;;  %v4529_v23 = vld [vmem:[%s5557_s3 + $0x178] sm:$0xff]   ;;  %v582_v24 = vshrl.u32 %v4281_v21, 16  ;;  %v585_v25 = vshll.u32 %v4281_v21, 16  ;;  %v4282_v26 = vld [vmem:[%s4515_s23 + $0x40] sm:$0xff]   ;;  %s407_s17 = scalar_lea.vmem %s5559_s5, %s3151_s10 }
  0x16   : > { %3509 = vmatprep.subr.bf16.mxu0 %v4263_v6  ;;  %4059 = vmatprep.subr.bf16.mxu1 %v4450_v7  ;;  %v4277_v20 = vld [vmem:[%s5557_s3 + $0xf0] sm:$0xff]   ;;  %v4283_v27 = vld [vmem:[%s4515_s23 + $0x48] sm:$0xff]   ;;  %v4280_v28 = vld [vmem:[%s5557_s3 + $0xf8] sm:$0xff]   ;;  %v638_v31 = vshrl.u32 %v4282_v26, 16  ;;  %v641_v32 = vshll.u32 %v4282_v26, 16 }
  0x17   : > { %v584_v29 = vrot.slane %v582_v24, 7  ;;  %vm4538_vm3 = vmand %vm736_vm0, %vm737_vm1  ;;  %v645_v33 = vshrl.u32 %v4283_v27, 16  ;;  %v4284_v34 = vld [vmem:[%s5557_s3 + $0x40] sm:$0xff]   ;;  %v648_v38 = vshll.u32 %v4283_v27, 16  ;;  %v4288_v48 = vld [vmem:[%s4515_s23 + $0x8] sm:$0xff]  }
  0x18   : > { %v640_v37 = vrot.slane %v638_v31, 7  ;;  %v4285_v55 = vld [vmem:[%s5557_s3] sm:$0xff]   ;;  %v589_v56 = vshrl.u32 %v4288_v48, 16  ;;  %v4286_v58 = vld [vmem:[%s5557_s3 + $0x48] sm:$0xff]   ;;  %v592_v59 = vshll.u32 %v4288_v48, 16  ;;  %v4289_v60 = vld [vmem:[%s4515_s23 + $0x50] sm:$0xff]  }
  0x19   : > { %3510 = vmatpush3.bf16.msra.mxu0 %v4265_v8  ;;  %4067 = vmatpush3.bf16.msra.mxu1 %v4450_v7  ;;  %v587_v35 = vor.u32 %v585_v25, %v584_v29  ;;  %v4548_v36 = vsel %vm4538_vm3, %v584_v29, 0  ;;  %v647_v40 = vrot.slane %v645_v33, 7  ;;  %v4290_v61 = vld [vmem:[%s4515_s23 + $0x58] sm:$0xff]   ;;  %v652_v3 = vshrl.u32 %v4289_v60, 16  ;;  %v4291_v26 = vld [vmem:[%s5557_s3 + $0x50] sm:$0xff]  }
  0x1a   : > { %3511 = vmatprep.subr.bf16.mxu0 %v4266_v9  ;;  %4060 = vmatprep.subr.bf16.mxu1 %v4463_v10  ;;  %v796_v39 = vshll.u32 %v4548_v36, 16  ;;  %v643_v42 = vor.u32 %v641_v32, %v640_v37  ;;  %v4558_v43 = vsel %vm4538_vm3, %v640_v37, 0  ;;  %v591_v2 = vrot.slane %v589_v56, 7  ;;  %v4292_v37 = vld [vmem:[%s5557_s3 + $0x10] sm:$0xff]  }
  0x1b   : > { %v4554_v41 = vsel %vm4538_vm3, 0, %v587_v35  ;;  %v1075_v47 = vrot.slane %v4558_v43, 1  ;;  %v650_v50 = vor.u32 %v648_v38, %v647_v40  ;;  %v4571_v51 = vsel %vm4538_vm3, %v647_v40, 0  ;;  %v4293_v40 = vld [vmem:[%s5557_s3 + $0x58] sm:$0xff]  }
  0x1c   : > { %v789_v44 = vshrl.u32 %v4554_v41, 16  ;;  %v791_v45 = vshll.u32 %v4554_v41, 16  ;;  %v798_v46 = vrot.slane %v796_v39, 1  ;;  %v4567_v49 = vsel %vm4538_vm3, 0, %v643_v42 }
  0x1d   : > { %3512 = vmatpush3.bf16.msra.mxu0 %v4268_v11  ;;  %4068 = vmatpush3.bf16.msra.mxu1 %v4463_v10  ;;  %v1074_v53 = vrot.slane %v4567_v49, 1  ;;  %v1078_v54 = vrot.slane %v4571_v51, 1  ;;  %v4580_v57 = vsel %vm4538_vm3, 0, %v650_v50  ;;  %v655_v5 = vshll.u32 %v4289_v60, 16 }
  0x1e   : > { %3513 = vmatprep.subr.bf16.mxu0 %v4269_v12  ;;  %4061 = vmatprep.subr.bf16.mxu1 %v4477_v13  ;;  %v793_v52 = vrot.slane %v791_v45, 1  ;;  %v1077_v0 = vrot.slane %v4580_v57, 1  ;;  %v659_v6 = vshrl.u32 %v4290_v61, 16  ;;  %v662_v8 = vshll.u32 %v4290_v61, 16  ;;  %v4294_v61 = vld [vmem:[%s5557_s3 + $0x18] sm:$0xff]  }
  0x1f   : > { %v4588_v63 = vsel %vm1046_vm2, %v1074_v53, %v1075_v47  ;;  %v594_v12 = vor.u32 %v592_v59, %v591_v2  ;;  %v4296_v47 = vld [vmem:[%s4515_s23 + $0x60] sm:$0xff]  }
  0x20   : > { %v794_v62 = vor.u32 %v793_v52, %v789_v44  ;;  %3945 = vmatprep.mubr.bf16.mxu1 %v4588_v63  ;;  %v4596_v11 = vsel %vm1046_vm2, %v1077_v0, %v1078_v54  ;;  %v4297_v52 = vld [vmem:[%s4515_s23 + $0x68] sm:$0xff]   ;;  %v669_v56 = vshll.u32 %v4296_v47, 16 }
  0x21   : > { %3514 = vmatpush3.bf16.msra.mxu0 %v4271_v14  ;;  %4069 = vmatpush3.bf16.msra.mxu1 %v4477_v13  ;;  %v4600_v14 = vsel %vm4538_vm3, %v591_v2, 0  ;;  %v4611_v21 = vsel %vm4538_vm3, 0, %v594_v12  ;;  %v673_v59 = vshrl.u32 %v4297_v52, 16  ;;  %v676_v60 = vshll.u32 %v4297_v52, 16  ;;  %v4298_v2 = vld [vmem:[%s5557_s3 + $0x60] sm:$0xff]  }
  0x22   : > { %3515 = vmatprep.subr.bf16.mxu0 %v4272_v15  ;;  %4062 = vmatprep.subr.bf16.mxu1 %v4493_v16  ;;  %v4593_v9 = vsel %vm775_vm4, %v794_v62, %v798_v46  ;;  %v808_v15 = vshll.u32 %v4600_v14, 16  ;;  %v803_v24 = vshll.u32 %v4611_v21, 16 }
  0x23   : > { %1392 = vmatprep.mubr.bf16.mxu0 %v4593_v9 }
  0x24   : > { %v810_v27 = vrot.slane %v808_v15, 1  ;;  %v805_v32 = vrot.slane %v803_v24, 1 }
  0x25   : > { %3516 = vmatpush3.bf16.msra.mxu0 %v4274_v17  ;;  %4070 = vmatpush3.bf16.msra.mxu1 %v4493_v16  ;;  %v654_v17 = vrot.slane %v652_v3, 7 }
  0x26   : > { %3517 = vmatprep.subr.bf16.mxu0 %v4275_v18  ;;  %4063 = vmatprep.subr.bf16.mxu1 %v4509_v19  ;;  %v661_v18 = vrot.slane %v659_v6, 7 }
  0x27   : > { %v657_v25 = vor.u32 %v655_v5, %v654_v17  ;;  %v675_v5 = vrot.slane %v673_v59, 7  ;;  %v4305_v59 = vld [vmem:[%s5557_s3 + $0x70] sm:$0xff]  }
  0x28   : > { %v664_v29 = vor.u32 %v662_v8, %v661_v18  ;;  %v4625_v31 = vsel %vm4538_vm3, %v661_v18, 0 }
  0x29   : > { %3518 = vmatpush3.bf16.msra.mxu0 %v4277_v20  ;;  %4071 = vmatpush3.bf16.msra.mxu1 %v4509_v19  ;;  %v4287_v20 = vld [vmem:[%s5557_s3 + $0x8] sm:$0xff]   ;;  %v4631_v33 = vsel %vm4538_vm3, 0, %v657_v25  ;;  %v1084_v35 = vrot.slane %v4625_v31, 1 }
  0x2a   : > { %3519 = vmatprep.subr.bf16.mxu0 %v4278_v22  ;;  %4064 = vmatprep.subr.bf16.mxu1 %v4529_v23  ;;  %v801_v22 = vshrl.u32 %v4611_v21, 16  ;;  %v1080_v38 = vrot.slane %v4631_v33, 1  ;;  %v4641_v39 = vsel %vm4538_vm3, 0, %v664_v29 }
  0x2b   : > { %v1083_v46 = vrot.slane %v4641_v39, 1 }
  0x2c   : > { %v806_v45 = vor.u32 %v805_v32, %v801_v22  ;;  %v4302_v32 = vld [vmem:[%s4515_s23 + $0x18] sm:$0xff]  }
  0x2d   : > { %3520 = vmatpush3.bf16.msra.mxu0 %v4280_v28  ;;  %4072 = vmatpush3.bf16.msra.mxu1 %v4529_v23  ;;  %v4621_v28 = vsel %vm4538_vm3, %v654_v17, 0  ;;  %v4659_v54 = vsel %vm1046_vm2, %v1083_v46, %v1084_v35  ;;  %v4299_v17 = vld [vmem:[%s5557_s3 + $0x20] sm:$0xff]  }
  0x2e   : > { %3913 = vmatprep.subr.bf16.mxu0 %v4425_v1  ;;  %3641 = vmatprep.subr.bf16.mxu1 %v4284_v34  ;;  %v1081_v34 = vrot.slane %v4621_v28, 1  ;;  %v4655_v53 = vsel %vm775_vm4, %v806_v45, %v810_v27  ;;  %v4300_v27 = vld [vmem:[%s5557_s3 + $0x68] sm:$0xff]   ;;  %v606_v45 = vshll.u32 %v4302_v32, 16 }
  0x30   : > { %3946 = vmatmul.mubr.bf16.vlgmr.msra.gmra.mrb[0].mxu1 %v4596_v11  ;;  %1393 = vmatmul.mubr.bf16.vlgmr.msra.gmra.mrb[0].mxu0 %v4554_v41  ;;  %v4650_v48 = vsel %vm1046_vm2, %v1080_v38, %v1081_v34  ;;  %v4303_v34 = vld [vmem:[%s4515_s23 + $0x70] sm:$0xff]   ;;  %v4304_v38 = vld [vmem:[%s4515_s23 + $0x78] sm:$0xff]  }
  0x31   : > { %3642 = vmatpush3.bf16.msra.mxu1 %v4285_v55  ;;  %3914 = vmatpush3.bf16.msra.mxu0 %v4425_v1  ;;  %v4295_v1 = vld [vmem:[%s4515_s23 + $0x10] sm:$0xff]   ;;  %v666_v55 = vshrl.u32 %v4296_v47, 16  ;;  %v680_v46 = vshrl.u32 %v4303_v34, 16  ;;  %v687_v52 = vshrl.u32 %v4304_v38, 16 }
  0x32   : > { %3643 = vmatprep.subr.bf16.mxu1 %v4286_v58  ;;  %3915 = vmatprep.subr.bf16.mxu0 %v4438_v4  ;;  %v596_v42 = vshrl.u32 %v4295_v1, 16  ;;  %v599_v44 = vshll.u32 %v4295_v1, 16 }
  0x33   : > { %3949 = vmatprep.mubr.bf16.mxu1 %v4650_v48  ;;  %1400 = vmatprep.mubr.bf16.mxu0 %v4655_v53  ;;  %v668_v0 = vrot.slane %v666_v55, 7 }
  0x34   : > { %v598_v50 = vrot.slane %v596_v42, 7  ;;  %v4301_v42 = vld [vmem:[%s5557_s3 + $0x28] sm:$0xff]  }
  0x35   : > { %3644 = vmatpush3.bf16.msra.mxu1 %v4287_v20  ;;  %3916 = vmatpush3.bf16.msra.mxu0 %v4438_v4  ;;  %v671_v15 = vor.u32 %v669_v56, %v668_v0  ;;  %v4688_v18 = vsel %vm4538_vm3, %v668_v0, 0  ;;  %v678_v20 = vor.u32 %v676_v60, %v675_v5  ;;  %v682_v56 = vrot.slane %v680_v46, 7 }
  0x36   : > { %3645 = vmatprep.subr.bf16.mxu1 %v4291_v26  ;;  %3917 = vmatprep.subr.bf16.mxu0 %v4450_v7  ;;  %v601_v4 = vor.u32 %v599_v44, %v598_v50  ;;  %v4665_v58 = vsel %vm4538_vm3, %v598_v50, 0  ;;  %v1087_v25 = vrot.slane %v4688_v18, 1  ;;  %v603_v44 = vshrl.u32 %v4302_v32, 16 }
  0x37   : > { %v820_v62 = vshll.u32 %v4665_v58, 16  ;;  %v4696_v24 = vsel %vm4538_vm3, 0, %v671_v15  ;;  %v4706_v1 = vsel %vm4538_vm3, 0, %v678_v20  ;;  %v683_v50 = vshll.u32 %v4303_v34, 16  ;;  %v4308_v34 = vld [vmem:[%s5557_s3 + $0x38] sm:$0xff]  }
  0x38   : > { %3950 = vmatmul.mubr.bf16.gmra.mrb[4].mxu1 %v4659_v54  ;;  %1401 = vmatmul.mubr.bf16.gmra.mrb[4].mxu0 %v4611_v21  ;;  %v4677_v3 = vsel %vm4538_vm3, 0, %v601_v4  ;;  %v1086_v29 = vrot.slane %v4696_v24, 1  ;;  %v605_v55 = vrot.slane %v603_v44, 7  ;;  %v690_v4 = vshll.u32 %v4304_v38, 16  ;;  %v4782_v44 = vld [vmem:[%s5557_s3 + $0x80] sm:$0xff]  }
  0x39   : > { %3646 = vmatpush3.bf16.msra.mxu1 %v4292_v37  ;;  %3918 = vmatpush3.bf16.msra.mxu0 %v4450_v7  ;;  %v813_v6 = vshrl.u32 %v4677_v3, 16  ;;  %v815_v8 = vshll.u32 %v4677_v3, 16  ;;  %v822_v12 = vrot.slane %v820_v62, 1  ;;  %v4692_v7 = vsel %vm4538_vm3, %v675_v5, 0 }
  0x3a   : > { %3647 = vmatprep.subr.bf16.mxu1 %v4293_v40  ;;  %3919 = vmatprep.subr.bf16.mxu0 %v4463_v10  ;;  %v1090_v26 = vrot.slane %v4692_v7, 1  ;;  %v1089_v37 = vrot.slane %v4706_v1, 1  ;;  %v4715_v40 = vsel %vm1046_vm2, %v1086_v29, %v1087_v25  ;;  %v689_v60 = vrot.slane %v687_v52, 7  ;;  %v4309_v25 = vld [vmem:[%s4515_s23 + $0x20] sm:$0xff]  }
  0x3b   : > { %v817_v22 = vrot.slane %v815_v8, 1  ;;  %3953 = vmatprep.mubr.bf16.mxu1 %v4715_v40  ;;  %v608_v62 = vor.u32 %v606_v45, %v605_v55  ;;  %v4738_v0 = vsel %vm4538_vm3, %v605_v55, 0  ;;  %v4742_v5 = vsel %vm4538_vm3, %v682_v56, 0  ;;  %v443_v52 = vld [vmem:[%s370_s26 + $0x4] sm:$0xf] }
  0x3c   : > { %v1093_v8 = vrot.slane %v4742_v5, 1  ;;  %v4749_v15 = vsel %vm4538_vm3, %v689_v60, 0  ;;  %v613_v38 = vshll.u32 %v4309_v25, 16 }
  0x3d   : > { %3648 = vmatpush3.bf16.msra.mxu1 %v4294_v61  ;;  %3920 = vmatpush3.bf16.msra.mxu0 %v4463_v10  ;;  %v818_v35 = vor.u32 %v817_v22, %v813_v6  ;;  %v4725_v10 = vsel %vm1046_vm2, %v1089_v37, %v1090_v26  ;;  %v4306_v61 = vld [vmem:[%s5557_s3 + $0x30] sm:$0xff]   ;;  %v832_v6 = vshll.u32 %v4738_v0, 16  ;;  %v1096_v22 = vrot.slane %v4749_v15, 1 }
  0x3e   : > { %3649 = vmatprep.subr.bf16.mxu1 %v4298_v2  ;;  %3921 = vmatprep.subr.bf16.mxu0 %v4477_v13  ;;  %v685_v2 = vor.u32 %v683_v50, %v682_v56  ;;  %v610_v37 = vshrl.u32 %v4309_v25, 16  ;;  %v4311_v56 = vld [vmem:[%s4515_s23 + $0x28] sm:$0xff]  }
  0x3f   : > { %v4721_v47 = vsel %vm775_vm4, %v818_v35, %v822_v12  ;;  %v692_v12 = vor.u32 %v690_v4, %v689_v60  ;;  %v834_v29 = vrot.slane %v832_v6, 1 }
  0x40   : > { %1408 = vmatprep.mubr.bf16.mxu0 %v4721_v47  ;;  %3954 = vmatmul.mubr.bf16.gmra.mrb[8].mxu1 %v4725_v10  ;;  %v4765_v20 = vsel %vm4538_vm3, 0, %v685_v2  ;;  %v612_v4 = vrot.slane %v610_v37, 7  ;;  %v620_v2 = vshll.u32 %v4311_v56, 16  ;;  %v4314_v37 = vld [vmem:[%s4515_s23 + $0x38] sm:$0xff]  }
  0x41   : > { %3650 = vmatpush3.bf16.msra.mxu1 %v4299_v17  ;;  %1409 = vmatmul.mubr.bf16.gmra.mrb[8].mxu0 %v4677_v3  ;;  %v4307_v17 = vld [vmem:[%s5557_s3 + $0x78] sm:$0xff]   ;;  %v1092_v32 = vrot.slane %v4765_v20, 1  ;;  %v4777_v35 = vsel %vm4538_vm3, 0, %v692_v12  ;;  %v4312_v12 = vld [vmem:[%s4515_s23 + $0x30] sm:$0xff]  }
  0x42   : > { %3651 = vmatprep.subr.bf16.mxu1 %v4300_v27  ;;  %3922 = vmatpush3.bf16.msra.mxu0 %v4477_v13  ;;  %v4761_v13 = vsel %vm4538_vm3, 0, %v608_v62  ;;  %v1095_v50 = vrot.slane %v4777_v35, 1  ;;  %v617_v62 = vshrl.u32 %v4311_v56, 16  ;;  %v4798_v6 = vsel %vm4538_vm3, %v612_v4, 0 }
  0x43   : > { %3923 = vmatprep.subr.bf16.mxu0 %v4493_v16  ;;  %v825_v26 = vshrl.u32 %v4761_v13, 16  ;;  %v827_v27 = vshll.u32 %v4761_v13, 16  ;;  %v4786_v46 = vsel %vm1046_vm2, %v1092_v32, %v1093_v8 }
  0x44   : > { %5565 = vst [vmem:[#allocation2_spill] sm:$0xff] %v4786_v46  ;;  %3957 = vmatprep.mubr.bf16.mxu1 %v4786_v46  ;;  %v619_v25 = vrot.slane %v617_v62, 7 }
  0x45   : > { %3652 = vmatpush3.bf16.msra.mxu1 %v4301_v42  ;;  %v442_v42 = vld [vmem:[%s370_s26] sm:$0xf]  ;;  %v829_v45 = vrot.slane %v827_v27, 1 }
  0x46   : > { %3653 = vmatprep.subr.bf16.mxu1 %v4305_v59  ;;  %3924 = vmatpush3.bf16.msra.mxu0 %v4493_v16  ;;  %v461_v55 = vmul.bf16 0.0, %v442_v42  ;;  %v462_v59 = vmul.bf16 0.0, %v443_v52  ;;  %v4793_v16 = vsel %vm1046_vm2, %v1095_v50, %v1096_v22  ;;  %v844_v22 = vshll.u32 %v4798_v6, 16 }
  0x47   : > { %3925 = vmatprep.subr.bf16.mxu0 %v4509_v19  ;;  %v830_v60 = vor.u32 %v829_v45, %v825_v26  ;;  %5566 = vst [vmem:[#allocation3_spill] sm:$0xff] %v4793_v16  ;;  %v622_v42 = vor.u32 %v620_v2, %v619_v25  ;;  %v4819_v50 = vsel %vm4538_vm3, %v619_v25, 0 }
  0x48   : > { %3958 = vmatmul.mubr.bf16.gmra.mrb[12].mxu1 %v4793_v16  ;;  %v3152_v8 = vcombine.low %v461_v55, %v462_v59  ;;  %v627_v55 = vshll.u32 %v4312_v12, 16  ;;  %v856_v59 = vshll.u32 %v4819_v50, 16 }
  0x49   : > { %3654 = vmatpush3.bf16.msra.mxu1 %v4306_v61  ;;  %v615_v61 = vor.u32 %v613_v38, %v612_v4  ;;  %v846_v38 = vrot.slane %v844_v22, 1  ;;  %v4824_v4 = vsel %vm4538_vm3, 0, %v622_v42 }
  0x4a   : > { %3655 = vmatprep.subr.bf16.mxu1 %v4307_v17  ;;  %3926 = vmatpush3.bf16.msra.mxu0 %v4509_v19  ;;  %v4803_v17 = vsel %vm775_vm4, %v830_v60, %v834_v29  ;;  %v575_v27 = vshrl.u32 %v3152_v8, 16  ;;  %v578_v32 = vshll.u32 %v3152_v8, 16  ;;  %v624_v19 = vshrl.u32 %v4312_v12, 16 }
  0x4b   : > { %3927 = vmatprep.subr.bf16.mxu0 %v4529_v23  ;;  %1416 = vmatprep.mubr.bf16.mxu0 %v4803_v17  ;;  %v4810_v26 = vsel %vm4538_vm3, 0, %v615_v61  ;;  %v631_v60 = vshrl.u32 %v4314_v37, 16  ;;  %v849_v61 = vshrl.u32 %v4824_v4, 16  ;;  %v851_v8 = vshll.u32 %v4824_v4, 16 }
  0x4c   : > { %1417 = vmatmul.mubr.bf16.gmra.mrb[12].mxu0 %v4761_v13  ;;  %v837_v29 = vshrl.u32 %v4810_v26, 16  ;;  %v577_v45 = vrot.slane %v575_v27, 7  ;;  %v626_v52 = vrot.slane %v624_v19, 7  ;;  %v858_v22 = vrot.slane %v856_v59, 1 }
  0x4d   : > { %3656 = vmatpush3.bf16.msra.mxu1 %v4308_v34  ;;  %v839_v34 = vshll.u32 %v4810_v26, 16  ;;  %v853_v19 = vrot.slane %v851_v8, 1 }
  0x4e   : > { %3961 = vmatprep.subr.bf16.mxu1 %v4782_v44  ;;  %3928 = vmatpush3.bf16.msra.mxu0 %v4529_v23  ;;  %v580_v62 = vor.u32 %v578_v32, %v577_v45  ;;  %v4829_v2 = vsel %vm4538_vm3, %v577_v45, 0  ;;  %v629_v25 = vor.u32 %v627_v55, %v626_v52  ;;  %v4840_v32 = vsel %vm4538_vm3, %v626_v52, 0 }
  0x4f   : > { %v841_v56 = vrot.slane %v839_v34, 1  ;;  %v784_v23 = vshll.u32 %v4829_v2, 16  ;;  %v633_v34 = vrot.slane %v631_v60, 7  ;;  %v854_v55 = vor.u32 %v853_v19, %v849_v61 }
  0x50   : > { %v4836_v27 = vsel %vm4538_vm3, 0, %v580_v62  ;;  %v868_v59 = vshll.u32 %v4840_v32, 16  ;;  %v634_v62 = vshll.u32 %v4314_v37, 16 }
  0x51   : > { %v842_v12 = vor.u32 %v841_v56, %v837_v29  ;;  %v777_v45 = vshrl.u32 %v4836_v27, 16  ;;  %v779_v29 = vshll.u32 %v4836_v27, 16  ;;  %v4850_v56 = vsel %vm4538_vm3, 0, %v629_v25 }
  0x52   : > { %v786_v8 = vrot.slane %v784_v23, 1  ;;  %v863_v60 = vshll.u32 %v4850_v56, 16  ;;  %v636_v16 = vor.u32 %v634_v62, %v633_v34  ;;  %v870_v19 = vrot.slane %v868_v59, 1 }
  0x53   : > { %v4843_v42 = vsel %vm775_vm4, %v842_v12, %v846_v38  ;;  %v781_v52 = vrot.slane %v779_v29, 1  ;;  %v861_v38 = vshrl.u32 %v4850_v56, 16  ;;  %v4857_v12 = vsel %vm775_vm4, %v854_v55, %v858_v22  ;;  %v4313_v22 = vld [vmem:[%s5557_s3 + $0x88] sm:$0xff]   ;;  %v4320_v55 = vld [vmem:[%s5557_s3 + $0x1c0] sm:$0xff]  }
  0x54   : > { %1424 = vmatprep.mubr.bf16.mxu0 %v4843_v42  ;;  %v865_v25 = vrot.slane %v863_v60, 1  ;;  %v4862_v37 = vsel %vm4538_vm3, 0, %v636_v16  ;;  %v4866_v23 = vsel %vm4538_vm3, %v633_v34, 0  ;;  %3777 = vmatprep.subr.bf16.mxu0 %v4320_v55  ;;  %v885_v60 = vshrl.u32 %v4567_v49, 16 }
  0x55   : > { %1425 = vmatmul.mubr.bf16.gmra.mrb[16].mxu0 %v4810_v26  ;;  %v782_v61 = vor.u32 %v781_v52, %v777_v45  ;;  %v875_v45 = vshll.u32 %v4862_v37, 16  ;;  %v873_v34 = vshrl.u32 %v4862_v37, 16  ;;  %v880_v62 = vshll.u32 %v4866_v23, 16  ;;  %v4315_v52 = vld [vmem:[%s5557_s3 + $0x90] sm:$0xff]  }
  0x56   : > { %1432 = vmatprep.mubr.bf16.mxu0 %v4857_v12  ;;  %v866_v46 = vor.u32 %v865_v25, %v861_v38  ;;  %v887_v38 = vshll.u32 %v4567_v49, 16  ;;  %v892_v25 = vshll.u32 %v4558_v43, 16  ;;  %v4318_v43 = vld [vmem:[%s5557_s3 + $0xa8] sm:$0xff]  }
  0x57   : > { %v787_v29 = vsel %vm775_vm4, %v782_v61, %v786_v8  ;;  %v877_v59 = vrot.slane %v875_v45, 1  ;;  %v882_v8 = vrot.slane %v880_v62, 1  ;;  %v899_v45 = vshll.u32 %v4580_v57, 16 }
  0x58   : > { %1858 = vmatprep.mubr.bf16.mxu1 %v787_v29  ;;  %v4878_v16 = vsel %vm775_vm4, %v866_v46, %v870_v19  ;;  %v889_v61 = vrot.slane %v887_v38, 1  ;;  %v4317_v19 = vld [vmem:[%s5557_s3 + $0xa0] sm:$0xff]   ;;  %v904_v62 = vshll.u32 %v4571_v51, 16  ;;  %v911_v51 = vshll.u32 %v4631_v33, 16 }
  0x59   : > { %1859 = vmatmul.mubr.bf16.vlgmr.msra.gmra.mrb[16].mxu1 %v4836_v27  ;;  %v878_v46 = vor.u32 %v877_v59, %v873_v34  ;;  %v897_v34 = vshrl.u32 %v4580_v57, 16  ;;  %v901_v59 = vrot.slane %v899_v45, 1  ;;  %v923_v45 = vshll.u32 %v4641_v39, 16 }
  0x5a   : > { %3962 = vmatpush3.bf16.msra.mxu1 %v4782_v44  ;;  %1866 = vmatprep.mubr.bf16.mxu1 %v4593_v9  ;;  %v4316_v44 = vld [vmem:[%s5557_s3 + $0x98] sm:$0xff]   ;;  %v890_v29 = vor.u32 %v889_v61, %v885_v60 }
  0x5b   : > { %3963 = vmatprep.subr.bf16.mxu1 %v4313_v22  ;;  %v4895_v9 = vsel %vm775_vm4, %v878_v46, %v882_v8  ;;  %v1047_v46 = vrot.slane %v4836_v27, 1  ;;  %v1048_v8 = vrot.slane %v4829_v2, 1  ;;  %v902_v38 = vor.u32 %v901_v59, %v897_v34  ;;  %v4328_v61 = vld [vmem:[%s5557_s3 + $0xb8] sm:$0xff]  }
  0x5c   : > { %v916_v27 = vshll.u32 %v4621_v28, 16  ;;  %v921_v34 = vshrl.u32 %v4641_v39, 16  ;;  %v925_v59 = vrot.slane %v923_v45, 1 }
  0x5d   : > { %1433 = vmatmul.mubr.bf16.gmra.mrb[20].mxu0 %v4824_v4  ;;  %v4925_v60 = vsel %vm1046_vm2, %v1047_v46, %v1048_v8  ;;  %v935_v8 = vshll.u32 %v4696_v24, 16 }
  0x5e   : > { %1440 = vmatprep.mubr.bf16.mxu0 %v4878_v16  ;;  %3964 = vmatpush3.bf16.msra.mxu1 %v4313_v22  ;;  %v894_v22 = vrot.slane %v892_v25, 1  ;;  %v909_v25 = vshrl.u32 %v4631_v33, 16 }
  0x5f   : > { %3965 = vmatprep.subr.bf16.mxu1 %v4315_v52 }
  0x60   : > { %v4911_v55 = vsel %vm775_vm4, %v890_v29, %v894_v22  ;;  %v4939_v29 = vld [vmem:[%s5557_s3 + $0x200] sm:$0xff]   ;;  %v918_v22 = vrot.slane %v916_v27, 1  ;;  %v947_v27 = vshll.u32 %v4706_v1, 16 }
  0x61   : > { %1867 = vmatmul.mubr.bf16.gmra.mrb[20].mxu1 %v4554_v41 }
  0x62   : > { %1874 = vmatprep.mubr.bf16.mxu1 %v4655_v53  ;;  %3966 = vmatpush3.bf16.msra.mxu1 %v4315_v52  ;;  %v4319_v52 = vld [vmem:[%s5557_s3 + $0xb0] sm:$0xff]  }
  0x63   : > { %3967 = vmatprep.subr.bf16.mxu1 %v4316_v44 }
  0x65   : > { %1441 = vmatmul.mubr.bf16.gmra.mrb[24].mxu0 %v4850_v56 }
  0x66   : > { %1448 = vmatprep.mubr.bf16.mxu0 %v4895_v9  ;;  %3968 = vmatpush3.bf16.msra.mxu1 %v4316_v44  ;;  %v906_v44 = vrot.slane %v904_v62, 1  ;;  %v928_v62 = vshll.u32 %v4625_v31, 16  ;;  %v940_v31 = vshll.u32 %v4688_v18, 16  ;;  %v952_v18 = vshll.u32 %v4692_v7, 16 }
  0x67   : > { %3969 = vmatprep.subr.bf16.mxu1 %v4317_v19  ;;  %v964_v7 = vshll.u32 %v4742_v5, 16  ;;  %v976_v5 = vshll.u32 %v4749_v15, 16  ;;  %v1050_v15 = vrot.slane %v4554_v41, 1  ;;  %v1057_v41 = vrot.slane %v4665_v58, 1  ;;  %v4323_v58 = vld [vmem:[%s5557_s3 + $0x188] sm:$0xff]  }
  0x68   : > { %v4934_v2 = vsel %vm775_vm4, %v902_v38, %v906_v44  ;;  %v930_v46 = vrot.slane %v928_v62, 1  ;;  %v933_v44 = vshrl.u32 %v4696_v24, 16 }
  0x69   : > { %1875 = vmatmul.mubr.bf16.gmra.mrb[24].mxu1 %v4611_v21 }
  0x6a   : > { %1882 = vmatprep.mubr.bf16.mxu1 %v4721_v47  ;;  %3970 = vmatpush3.bf16.msra.mxu1 %v4317_v19  ;;  %v913_v19 = vrot.slane %v911_v51, 1  ;;  %v937_v51 = vrot.slane %v935_v8, 1 }
  0x6b   : > { %3971 = vmatprep.subr.bf16.mxu1 %v4318_v43 }
  0x6c   : > { %v914_v28 = vor.u32 %v913_v19, %v909_v25  ;;  %v942_v25 = vrot.slane %v940_v31, 1 }
  0x6d   : > { %1449 = vmatmul.mubr.bf16.gmra.mrb[28].mxu0 %v4862_v37 }
  0x6e   : > { %1456 = vmatprep.mubr.bf16.mxu0 %v4911_v55  ;;  %3972 = vmatpush3.bf16.msra.mxu1 %v4318_v43  ;;  %v4948_v43 = vsel %vm775_vm4, %v914_v28, %v918_v22  ;;  %v945_v28 = vshrl.u32 %v4706_v1, 16  ;;  %v949_v22 = vrot.slane %v947_v27, 1 }
  0x6f   : > { %3973 = vmatprep.subr.bf16.mxu1 %v4319_v52 }
  0x70   : > { %v950_v45 = vor.u32 %v949_v22, %v945_v28  ;;  %v978_v28 = vrot.slane %v976_v5, 1 }
  0x71   : > { %1883 = vmatmul.mubr.bf16.gmra.mrb[28].mxu1 %v4677_v3 }
  0x72   : > { %1890 = vmatprep.mubr.bf16.mxu1 %v4803_v17  ;;  %3974 = vmatpush3.bf16.msra.mxu1 %v4319_v52  ;;  %v926_v52 = vor.u32 %v925_v59, %v921_v34  ;;  %v954_v34 = vrot.slane %v952_v18, 1  ;;  %v959_v59 = vshll.u32 %v4765_v20, 16  ;;  %v1051_v18 = vrot.slane %v4548_v36, 1 }
  0x73   : > { %3975 = vmatprep.subr.bf16.mxu1 %v4328_v61 }
  0x74   : > { %v4958_v38 = vsel %vm775_vm4, %v926_v52, %v930_v46  ;;  %v4978_v62 = vsel %vm775_vm4, %v950_v45, %v954_v34  ;;  %v957_v52 = vshrl.u32 %v4765_v20, 16  ;;  %v961_v46 = vrot.slane %v959_v59, 1 }
  0x75   : > { %1457 = vmatmul.mubr.bf16.gmra.mrb[32].mxu0 %v4567_v49  ;;  %v5006_v45 = vsel %vm1046_vm2, %v1050_v15, %v1051_v18  ;;  %v1054_v34 = vrot.slane %v4600_v14, 1  ;;  %v1053_v59 = vrot.slane %v4611_v21, 1  ;;  %v4322_v14 = vld [vmem:[%s5557_s3 + $0x1c8] sm:$0xff]   ;;  %v1065_v15 = vrot.slane %v4824_v4, 1 }
  0x76   : > { %1464 = vmatprep.mubr.bf16.mxu0 %v4934_v2  ;;  %3976 = vmatpush3.bf16.msra.mxu1 %v4328_v61  ;;  %v938_v61 = vor.u32 %v937_v51, %v933_v44  ;;  %v962_v8 = vor.u32 %v961_v46, %v957_v52  ;;  %v966_v44 = vrot.slane %v964_v7, 1  ;;  %v971_v51 = vshll.u32 %v4777_v35, 16  ;;  %v4321_v46 = vld [vmem:[%s5557_s3 + $0x180] sm:$0xff]  }
  0x77   : > { %4009 = vmatprep.subr.bf16.mxu1 %v4939_v29  ;;  %v1056_v52 = vrot.slane %v4677_v3, 1  ;;  %v5016_v36 = vsel %vm1046_vm2, %v1053_v59, %v1054_v34  ;;  %v1066_v18 = vrot.slane %v4819_v50, 1  ;;  %v4329_v34 = vld [vmem:[%s5557_s3 + $0x1e0] sm:$0xff]   ;;  %v1068_v59 = vrot.slane %v4850_v56, 1  ;;  %v4331_v50 = vld [vmem:[%s5557_s3 + $0x1e8] sm:$0xff]  }
  0x78   : > { %v4968_v19 = vsel %vm775_vm4, %v938_v61, %v942_v25  ;;  %v4988_v31 = vsel %vm775_vm4, %v962_v8, %v966_v44  ;;  %v969_v61 = vshrl.u32 %v4777_v35, 16  ;;  %v973_v25 = vrot.slane %v971_v51, 1  ;;  %v4324_v51 = vld [vmem:[%s5557_s3 + $0x1d0] sm:$0xff]  }
  0x79   : > { %1891 = vmatmul.mubr.bf16.gmra.mrb[32].mxu1 %v4761_v13  ;;  %v5026_v7 = vsel %vm1046_vm2, %v1056_v52, %v1057_v41  ;;  %v1059_v8 = vrot.slane %v4761_v13, 1  ;;  %v1060_v44 = vrot.slane %v4738_v0, 1  ;;  %v4326_v0 = vld [vmem:[%s5557_s3 + $0x1d8] sm:$0xff]   ;;  %v1069_v52 = vrot.slane %v4840_v32, 1  ;;  %v4332_v32 = vld [vmem:[%s5557_s3 + $0x1a8] sm:$0xff]  }
  0x7a   : > { %1898 = vmatprep.mubr.bf16.mxu1 %v4843_v42  ;;  %v974_v27 = vor.u32 %v973_v25, %v969_v61  ;;  %v1062_v61 = vrot.slane %v4810_v26, 1  ;;  %v1063_v25 = vrot.slane %v4798_v6, 1  ;;  %v4327_v6 = vld [vmem:[%s5557_s3 + $0x198] sm:$0xff]   ;;  %v5068_v41 = vsel %vm1046_vm2, %v1065_v15, %v1066_v18 }
  0x7b   : > { %v5042_v5 = vsel %vm1046_vm2, %v1059_v8, %v1060_v44  ;;  %v1072_v8 = vrot.slane %v4866_v23, 1  ;;  %v4333_v44 = vld [vmem:[%s5557_s3 + $0x1f0] sm:$0xff]   ;;  %v4335_v23 = vld [vmem:[%s5557_s3 + $0x1f8] sm:$0xff]  }
  0x7c   : > { %v4997_v22 = vsel %vm775_vm4, %v974_v27, %v978_v28  ;;  %v4325_v27 = vld [vmem:[%s5557_s3 + $0x190] sm:$0xff]   ;;  %v5052_v28 = vsel %vm1046_vm2, %v1062_v61, %v1063_v25  ;;  %v4336_v25 = vld [vmem:[%s5557_s3 + $0x1b8] sm:$0xff]  }
  0x7d   : > { %1465 = vmatmul.mubr.bf16.gmra.mrb[36].mxu0 %v4580_v57  ;;  %v4334_v61 = vld [vmem:[%s5557_s3 + $0x1b0] sm:$0xff]  }
  0x7e   : > { %1472 = vmatprep.mubr.bf16.mxu0 %v4948_v43 }
  0x81   : > { %1899 = vmatmul.mubr.bf16.gmra.mrb[36].mxu1 %v4810_v26 }
  0x82   : > { %1906 = vmatprep.mubr.bf16.mxu1 %v4857_v12 }
  0x85   : > { %1473 = vmatmul.mubr.bf16.gmra.mrb[40].mxu0 %v4631_v33 }
  0x86   : > { %1480 = vmatprep.mubr.bf16.mxu0 %v4958_v38 }
  0x89   : > { %1907 = vmatmul.mubr.bf16.gmra.mrb[40].mxu1 %v4824_v4 }
  0x8a   : > { %1914 = vmatprep.mubr.bf16.mxu1 %v4878_v16 }
  0x8d   : > { %1481 = vmatmul.mubr.bf16.gmra.mrb[44].mxu0 %v4641_v39 }
  0x8e   : > { %1488 = vmatprep.mubr.bf16.mxu0 %v4968_v19 }
  0x91   : > { %1915 = vmatmul.mubr.bf16.gmra.mrb[44].mxu1 %v4850_v56 }
  0x92   : > { %1922 = vmatprep.mubr.bf16.mxu1 %v4895_v9 }
  0x95   : > { %1489 = vmatmul.mubr.bf16.gmra.mrb[48].mxu0 %v4696_v24 }
  0x96   : > { %1496 = vmatprep.mubr.bf16.mxu0 %v4978_v62 }
  0x99   : > { %1923 = vmatmul.mubr.bf16.gmra.mrb[48].mxu1 %v4862_v37 }
  0x9a   : > { %1930 = vmatprep.mubr.bf16.mxu1 %v4911_v55 }
  0x9d   : > { %1497 = vmatmul.mubr.bf16.gmra.mrb[52].mxu0 %v4706_v1 }
  0x9e   : > { %1504 = vmatprep.mubr.bf16.mxu0 %v4988_v31 }
  0xa1   : > { %1931 = vmatmul.mubr.bf16.gmra.mrb[52].mxu1 %v4567_v49 }
  0xa2   : > { %1938 = vmatprep.mubr.bf16.mxu1 %v4934_v2 }
  0xa5   : > { %1505 = vmatmul.mubr.bf16.gmra.mrb[56].mxu0 %v4765_v20 }
  0xa6   : > { %1512 = vmatprep.mubr.bf16.mxu0 %v4997_v22 }
  0xa9   : > { %1939 = vmatmul.mubr.bf16.gmra.mrb[56].mxu1 %v4580_v57 }
  0xaa   : > { %1946 = vmatprep.mubr.bf16.mxu1 %v4948_v43 }
  0xad   : > { %1513 = vmatmul.mubr.bf16.gmra.mrb[60].mxu0 %v4777_v35 }
  0xae   : > { %3929 = vmatprep.mubr.bf16.mxu0 %v5006_v45 }
  0xb1   : > { %1947 = vmatmul.mubr.bf16.gmra.mrb[60].mxu1 %v4631_v33 }
  0xb2   : > { %1954 = vmatprep.mubr.bf16.mxu1 %v4958_v38 }
  0xb5   : > { %3930 = vmatmul.mubr.bf16.vlgmr.msra.gmra.mrb[64].mxu0 %v5016_v36 }
  0xb6   : > { %3778 = vmatpush3.bf16.msra.mxu0 %v4321_v46  ;;  %3933 = vmatprep.mubr.bf16.mxu0 %v5026_v7  ;;  %v4330_v46 = vld [vmem:[%s5557_s3 + $0x1a0] sm:$0xff]  }
  0xb7   : > { %3779 = vmatprep.subr.bf16.mxu0 %v4322_v14  ;;  %v5078_v14 = vsel %vm1046_vm2, %v1068_v59, %v1069_v52 }
  0xb9   : > { %1955 = vmatmul.mubr.bf16.gmra.mrb[64].mxu1 %v4641_v39 }
  0xba   : > { %3780 = vmatpush3.bf16.msra.mxu0 %v4323_v58  ;;  %1962 = vmatprep.mubr.bf16.mxu1 %v4968_v19  ;;  %v1071_v58 = vrot.slane %v4862_v37, 1 }
  0xbb   : > { %3781 = vmatprep.subr.bf16.mxu0 %v4324_v51 }
  0xbc   : > { %v5092_v51 = vsel %vm1046_vm2, %v1071_v58, %v1072_v8 }
  0xbd   : > { %3934 = vmatmul.mubr.bf16.gmra.mrb[68].mxu0 %v5042_v5 }
  0xbe   : > { %3782 = vmatpush3.bf16.msra.mxu0 %v4325_v27  ;;  %3937 = vmatprep.mubr.bf16.mxu0 %v5052_v28  ;;  %v4338_v27 = vld [vmem:[%s5557_s3 + $0x208] sm:$0xff]  }
  0xbf   : > { %3783 = vmatprep.subr.bf16.mxu0 %v4326_v0 }
  0xc1   : > { %1963 = vmatmul.mubr.bf16.gmra.mrb[68].mxu1 %v4696_v24 }
  0xc2   : > { %3784 = vmatpush3.bf16.msra.mxu0 %v4327_v6  ;;  %1970 = vmatprep.mubr.bf16.mxu1 %v4978_v62 }
  0xc3   : > { %3785 = vmatprep.subr.bf16.mxu0 %v4329_v34 }
  0xc5   : > { %3938 = vmatmul.mubr.bf16.gmra.mrb[72].mxu0 %v5068_v41 }
  0xc6   : > { %3786 = vmatpush3.bf16.msra.mxu0 %v4330_v46  ;;  %3941 = vmatprep.mubr.bf16.mxu0 %v5078_v14 }
  0xc7   : > { %3787 = vmatprep.subr.bf16.mxu0 %v4331_v50 }
  0xc9   : > { %1971 = vmatmul.mubr.bf16.gmra.mrb[72].mxu1 %v4706_v1 }
  0xca   : > { %3788 = vmatpush3.bf16.msra.mxu0 %v4332_v32  ;;  %1978 = vmatprep.mubr.bf16.mxu1 %v4988_v31 }
  0xcb   : > { %3789 = vmatprep.subr.bf16.mxu0 %v4333_v44 }
  0xcd   : > { %3942 = vmatmul.mubr.bf16.gmra.mrb[76].mxu0 %v5092_v51 }
  0xce   : > { %3790 = vmatpush3.bf16.msra.mxu0 %v4334_v61  ;;  %2373 = vmatprep.mubr.bf16.mxu0 %v4655_v53  ;;  %v4339_v53 = vld [vmem:[%s5557_s3 + $0x210] sm:$0xff]  }
  0xcf   : > { %3791 = vmatprep.subr.bf16.mxu0 %v4335_v23 }
  0xd1   : > { %1979 = vmatmul.mubr.bf16.gmra.mrb[76].mxu1 %v4765_v20 }
  0xd2   : > { %3792 = vmatpush3.bf16.msra.mxu0 %v4336_v25  ;;  %3977 = vmatprep.mubr.bf16.mxu1 %v4925_v60 }
  0xd5   : > { %2374 = vmatmul.mubr.bf16.vlgmr.msra.gmra.mrb[80].mxu0 %v4611_v21  ;;  %v4340_v21 = vld [vmem:[%s5557_s3 + $0x218] sm:$0xff]  }
  0xd6   : > { %2381 = vmatprep.mubr.bf16.mxu0 %v4721_v47  ;;  %v4342_v47 = vld [vmem:[%s5557_s3 + $0x228] sm:$0xff]  }
  0xd9   : > { %3978 = vmatmul.mubr.bf16.vlgmr.msra.gmra.mrb[80].mxu1 %v5006_v45 }
  0xda   : > { %4010 = vmatpush3.bf16.msra.mxu1 %v4939_v29  ;;  %3981 = vmatprep.mubr.bf16.mxu1 %v5016_v36 }
  0xdb   : > { %4011 = vmatprep.subr.bf16.mxu1 %v4338_v27 }
  0xdd   : > { %2382 = vmatmul.mubr.bf16.gmra.mrb[84].mxu0 %v4677_v3  ;;  %v4341_v3 = vld [vmem:[%s5557_s3 + $0x220] sm:$0xff]  }
  0xde   : > { %2389 = vmatprep.mubr.bf16.mxu0 %v4803_v17  ;;  %4012 = vmatpush3.bf16.msra.mxu1 %v4338_v27  ;;  %v4344_v17 = vld [vmem:[%s5557_s3 + $0x238] sm:$0xff]  }
  0xdf   : > { %4013 = vmatprep.subr.bf16.mxu1 %v4339_v53 }
  0xe1   : > { %3982 = vmatmul.mubr.bf16.gmra.mrb[84].mxu1 %v5026_v7 }
  0xe2   : > { %3985 = vmatprep.mubr.bf16.mxu1 %v5042_v5  ;;  %4014 = vmatpush3.bf16.msra.mxu1 %v4339_v53 }
  0xe3   : > { %4015 = vmatprep.subr.bf16.mxu1 %v4340_v21 }
  0xe5   : > { %2390 = vmatmul.mubr.bf16.gmra.mrb[88].mxu0 %v4761_v13  ;;  %v4343_v13 = vld [vmem:[%s5557_s3 + $0x230] sm:$0xff]  }
  0xe6   : > { %2397 = vmatprep.mubr.bf16.mxu0 %v4843_v42  ;;  %4016 = vmatpush3.bf16.msra.mxu1 %v4340_v21 }
  0xe7   : > { %4017 = vmatprep.subr.bf16.mxu1 %v4341_v3 }
  0xe9   : > { %3986 = vmatmul.mubr.bf16.gmra.mrb[88].mxu1 %v5052_v28 }
  0xea   : > { %3989 = vmatprep.mubr.bf16.mxu1 %v5068_v41  ;;  %4018 = vmatpush3.bf16.msra.mxu1 %v4341_v3 }
  0xeb   : > { %4019 = vmatprep.subr.bf16.mxu1 %v4342_v47 }
  0xed   : > { %2398 = vmatmul.mubr.bf16.gmra.mrb[92].mxu0 %v4810_v26 }
  0xee   : > { %2405 = vmatprep.mubr.bf16.mxu0 %v4857_v12  ;;  %4020 = vmatpush3.bf16.msra.mxu1 %v4342_v47 }
  0xef   : > { %4021 = vmatprep.subr.bf16.mxu1 %v4343_v13 }
  0xf1   : > { %3990 = vmatmul.mubr.bf16.gmra.mrb[92].mxu1 %v5078_v14 }
  0xf2   : > { %3993 = vmatprep.mubr.bf16.mxu1 %v5092_v51  ;;  %4022 = vmatpush3.bf16.msra.mxu1 %v4343_v13 }
  0xf3   : > { %4023 = vmatprep.subr.bf16.mxu1 %v4344_v17 }
  0xf5   : > { %2406 = vmatmul.mubr.bf16.gmra.mrb[96].mxu0 %v4824_v4 }
  0xf6   : > { %2413 = vmatprep.mubr.bf16.mxu0 %v4878_v16  ;;  %4024 = vmatpush3.bf16.msra.mxu1 %v4344_v17 }
  0xf9   : > { %3994 = vmatmul.mubr.bf16.gmra.mrb[0].mxu1 %v4588_v63 }
  0xfa   : > { %3997 = vmatprep.mubr.bf16.mxu1 %v4596_v11 }
  0xfd   : > { %2414 = vmatmul.mubr.bf16.gmra.mrb[100].mxu0 %v4850_v56 }
  0xfe   : > { %2421 = vmatprep.mubr.bf16.mxu0 %v4895_v9 }
 0x101   : > { %3998 = vmatmul.mubr.bf16.gmra.mrb[4].mxu1 %v4650_v48 }
 0x102   : > { %4001 = vmatprep.mubr.bf16.mxu1 %v4659_v54 }
 0x103   : > { %v3521_v26 = vpop.f32.mrb[0].mxu0 }
 0x104   : > { %v3522_v42 = vpop.f32.mrb[1].mxu0 }
 0x105   : > { %v5154_v12 = vadd.f32 %v3522_v42, %v3521_v26  ;;  %v3524_v60 = vpop.f32.mrb[2].mxu0  ;;  %2422 = vmatmul.mubr.bf16.gmra.mrb[104].mxu0 %v4862_v37  ;;  %v5567_v37 = vld [vmem:[#allocation2_spill] sm:$0xff] }
 0x106   : > { %v3525_v4 = vpop.f32.mrb[3].mxu0  ;;  %2429 = vmatprep.mubr.bf16.mxu0 %v4911_v55 }
 0x107   : > { %v5158_v16 = vadd.f32 %v3525_v4, %v3524_v60 }
 0x109   : > { %4002 = vmatmul.mubr.bf16.gmra.mrb[8].mxu1 %v4715_v40 }
 0x10a   : > { %4005 = vmatprep.mubr.bf16.mxu1 %v4725_v10 }
 0x10b   : > { %v3527_v29 = vpop.f32.mrb[4].mxu0 }
 0x10c   : > { %v3528_v56 = vpop.f32.mrb[5].mxu0 }
 0x10d   : > { %v5163_v9 = vadd.f32 %v3528_v56, %v3527_v29  ;;  %v3530_v45 = vpop.f32.mrb[6].mxu0  ;;  %2430 = vmatmul.mubr.bf16.gmra.mrb[108].mxu0 %v4567_v49 }
 0x10e   : > { %v3531_v0 = vpop.f32.mrb[7].mxu0  ;;  %2437 = vmatprep.mubr.bf16.mxu0 %v4934_v2  ;;  %v464_v2 = vld [vmem:[%s387_s11 + $0x4] sm:$0xf] }
 0x10f   : > { %v5166_v6 = vadd.f32 %v3531_v0, %v3530_v45  ;;  %v483_v52 = vmul.bf16 0.0, %v464_v2 }
 0x111   : > { %4006 = vmatmul.mubr.bf16.gmra.mrb[12].mxu1 %v5567_v37 }
 0x112   : > { %4025 = vmatprep.mubr.bf16.mxu1 %v5016_v36 }
 0x114   : > { %v3533_v55 = vpop.f32.mrb[8].mxu0 }
 0x115   : > { %2438 = vmatmul.mubr.bf16.gmra.mrb[112].mxu0 %v4580_v57  ;;  %v3534_v15 = vpop.f32.mrb[9].mxu0  ;;  %v463_v57 = vld [vmem:[%s387_s11] sm:$0xf] }
 0x116   : > { %v5172_v18 = vadd.f32 %v3534_v15, %v3533_v55  ;;  %v3536_v34 = vpop.f32.mrb[10].mxu0  ;;  %2445 = vmatprep.mubr.bf16.mxu0 %v4948_v43  ;;  %v482_v43 = vmul.bf16 0.0, %v463_v57 }
 0x117   : > { %v3537_v59 = vpop.f32.mrb[11].mxu0 }
 0x118   : > { %v5176_v49 = vadd.f32 %v3537_v59, %v3536_v34 }
 0x119   : > { %4026 = vmatmul.mubr.bf16.vlgmr.msra.gmra.mrb[80].mxu1 %v5026_v7  ;;  %v3169_v7 = vcombine.low %v482_v43, %v483_v52 }
 0x11a   : > { %4029 = vmatprep.mubr.bf16.mxu1 %v5042_v5 }
 0x11d   : > { %2446 = vmatmul.mubr.bf16.gmra.mrb[116].mxu0 %v4631_v33 }
 0x11e   : > { %2453 = vmatprep.mubr.bf16.mxu0 %v4958_v38  ;;  %v694_v38 = vshrl.u32 %v3169_v7, 16 }
 0x11f   : > { %v3539_v36 = vpop.f32.mrb[12].mxu0 }
 0x120   : > { %v3540_v46 = vpop.f32.mrb[13].mxu0  ;;  %v696_v25 = vrot.slane %v694_v38, 7 }
 0x121   : > { %v5185_v50 = vadd.f32 %v3540_v46, %v3539_v36  ;;  %v3542_v32 = vpop.f32.mrb[14].mxu0  ;;  %4030 = vmatmul.mubr.bf16.gmra.mrb[84].mxu1 %v5052_v28 }
 0x122   : > { %v3543_v58 = vpop.f32.mrb[15].mxu0  ;;  %4033 = vmatprep.mubr.bf16.mxu1 %v5068_v41  ;;  %v697_v41 = vshll.u32 %v3169_v7, 16  ;;  %v774_v45 = vsel %vm4538_vm3, %v696_v25, 0 }
 0x123   : > { %v5188_v8 = vadd.f32 %v3543_v58, %v3542_v32  ;;  %v988_v57 = vshll.u32 %v774_v45, 16 }
 0x124   : > { %v699_v3 = vor.u32 %v697_v41, %v696_v25 }
 0x125   : > { %2454 = vmatmul.mubr.bf16.gmra.mrb[120].mxu0 %v4641_v39  ;;  %v990_v52 = vrot.slane %v988_v57, 1 }
 0x126   : > { %2461 = vmatprep.mubr.bf16.mxu0 %v4968_v19 }
 0x128   : > { %v3545_v33 = vpop.f32.mrb[16].mxu0 }
 0x129   : > { %v3546_v5 = vpop.f32.mrb[17].mxu0  ;;  %4034 = vmatmul.mubr.bf16.gmra.mrb[88].mxu1 %v5078_v14 }
 0x12a   : > { %v5193_v44 = vadd.f32 %v3546_v5, %v3545_v33  ;;  %v3548_v61 = vpop.f32.mrb[18].mxu0  ;;  %4037 = vmatprep.mubr.bf16.mxu1 %v5092_v51 }
 0x12b   : > { %v3549_v23 = vpop.f32.mrb[19].mxu0 }
 0x12c   : > { %v5196_v28 = vadd.f32 %v3549_v23, %v3548_v61  ;;  %v3657_v39 = vpop.f32.mrb[16].mxu1 }
 0x12d   : > { %2462 = vmatmul.mubr.bf16.gmra.mrb[124].mxu0 %v4696_v24  ;;  %v3658_v19 = vpop.f32.mrb[17].mxu1 }
 0x12e   : > { %2469 = vmatprep.mubr.bf16.mxu0 %v4978_v62  ;;  %v5201_v27 = vadd.f32 %v3658_v19, %v3657_v39  ;;  %v3660_v53 = vpop.f32.mrb[18].mxu1  ;;  %v5213_v62 = vsel %vm4538_vm3, 0, %v699_v3 }
 0x12f   : > { %v3661_v47 = vpop.f32.mrb[19].mxu1  ;;  %v983_v4 = vshll.u32 %v5213_v62, 16  ;;  %v981_v34 = vshrl.u32 %v5213_v62, 16 }
 0x130   : > { %v3551_v21 = vpop.f32.mrb[20].mxu0  ;;  %v5203_v13 = vadd.f32 %v3661_v47, %v3660_v53 }
 0x131   : > { %v3552_v14 = vpop.f32.mrb[21].mxu0  ;;  %4038 = vmatmul.mubr.bf16.gmra.mrb[92].mxu1 %v4588_v63  ;;  %v985_v59 = vrot.slane %v983_v4, 1 }
 0x132   : > { %v5205_v17 = vadd.f32 %v3552_v14, %v3551_v21  ;;  %v3554_v51 = vpop.f32.mrb[22].mxu0  ;;  %4041 = vmatprep.mubr.bf16.mxu1 %v4596_v11  ;;  %v1098_v14 = vrot.slane %v5213_v62, 1 }
 0x133   : > { %v3555_v26 = vpop.f32.mrb[23].mxu0  ;;  %v986_v43 = vor.u32 %v985_v59, %v981_v34 }
 0x134   : > { %v5208_v24 = vadd.f32 %v3555_v26, %v3554_v51  ;;  %v3663_v42 = vpop.f32.mrb[20].mxu1  ;;  %v1099_v51 = vrot.slane %v774_v45, 1 }
 0x135   : > { %2470 = vmatmul.mubr.bf16.gmra.mrb[128].mxu0 %v4706_v1  ;;  %v3664_v60 = vpop.f32.mrb[21].mxu1 }
 0x136   : > { %2477 = vmatprep.mubr.bf16.mxu0 %v4988_v31  ;;  %v5218_v29 = vadd.f32 %v3664_v60, %v3663_v42  ;;  %v3666_v63 = vpop.f32.mrb[22].mxu1 }
 0x137   : > { %v3667_v11 = vpop.f32.mrb[23].mxu1 }
 0x138   : > { %v3557_v56 = vpop.f32.mrb[24].mxu0  ;;  %v5222_v55 = vadd.f32 %v3667_v11, %v3666_v63  ;;  %v1100_v63 = vsel %vm1046_vm2, %v1098_v14, %v1099_v51 }
 0x139   : > { %v3558_v0 = vpop.f32.mrb[25].mxu0  ;;  %4042 = vmatmul.mubr.bf16.gmra.mrb[0].mxu1 %v4650_v48 }
 0x13a   : > { %v5224_v15 = vadd.f32 %v3558_v0, %v3557_v56  ;;  %v3560_v1 = vpop.f32.mrb[26].mxu0  ;;  %4045 = vmatprep.mubr.bf16.mxu1 %v4659_v54 }
 0x13b   : > { %v3561_v31 = vpop.f32.mrb[27].mxu0 }
 0x13c   : > { %v5228_v2 = vadd.f32 %v3561_v31, %v3560_v1  ;;  %v3669_v30 = vpop.f32.mrb[24].mxu1 }
 0x13d   : > { %2478 = vmatmul.mubr.bf16.gmra.mrb[132].mxu0 %v4765_v20  ;;  %v3670_v36 = vpop.f32.mrb[25].mxu1  ;;  %v991_v20 = vsel %vm775_vm4, %v986_v43, %v990_v52 }
 0x13e   : > { %2485 = vmatprep.mubr.bf16.mxu0 %v4997_v22  ;;  %v5233_v46 = vadd.f32 %v3670_v36, %v3669_v30  ;;  %v3672_v48 = vpop.f32.mrb[26].mxu1 }
 0x13f   : > { %v3673_v58 = vpop.f32.mrb[27].mxu1 }
 0x140   : > { %v3563_v32 = vpop.f32.mrb[28].mxu0  ;;  %v5235_v33 = vadd.f32 %v3673_v58, %v3672_v48 }
 0x141   : > { %v3564_v7 = vpop.f32.mrb[29].mxu0  ;;  %4046 = vmatmul.mubr.bf16.gmra.mrb[4].mxu1 %v4715_v40 }
 0x142   : > { %v5237_v38 = vadd.f32 %v3564_v7, %v3563_v32  ;;  %v3566_v5 = vpop.f32.mrb[30].mxu0  ;;  %4049 = vmatprep.mubr.bf16.mxu1 %v4725_v10 }
 0x143   : > { %v3567_v54 = vpop.f32.mrb[31].mxu0 }
 0x144   : > { %v5241_v22 = vadd.f32 %v3567_v54, %v3566_v5  ;;  %v3675_v61 = vpop.f32.mrb[28].mxu1 }
 0x145   : > { %2486 = vmatmul.mubr.bf16.gmra.mrb[136].mxu0 %v4777_v35  ;;  %v3676_v23 = vpop.f32.mrb[29].mxu1  ;;  %v5568_v35 = vld [vmem:[#allocation3_spill] sm:$0xff] }
 0x146   : > { %2493 = vmatprep.mubr.bf16.mxu0 %v991_v20  ;;  %v5245_v25 = vadd.f32 %v3676_v23, %v3675_v61  ;;  %v3678_v41 = vpop.f32.mrb[30].mxu1 }
 0x147   : > { %v3679_v19 = vpop.f32.mrb[31].mxu1 }
 0x148   : > { %v3569_v39 = vpop.f32.mrb[32].mxu0  ;;  %v5247_v21 = vadd.f32 %v3679_v19, %v3678_v41 }
 0x149   : > { %v3570_v53 = vpop.f32.mrb[33].mxu0  ;;  %4050 = vmatmul.mubr.bf16.gmra.mrb[8].mxu1 %v5567_v37 }
 0x14a   : > { %v5249_v40 = vadd.f32 %v3570_v53, %v3569_v39  ;;  %v3572_v3 = vpop.f32.mrb[34].mxu0  ;;  %4053 = vmatprep.mubr.bf16.mxu1 %v5568_v35 }
 0x14b   : > { %v3573_v47 = vpop.f32.mrb[35].mxu0 }
 0x14c   : > { %v5252_v10 = vadd.f32 %v3573_v47, %v3572_v3  ;;  %v3681_v26 = vpop.f32.mrb[32].mxu1 }
 0x14d   : > { %2494 = vmatmul.mubr.bf16.gmra.mrb[140].mxu0 %v5213_v62  ;;  %v3682_v42 = vpop.f32.mrb[33].mxu1 }
 0x14e   : > { %v5257_v60 = vadd.f32 %v3682_v42, %v3681_v26  ;;  %v3684_v4 = vpop.f32.mrb[34].mxu1 }
 0x14f   : > { %v3685_v11 = vpop.f32.mrb[35].mxu1 }
 0x150   : > { %v3575_v56 = vpop.f32.mrb[36].mxu0  ;;  %v5260_v0 = vadd.f32 %v3685_v11, %v3684_v4 }
 0x151   : > { %v3576_v37 = vpop.f32.mrb[37].mxu0  ;;  %4054 = vmatmul.mubr.bf16.gmra.mrb[12].mxu1 %v1100_v63 }
 0x152   : > { %v3577_v1 = vadd.f32 %v3576_v37, %v3575_v56  ;;  %v3578_v31 = vpop.f32.mrb[38].mxu0 }
 0x153   : > { %v3579_v34 = vpop.f32.mrb[39].mxu0 }
 0x154   : > { %v5262_v59 = vadd.f32 %v3579_v34, %v3578_v31  ;;  %v3687_v45 = vpop.f32.mrb[36].mxu1 }
 0x155   : > { %v3688_v62 = vpop.f32.mrb[37].mxu1 }
 0x156   : > { %v5264_v57 = vadd.f32 %v3688_v62, %v3687_v45  ;;  %v3690_v30 = vpop.f32.mrb[38].mxu1 }
 0x157   : > { %v3691_v43 = vpop.f32.mrb[39].mxu1 }
 0x158   : > { %v3581_v36 = vpop.f32.mrb[40].mxu0  ;;  %v5266_v48 = vadd.f32 %v3691_v43, %v3690_v30 }
 0x159   : > { %v3582_v52 = vpop.f32.mrb[41].mxu0 }
 0x15a   : > { %v5268_v32 = vadd.f32 %v3582_v52, %v3581_v36  ;;  %v3584_v58 = vpop.f32.mrb[42].mxu0 }
 0x15b   : > { %v3585_v7 = vpop.f32.mrb[43].mxu0 }
 0x15c   : > { %v5270_v5 = vadd.f32 %v3585_v7, %v3584_v58  ;;  %v3693_v54 = vpop.f32.mrb[40].mxu1 }
 0x15d   : > { %v3694_v20 = vpop.f32.mrb[41].mxu1 }
 0x15e   : > { %v5272_v61 = vadd.f32 %v3694_v20, %v3693_v54  ;;  %v3696_v23 = vpop.f32.mrb[42].mxu1 }
 0x15f   : > { %v3697_v39 = vpop.f32.mrb[43].mxu1 }
 0x160   : > { %v3587_v41 = vpop.f32.mrb[44].mxu0  ;;  %v5274_v53 = vadd.f32 %v3697_v39, %v3696_v23 }
 0x161   : > { %v3588_v19 = vpop.f32.mrb[45].mxu0 }
 0x162   : > { %v5276_v3 = vadd.f32 %v3588_v19, %v3587_v41  ;;  %v3590_v47 = vpop.f32.mrb[46].mxu0 }
 0x163   : > { %v3591_v35 = vpop.f32.mrb[47].mxu0 }
 0x164   : > { %v5278_v14 = vadd.f32 %v3591_v35, %v3590_v47  ;;  %v3699_v51 = vpop.f32.mrb[44].mxu1 }
 0x165   : > { %v3700_v26 = vpop.f32.mrb[45].mxu1 }
 0x166   : > { %v5280_v42 = vadd.f32 %v3700_v26, %v3699_v51  ;;  %v3702_v4 = vpop.f32.mrb[46].mxu1 }
 0x167   : > { %v3703_v56 = vpop.f32.mrb[47].mxu1 }
 0x168   : > { %v3593_v63 = vpop.f32.mrb[48].mxu0  ;;  %v5282_v37 = vadd.f32 %v3703_v56, %v3702_v4 }
 0x169   : > { %v3594_v11 = vpop.f32.mrb[49].mxu0 }
 0x16a   : > { %v5284_v31 = vadd.f32 %v3594_v11, %v3593_v63  ;;  %v3596_v34 = vpop.f32.mrb[50].mxu0 }
 0x16b   : > { %v3597_v45 = vpop.f32.mrb[51].mxu0 }
 0x16c   : > { %v5286_v62 = vadd.f32 %v3597_v45, %v3596_v34  ;;  %v3705_v30 = vpop.f32.mrb[48].mxu1 }
 0x16d   : > { %v3706_v36 = vpop.f32.mrb[49].mxu1 }
 0x16e   : > { %v3707_v43 = vadd.f32 %v3706_v36, %v3705_v30  ;;  %v3708_v52 = vpop.f32.mrb[50].mxu1 }
 0x16f   : > { %v3709_v7 = vpop.f32.mrb[51].mxu1 }
 0x170   : > { %v3599_v58 = vpop.f32.mrb[52].mxu0  ;;  %v5289_v20 = vadd.f32 %v3707_v43, %v5249_v40  ;;  %v3710_v23 = vadd.f32 %v3709_v7, %v3708_v52 }
 0x171   : > { %v3600_v54 = vpop.f32.mrb[53].mxu0 }
 0x172   : > { %v5291_v41 = vadd.f32 %v3600_v54, %v3599_v58  ;;  %v3602_v39 = vpop.f32.mrb[54].mxu0  ;;  %v5294_v47 = vadd.f32 %v3710_v23, %v5252_v10 }
 0x173   : > { %v3603_v19 = vpop.f32.mrb[55].mxu0 }
 0x174   : > { %v5296_v35 = vadd.f32 %v3603_v19, %v3602_v39  ;;  %v3711_v51 = vpop.f32.mrb[52].mxu1 }
 0x175   : > { %v3712_v26 = vpop.f32.mrb[53].mxu1 }
 0x176   : > { %v3713_v4 = vadd.f32 %v3712_v26, %v3711_v51  ;;  %v3714_v63 = vpop.f32.mrb[54].mxu1 }
 0x177   : > { %v3715_v11 = vpop.f32.mrb[55].mxu1 }
 0x178   : > { %v3605_v56 = vpop.f32.mrb[56].mxu0  ;;  %v5298_v45 = vadd.f32 %v3713_v4, %v3577_v1  ;;  %v3716_v40 = vadd.f32 %v3715_v11, %v3714_v63 }
 0x179   : > { %v3606_v34 = vpop.f32.mrb[57].mxu0 }
 0x17a   : > { %v5300_v30 = vadd.f32 %v3606_v34, %v3605_v56  ;;  %v3608_v36 = vpop.f32.mrb[58].mxu0  ;;  %v5303_v52 = vadd.f32 %v3716_v40, %v5262_v59 }
 0x17b   : > { %v3609_v43 = vpop.f32.mrb[59].mxu0 }
 0x17c   : > { %5569 = vst [vmem:[#allocation2_spill] sm:$0xff] %v5303_v52  ;;  %v5305_v10 = vadd.f32 %v3609_v43, %v3608_v36  ;;  %v3717_v58 = vpop.f32.mrb[56].mxu1 }
 0x17d   : > { %v3718_v7 = vpop.f32.mrb[57].mxu1 }
 0x17e   : > { %v3719_v54 = vadd.f32 %v3718_v7, %v3717_v58  ;;  %v3720_v23 = vpop.f32.mrb[58].mxu1 }
 0x17f   : > { %v3721_v19 = vpop.f32.mrb[59].mxu1 }
 0x180   : > { %v3611_v39 = vpop.f32.mrb[60].mxu0  ;;  %v5308_v1 = vadd.f32 %v3719_v54, %v5268_v32  ;;  %v3722_v26 = vadd.f32 %v3721_v19, %v3720_v23 }
 0x181   : > { %v3612_v51 = vpop.f32.mrb[61].mxu0 }
 0x182   : > { %v5310_v4 = vadd.f32 %v3612_v51, %v3611_v39  ;;  %v3614_v63 = vpop.f32.mrb[62].mxu0  ;;  %v5313_v59 = vadd.f32 %v3722_v26, %v5270_v5 }
 0x183   : > { %v3615_v56 = vpop.f32.mrb[63].mxu0 }
 0x184   : > { %v5315_v11 = vadd.f32 %v3615_v56, %v3614_v63  ;;  %v3723_v34 = vpop.f32.mrb[60].mxu1 }
 0x185   : > { %v3724_v40 = vpop.f32.mrb[61].mxu1 }
 0x186   : > { %v3725_v36 = vadd.f32 %v3724_v40, %v3723_v34  ;;  %v3726_v43 = vpop.f32.mrb[62].mxu1 }
 0x187   : > { %v3727_v7 = vpop.f32.mrb[63].mxu1 }
 0x188   : > { %v3931_v58 = vpop.f32.mrb[64].mxu0  ;;  %v5319_v54 = vadd.f32 %v3725_v36, %v5276_v3  ;;  %v3728_v23 = vadd.f32 %v3727_v7, %v3726_v43 }
 0x189   : > { %v1564_v52 = vadd.f32 %v3931_v58, %v5163_v9  ;;  %v1555_v32 = vpop.f32.mrb[65].mxu0 }
 0x18a   : > { %v1556_v39 = vadd.f32 %v5154_v12, %v1555_v32  ;;  %v3932_v19 = vpop.f32.mrb[66].mxu0  ;;  %v5327_v63 = vadd.f32 %v3728_v23, %v5278_v14 }
 0x18b   : > { %v5323_v5 = vadd.f32 %v5218_v29, %v1564_v52  ;;  %v1567_v51 = vadd.f32 %v3932_v19, %v5166_v6  ;;  %v1558_v26 = vpop.f32.mrb[67].mxu0 }
 0x18c   : > { %v5330_v56 = vadd.f32 %v5201_v27, %v1556_v39  ;;  %v1559_v9 = vadd.f32 %v5158_v16, %v1558_v26  ;;  %v3729_v34 = vpop.f32.mrb[64].mxu1 }
 0x18d   : > { %v5334_v3 = vadd.f32 %v5222_v55, %v1567_v51  ;;  %v3730_v29 = vpop.f32.mrb[65].mxu1 }
 0x18e   : > { %v5337_v12 = vadd.f32 %v5203_v13, %v1559_v9  ;;  %v3731_v52 = vadd.f32 %v3730_v29, %v3729_v34  ;;  %v3732_v40 = vpop.f32.mrb[66].mxu1 }
 0x18f   : > { %v3733_v36 = vpop.f32.mrb[67].mxu1 }
 0x190   : > { %v3935_v6 = vpop.f32.mrb[68].mxu0  ;;  %v5341_v27 = vadd.f32 %v3731_v52, %v5284_v31  ;;  %v3734_v58 = vadd.f32 %v3733_v36, %v3732_v40 }
 0x191   : > { %v1580_v14 = vadd.f32 %v3935_v6, %v5185_v50  ;;  %v1571_v43 = vpop.f32.mrb[69].mxu0 }
 0x192   : > { %v1572_v16 = vadd.f32 %v5172_v18, %v1571_v43  ;;  %v3936_v55 = vpop.f32.mrb[70].mxu0  ;;  %v5349_v23 = vadd.f32 %v3734_v58, %v5286_v62 }
 0x193   : > { %v5345_v7 = vadd.f32 %v5245_v25, %v1580_v14  ;;  %v1583_v13 = vadd.f32 %v3936_v55, %v5188_v8  ;;  %v1574_v32 = vpop.f32.mrb[71].mxu0 }
 0x194   : > { %v5352_v39 = vadd.f32 %v5233_v46, %v1572_v16  ;;  %v1575_v50 = vadd.f32 %v5176_v49, %v1574_v32  ;;  %v3735_v19 = vpop.f32.mrb[68].mxu1 }
 0x195   : > { %v5356_v31 = vadd.f32 %v5247_v21, %v1583_v13  ;;  %v3736_v25 = vpop.f32.mrb[69].mxu1 }
 0x196   : > { %v5359_v18 = vadd.f32 %v5235_v33, %v1575_v50  ;;  %v3737_v51 = vadd.f32 %v3736_v25, %v3735_v19  ;;  %v3738_v26 = vpop.f32.mrb[70].mxu1 }
 0x197   : > { %v3739_v9 = vpop.f32.mrb[71].mxu1 }
 0x198   : > { %v3939_v8 = vpop.f32.mrb[72].mxu0  ;;  %v5363_v46 = vadd.f32 %v3737_v51, %v5291_v41  ;;  %v3740_v29 = vadd.f32 %v3739_v9, %v3738_v26 }
 0x199   : > { %v1596_v62 = vadd.f32 %v3939_v8, %v5205_v17  ;;  %v1587_v34 = vpop.f32.mrb[73].mxu0 }
 0x19a   : > { %v1588_v49 = vadd.f32 %v5193_v44, %v1587_v34  ;;  %v3940_v21 = vpop.f32.mrb[74].mxu0  ;;  %v5371_v6 = vadd.f32 %v3740_v29, %v5296_v35 }
 0x19b   : > { %v5367_v52 = vadd.f32 %v5264_v57, %v1596_v62  ;;  %v1599_v33 = vadd.f32 %v3940_v21, %v5208_v24  ;;  %v1590_v40 = vpop.f32.mrb[75].mxu0 }
 0x19c   : > { %v5374_v36 = vadd.f32 %v5257_v60, %v1588_v49  ;;  %v1591_v17 = vadd.f32 %v5196_v28, %v1590_v40  ;;  %v3741_v14 = vpop.f32.mrb[72].mxu1 }
 0x19d   : > { %v5378_v41 = vadd.f32 %v5266_v48, %v1599_v33  ;;  %v3742_v57 = vpop.f32.mrb[73].mxu1 }
 0x19e   : > { %v5381_v44 = vadd.f32 %v5260_v0, %v1591_v17  ;;  %v3743_v43 = vadd.f32 %v3742_v57, %v3741_v14  ;;  %v3744_v58 = vpop.f32.mrb[74].mxu1 }
 0x19f   : > { %v3745_v16 = vpop.f32.mrb[75].mxu1 }
 0x1a0   : > { %v3943_v24 = vpop.f32.mrb[76].mxu0  ;;  %v5385_v60 = vadd.f32 %v3743_v43, %v5300_v30  ;;  %v3746_v13 = vadd.f32 %v3745_v16, %v3744_v58 }
 0x1a1   : > { %v1612_v35 = vadd.f32 %v3943_v24, %v5237_v38  ;;  %v1603_v55 = vpop.f32.mrb[77].mxu0 }
 0x1a2   : > { %v1604_v28 = vadd.f32 %v5224_v15, %v1603_v55  ;;  %v3944_v48 = vpop.f32.mrb[78].mxu0  ;;  %v5393_v19 = vadd.f32 %v3746_v13, %v5305_v10 }
 0x1a3   : > { %v5389_v32 = vadd.f32 %v5280_v42, %v1612_v35  ;;  %v1615_v0 = vadd.f32 %v3944_v48, %v5241_v22  ;;  %v1606_v50 = vpop.f32.mrb[79].mxu0 }
 0x1a4   : > { %v5396_v25 = vadd.f32 %v5272_v61, %v1604_v28  ;;  %v1607_v38 = vadd.f32 %v5228_v2, %v1606_v50  ;;  %v3747_v51 = vpop.f32.mrb[76].mxu1 }
 0x1a5   : > { %v5400_v30 = vadd.f32 %v5282_v37, %v1615_v0  ;;  %v3748_v42 = vpop.f32.mrb[77].mxu1 }
 0x1a6   : > { %v5403_v15 = vadd.f32 %v5274_v53, %v1607_v38  ;;  %v3749_v26 = vadd.f32 %v3748_v42, %v3747_v51  ;;  %v3750_v8 = vpop.f32.mrb[78].mxu1 }
 0x1a7   : > { %v3751_v9 = vpop.f32.mrb[79].mxu1 }
 0x1a8   : > { %v3793_v22 = vpop.f32.mrb[80].mxu0  ;;  %v5406_v10 = vadd.f32 %v3749_v26, %v5310_v4  ;;  %v3752_v61 = vadd.f32 %v3751_v9, %v3750_v8 }
 0x1a9   : > { %v3794_v62 = vpop.f32.mrb[81].mxu0 }
 0x1aa   : > { %v3795_v34 = vadd.f32 %v3794_v62, %v3793_v22  ;;  %v3796_v29 = vpop.f32.mrb[82].mxu0  ;;  %v5409_v37 = vadd.f32 %v3752_v61, %v5315_v11 }
 0x1ab   : > { %v3797_v2 = vpop.f32.mrb[83].mxu0 }
 0x1ac   : > { %v3798_v49 = vadd.f32 %v3797_v2, %v3796_v29  ;;  %v5412_v53 = vadd.f32 %v3795_v34, %v5330_v56 }
 0x1ae   : > { %v5415_v21 = vadd.f32 %v3798_v49, %v5337_v12 }
 0x1b0   : > { %v3799_v33 = vpop.f32.mrb[84].mxu0 }
 0x1b1   : > { %v3800_v40 = vpop.f32.mrb[85].mxu0 }
 0x1b2   : > { %v3801_v17 = vadd.f32 %v3800_v40, %v3799_v33  ;;  %v3802_v14 = vpop.f32.mrb[86].mxu0 }
 0x1b3   : > { %v3803_v4 = vpop.f32.mrb[87].mxu0 }
 0x1b4   : > { %v3804_v57 = vadd.f32 %v3803_v4, %v3802_v14  ;;  %v4075_v43 = vadd.f32 %v3801_v17, %v5323_v5 }
 0x1b6   : > { %v5419_v58 = vadd.f32 %v3804_v57, %v5334_v3 }
 0x1b8   : > { %v3805_v11 = vpop.f32.mrb[88].mxu0 }
 0x1b9   : > { %v3806_v24 = vpop.f32.mrb[89].mxu0 }
 0x1ba   : > { %v3807_v16 = vadd.f32 %v3806_v24, %v3805_v11  ;;  %v3808_v35 = vpop.f32.mrb[90].mxu0 }
 0x1bb   : > { %v3809_v56 = vpop.f32.mrb[91].mxu0 }
 0x1bc   : > { %v3810_v55 = vadd.f32 %v3809_v56, %v3808_v35  ;;  %v5422_v12 = vadd.f32 %v3807_v16, %v5352_v39 }
 0x1be   : > { %v5425_v13 = vadd.f32 %v3810_v55, %v5359_v18 }
 0x1c0   : > { %v3811_v28 = vpop.f32.mrb[92].mxu0 }
 0x1c1   : > { %v3812_v48 = vpop.f32.mrb[93].mxu0 }
 0x1c2   : > { %v3813_v0 = vadd.f32 %v3812_v48, %v3811_v28  ;;  %v3814_v50 = vpop.f32.mrb[94].mxu0 }
 0x1c3   : > { %v3815_v5 = vpop.f32.mrb[95].mxu0 }
 0x1c4   : > { %v3816_v38 = vadd.f32 %v3815_v5, %v3814_v50  ;;  %v5428_v3 = vadd.f32 %v3813_v0, %v5345_v7 }
 0x1c6   : > { %v5431_v51 = vadd.f32 %v3816_v38, %v5356_v31 }
 0x1c8   : > { %v3817_v42 = vpop.f32.mrb[96].mxu0 }
 0x1c9   : > { %v3818_v26 = vpop.f32.mrb[97].mxu0 }
 0x1ca   : > { %v3819_v8 = vadd.f32 %v3818_v26, %v3817_v42  ;;  %v3820_v39 = vpop.f32.mrb[98].mxu0 }
 0x1cb   : > { %v3821_v22 = vpop.f32.mrb[99].mxu0 }
 0x1cc   : > { %v3822_v9 = vadd.f32 %v3821_v22, %v3820_v39  ;;  %v5434_v18 = vadd.f32 %v3819_v8, %v5374_v36 }
 0x1ce   : > { %v5437_v62 = vadd.f32 %v3822_v9, %v5381_v44 }
 0x1d0   : > { %v3823_v61 = vpop.f32.mrb[100].mxu0 }
 0x1d1   : > { %v3824_v34 = vpop.f32.mrb[101].mxu0 }
 0x1d2   : > { %v3825_v29 = vadd.f32 %v3824_v34, %v3823_v61  ;;  %v3826_v7 = vpop.f32.mrb[102].mxu0 }
 0x1d3   : > { %v3827_v2 = vpop.f32.mrb[103].mxu0 }
 0x1d4   : > { %v3828_v49 = vadd.f32 %v3827_v2, %v3826_v7  ;;  %v5440_v31 = vadd.f32 %v3825_v29, %v5367_v52 }
 0x1d6   : > { %v5443_v33 = vadd.f32 %v3828_v49, %v5378_v41 }
 0x1d8   : > { %v3829_v40 = vpop.f32.mrb[104].mxu0 }
 0x1d9   : > { %v3830_v17 = vpop.f32.mrb[105].mxu0 }
 0x1da   : > { %v3831_v14 = vadd.f32 %v3830_v17, %v3829_v40  ;;  %v3832_v36 = vpop.f32.mrb[106].mxu0 }
 0x1db   : > { %v3833_v4 = vpop.f32.mrb[107].mxu0 }
 0x1dc   : > { %v3834_v57 = vadd.f32 %v3833_v4, %v3832_v36  ;;  %v5446_v44 = vadd.f32 %v3831_v14, %v5396_v25 }
 0x1de   : > { %v5449_v11 = vadd.f32 %v3834_v57, %v5403_v15 }
 0x1e0   : > { %v3835_v24 = vpop.f32.mrb[108].mxu0 }
 0x1e1   : > { %v3836_v16 = vpop.f32.mrb[109].mxu0 }
 0x1e2   : > { %v3837_v35 = vadd.f32 %v3836_v16, %v3835_v24  ;;  %v3838_v52 = vpop.f32.mrb[110].mxu0  ;;  %v5570_v24 = vld [vmem:[#allocation2_spill] sm:$0xff] }
 0x1e3   : > { %v3839_v56 = vpop.f32.mrb[111].mxu0 }
 0x1e4   : > { %v3840_v55 = vadd.f32 %v3839_v56, %v3838_v52  ;;  %v5452_v41 = vadd.f32 %v3837_v35, %v5389_v32 }
 0x1e6   : > { %v5455_v28 = vadd.f32 %v3840_v55, %v5400_v30 }
 0x1e8   : > { %v3841_v48 = vpop.f32.mrb[112].mxu0 }
 0x1e9   : > { %v3842_v0 = vpop.f32.mrb[113].mxu0 }
 0x1ea   : > { %v3843_v25 = vadd.f32 %v3842_v0, %v3841_v48  ;;  %v3844_v50 = vpop.f32.mrb[114].mxu0 }
 0x1eb   : > { %v3845_v5 = vpop.f32.mrb[115].mxu0 }
 0x1ec   : > { %v3846_v15 = vadd.f32 %v3845_v5, %v3844_v50  ;;  %v5458_v38 = vadd.f32 %v5289_v20, %v3843_v25  ;;  %v4027_v42 = vpop.f32.mrb[80].mxu1 }
 0x1ed   : > { %v4076_v8 = vadd.f32 %v4075_v43, %v4027_v42  ;;  %v2536_v32 = vpop.f32.mrb[81].mxu1 }
 0x1ee   : > { %v5461_v26 = vadd.f32 %v5294_v47, %v3846_v15  ;;  %v4080_v39 = vadd.f32 %v5412_v53, %v2536_v32  ;;  %v4028_v30 = vpop.f32.mrb[82].mxu1 }
 0x1ef   : > { %v4084_v9 = vadd.f32 %v5419_v58, %v4028_v30  ;;  %v2539_v61 = vpop.f32.mrb[83].mxu1  ;;  %v2894_v14 = vmul.f32 %v4076_v8, %v4076_v8 }
 0x1f0   : > { %v3847_v22 = vpop.f32.mrb[116].mxu0  ;;  %v4088_v20 = vadd.f32 %v5415_v21, %v2539_v61  ;;  %v2892_v29 = vmul.f32 %v4080_v39, %v4080_v39 }
 0x1f1   : > { %v3848_v34 = vpop.f32.mrb[117].mxu0  ;;  %v3417_v7 = vpack.c.bf16 %v4084_v9, %v4076_v8  ;;  %v2895_v52 = vmul.f32 %v4084_v9, %v4084_v9 }
 0x1f2   : > { %v3849_v47 = vadd.f32 %v3848_v34, %v3847_v22  ;;  %v3850_v43 = vpop.f32.mrb[118].mxu0  ;;  %v3412_v2 = vpack.c.bf16 %v4088_v20, %v4080_v39  ;;  %v2855_v49 = vadd.f32 %v4088_v20, %v4080_v39  ;;  %v2893_v40 = vmul.f32 %v4088_v20, %v4088_v20 }
 0x1f3   : > { %v3851_v53 = vpop.f32.mrb[119].mxu0  ;;  %3490 = vst [vmem:[%s5469_s14 + $0x8] sm:$0xff] %v3417_v7  }
 0x1f4   : > { %v3852_v58 = vadd.f32 %v3851_v53, %v3850_v43  ;;  %v5474_v17 = vadd.f32 %v5298_v45, %v3849_v47  ;;  %3413 = vst [vmem:[%s5469_s14] sm:$0xff] %v3412_v2   ;;  %v2856_v36 = vadd.f32 %v4076_v8, %v2855_v49  ;;  %v2924_v4 = vadd.f32 %v2893_v40, %v2892_v29  ;;  %v4031_v57 = vpop.f32.mrb[84].mxu1 }
 0x1f5   : > { %v4092_v16 = vadd.f32 %v5428_v3, %v4031_v57  ;;  %v2552_v35 = vpop.f32.mrb[85].mxu1 }
 0x1f6   : > { %v5478_v21 = vadd.f32 %v5570_v24, %v3852_v58  ;;  %v2925_v56 = vadd.f32 %v2924_v4, %v2894_v14  ;;  %v4096_v55 = vadd.f32 %v5422_v12, %v2552_v35  ;;  %v2857_v48 = vadd.f32 %v4084_v9, %v2856_v36  ;;  %v4032_v0 = vpop.f32.mrb[86].mxu1 }
 0x1f7   : > { %v4100_v45 = vadd.f32 %v5431_v51, %v4032_v0  ;;  %v2555_v50 = vpop.f32.mrb[87].mxu1  ;;  %v2898_v47 = vmul.f32 %v4092_v16, %v4092_v16 }
 0x1f8   : > { %v3853_v25 = vpop.f32.mrb[120].mxu0  ;;  %v2858_v15 = vadd.f32 %v4096_v55, %v2857_v48  ;;  %v2896_v42 = vmul.f32 %v4096_v55, %v4096_v55  ;;  %v2926_v8 = vadd.f32 %v2925_v56, %v2895_v52  ;;  %v4104_v32 = vadd.f32 %v5425_v13, %v2555_v50 }
 0x1f9   : > { %v3854_v5 = vpop.f32.mrb[121].mxu0  ;;  %v3427_v39 = vpack.c.bf16 %v4100_v45, %v4092_v16  ;;  %v2899_v49 = vmul.f32 %v4100_v45, %v4100_v45 }
 0x1fa   : > { %v3856_v3 = vpop.f32.mrb[122].mxu0  ;;  %v3855_v30 = vadd.f32 %v3854_v5, %v3853_v25  ;;  %v2927_v61 = vadd.f32 %v2926_v8, %v2896_v42  ;;  %v3422_v12 = vpack.c.bf16 %v4104_v32, %v4096_v55  ;;  %v2859_v9 = vadd.f32 %v4104_v32, %v2858_v15 }
 0x1fb   : > { %v3857_v22 = vpop.f32.mrb[123].mxu0  ;;  %v2897_v34 = vmul.f32 %v4104_v32, %v4104_v32  ;;  %3492 = vst [vmem:[%s5469_s14 + $0x18] sm:$0xff] %v3427_v39  }
 0x1fc   : > { %v3858_v20 = vadd.f32 %v3857_v22, %v3856_v3  ;;  %v5486_v51 = vadd.f32 %v5308_v1, %v3855_v30  ;;  %3491 = vst [vmem:[%s5469_s14 + $0x10] sm:$0xff] %v3422_v12   ;;  %v2860_v43 = vadd.f32 %v4092_v16, %v2859_v9  ;;  %v4035_v7 = vpop.f32.mrb[88].mxu1 }
 0x1fd   : > { %v2928_v29 = vadd.f32 %v2927_v61, %v2897_v34  ;;  %v4108_v13 = vadd.f32 %v5440_v31, %v4035_v7  ;;  %v2568_v53 = vpop.f32.mrb[89].mxu1 }
 0x1fe   : > { %v5491_v2 = vadd.f32 %v5313_v59, %v3858_v20  ;;  %v4112_v58 = vadd.f32 %v5434_v18, %v2568_v53  ;;  %v2861_v14 = vadd.f32 %v4100_v45, %v2860_v43  ;;  %v4036_v36 = vpop.f32.mrb[90].mxu1 }
 0x1ff   : > { %v2929_v40 = vadd.f32 %v2928_v29, %v2898_v47  ;;  %v4116_v1 = vadd.f32 %v5443_v33, %v4036_v36  ;;  %v2571_v57 = vpop.f32.mrb[91].mxu1  ;;  %v2902_v5 = vmul.f32 %v4108_v13, %v4108_v13 }
 0x200   : > { %v3859_v4 = vpop.f32.mrb[124].mxu0  ;;  %v2862_v16 = vadd.f32 %v4112_v58, %v2861_v14  ;;  %v2900_v35 = vmul.f32 %v4112_v58, %v4112_v58  ;;  %v4120_v52 = vadd.f32 %v5437_v62, %v2571_v57 }
 0x201   : > { %v3860_v24 = vpop.f32.mrb[125].mxu0  ;;  %v2930_v31 = vadd.f32 %v2929_v40, %v2899_v49  ;;  %v3437_v56 = vpack.c.bf16 %v4116_v1, %v4108_v13  ;;  %v2903_v39 = vmul.f32 %v4116_v1, %v4116_v1 }
 0x202   : > { %v3862_v59 = vpop.f32.mrb[126].mxu0  ;;  %v3861_v55 = vadd.f32 %v3860_v24, %v3859_v4  ;;  %v3432_v18 = vpack.c.bf16 %v4120_v52, %v4112_v58  ;;  %v2863_v25 = vadd.f32 %v4120_v52, %v2862_v16  ;;  %v2901_v45 = vmul.f32 %v4120_v52, %v4120_v52 }
 0x203   : > { %v3863_v48 = vpop.f32.mrb[127].mxu0  ;;  %v2931_v0 = vadd.f32 %v2930_v31, %v2900_v35  ;;  %3494 = vst [vmem:[%s5469_s14 + $0x28] sm:$0xff] %v3437_v56  }
 0x204   : > { %v3864_v50 = vadd.f32 %v3863_v48, %v3862_v59  ;;  %v5498_v33 = vadd.f32 %v5319_v54, %v3861_v55  ;;  %3493 = vst [vmem:[%s5469_s14 + $0x20] sm:$0xff] %v3432_v18   ;;  %v2864_v15 = vadd.f32 %v4108_v13, %v2863_v25  ;;  %v4039_v8 = vpop.f32.mrb[92].mxu1 }
 0x205   : > { %v2932_v42 = vadd.f32 %v2931_v0, %v2901_v45  ;;  %v4124_v62 = vadd.f32 %v5452_v41, %v4039_v8  ;;  %v2584_v32 = vpop.f32.mrb[93].mxu1 }
 0x206   : > { %v5503_v3 = vadd.f32 %v5327_v63, %v3864_v50  ;;  %v4128_v22 = vadd.f32 %v5446_v44, %v2584_v32  ;;  %v2865_v61 = vadd.f32 %v4116_v1, %v2864_v15  ;;  %v4040_v12 = vpop.f32.mrb[94].mxu1 }
 0x207   : > { %v2933_v30 = vadd.f32 %v2932_v42, %v2902_v5  ;;  %v4132_v54 = vadd.f32 %v5455_v28, %v4040_v12  ;;  %v2587_v34 = vpop.f32.mrb[95].mxu1  ;;  %v2906_v36 = vmul.f32 %v4124_v62, %v4124_v62 }
 0x208   : > { %v3865_v9 = vpop.f32.mrb[128].mxu0  ;;  %v2866_v47 = vadd.f32 %v4128_v22, %v2865_v61  ;;  %v2904_v43 = vmul.f32 %v4128_v22, %v4128_v22  ;;  %v4136_v29 = vadd.f32 %v5449_v11, %v2587_v34 }
 0x209   : > { %v3866_v20 = vpop.f32.mrb[129].mxu0  ;;  %v2934_v41 = vadd.f32 %v2933_v30, %v2903_v39  ;;  %v3447_v7 = vpack.c.bf16 %v4132_v54, %v4124_v62  ;;  %v2907_v35 = vmul.f32 %v4132_v54, %v4132_v54 }
 0x20a   : > { %v3868_v63 = vpop.f32.mrb[130].mxu0  ;;  %v3867_v13 = vadd.f32 %v3866_v20, %v3865_v9  ;;  %v3442_v44 = vpack.c.bf16 %v4136_v29, %v4128_v22  ;;  %v2867_v40 = vadd.f32 %v4136_v29, %v2866_v47  ;;  %v2905_v58 = vmul.f32 %v4136_v29, %v4136_v29 }
 0x20b   : > { %v3869_v53 = vpop.f32.mrb[131].mxu0  ;;  %v2935_v49 = vadd.f32 %v2934_v41, %v2904_v43  ;;  %3496 = vst [vmem:[%s5469_s14 + $0x38] sm:$0xff] %v3447_v7  }
 0x20c   : > { %v3870_v14 = vadd.f32 %v3869_v53, %v3868_v63  ;;  %v5510_v28 = vadd.f32 %v5341_v27, %v3867_v13  ;;  %3495 = vst [vmem:[%s5469_s14 + $0x30] sm:$0xff] %v3442_v44   ;;  %v2868_v4 = vadd.f32 %v4124_v62, %v2867_v40  ;;  %v4043_v57 = vpop.f32.mrb[0].mxu1 }
 0x20d   : > { %v2936_v1 = vadd.f32 %v2935_v49, %v2905_v58  ;;  %v4139_v11 = vadd.f32 %v5474_v17, %v4043_v57  ;;  %v2600_v24 = vpop.f32.mrb[1].mxu1 }
 0x20e   : > { %v5515_v16 = vadd.f32 %v5349_v23, %v3870_v14  ;;  %v4142_v52 = vadd.f32 %v5458_v38, %v2600_v24  ;;  %v2869_v59 = vadd.f32 %v4132_v54, %v2868_v4  ;;  %v4044_v56 = vpop.f32.mrb[2].mxu1 }
 0x20f   : > { %v2937_v31 = vadd.f32 %v2936_v1, %v2906_v36  ;;  %v4145_v27 = vadd.f32 %v5478_v21, %v4044_v56  ;;  %v2603_v48 = vpop.f32.mrb[3].mxu1  ;;  %v2910_v39 = vmul.f32 %v4139_v11, %v4139_v11 }
 0x210   : > { %v3871_v55 = vpop.f32.mrb[132].mxu0  ;;  %v2870_v18 = vadd.f32 %v4142_v52, %v2869_v59  ;;  %v2908_v25 = vmul.f32 %v4142_v52, %v4142_v52  ;;  %v4148_v45 = vadd.f32 %v5461_v26, %v2603_v48 }
 0x211   : > { %v3872_v0 = vpop.f32.mrb[133].mxu0  ;;  %v2938_v17 = vadd.f32 %v2937_v31, %v2907_v35  ;;  %v3457_v50 = vpack.c.bf16 %v4145_v27, %v4139_v11  ;;  %v2911_v54 = vmul.f32 %v4145_v27, %v4145_v27 }
 0x212   : > { %v3874_v23 = vpop.f32.mrb[134].mxu0  ;;  %v3873_v5 = vadd.f32 %v3872_v0, %v3871_v55  ;;  %v3452_v38 = vpack.c.bf16 %v4148_v45, %v4142_v52  ;;  %v2871_v8 = vadd.f32 %v4148_v45, %v2870_v18  ;;  %v2909_v62 = vmul.f32 %v4148_v45, %v4148_v45 }
 0x213   : > { %v3875_v15 = vpop.f32.mrb[135].mxu0  ;;  %v2939_v42 = vadd.f32 %v2938_v17, %v2908_v25  ;;  %3498 = vst [vmem:[%s5469_s14 + $0x48] sm:$0xff] %v3457_v50  }
 0x214   : > { %v3876_v32 = vadd.f32 %v3875_v15, %v3874_v23  ;;  %v4162_v21 = vadd.f32 %v5363_v46, %v3873_v5  ;;  %3497 = vst [vmem:[%s5469_s14 + $0x40] sm:$0xff] %v3452_v38   ;;  %v2872_v30 = vadd.f32 %v4139_v11, %v2871_v8  ;;  %v4047_v61 = vpop.f32.mrb[4].mxu1 }
 0x215   : > { %v2940_v22 = vadd.f32 %v2939_v42, %v2909_v62  ;;  %v4151_v12 = vadd.f32 %v5498_v33, %v4047_v61  ;;  %v2616_v26 = vpop.f32.mrb[5].mxu1 }
 0x216   : > { %v4168_v9 = vadd.f32 %v5371_v6, %v3876_v32  ;;  %v4154_v20 = vadd.f32 %v5486_v51, %v2616_v26  ;;  %v2873_v47 = vadd.f32 %v4145_v27, %v2872_v30  ;;  %v4048_v43 = vpop.f32.mrb[6].mxu1 }
 0x217   : > { %v2941_v34 = vadd.f32 %v2940_v22, %v2910_v39  ;;  %v4157_v46 = vadd.f32 %v5503_v3, %v4048_v43  ;;  %v2619_v29 = vpop.f32.mrb[7].mxu1  ;;  %v2914_v1 = vmul.f32 %v4151_v12, %v4151_v12 }
 0x218   : > { %v3877_v41 = vpop.f32.mrb[136].mxu0  ;;  %v2874_v7 = vadd.f32 %v4154_v20, %v2873_v47  ;;  %v2912_v13 = vmul.f32 %v4154_v20, %v4154_v20  ;;  %v4160_v33 = vadd.f32 %v5491_v2, %v2619_v29 }
 0x219   : > { %v3878_v63 = vpop.f32.mrb[137].mxu0  ;;  %v2942_v53 = vadd.f32 %v2941_v34, %v2911_v54  ;;  %v3467_v6 = vpack.c.bf16 %v4157_v46, %v4151_v12  ;;  %v2915_v52 = vmul.f32 %v4157_v46, %v4157_v46 }
 0x21a   : > { %v3880_v49 = vpop.f32.mrb[138].mxu0  ;;  %v3879_v44 = vadd.f32 %v3878_v63, %v3877_v41  ;;  %v3462_v51 = vpack.c.bf16 %v4160_v33, %v4154_v20  ;;  %v2875_v14 = vadd.f32 %v4160_v33, %v2874_v7  ;;  %v2913_v36 = vmul.f32 %v4160_v33, %v4160_v33 }
 0x21b   : > { %v3881_v40 = vpop.f32.mrb[139].mxu0  ;;  %v2943_v58 = vadd.f32 %v2942_v53, %v2912_v13  ;;  %3500 = vst [vmem:[%s5469_s14 + $0x58] sm:$0xff] %v3467_v6  }
 0x21c   : > { %v3882_v4 = vadd.f32 %v3881_v40, %v3880_v49  ;;  %v4177_v3 = vadd.f32 %v5385_v60, %v3879_v44  ;;  %3499 = vst [vmem:[%s5469_s14 + $0x50] sm:$0xff] %v3462_v51   ;;  %v2876_v57 = vadd.f32 %v4151_v12, %v2875_v14  ;;  %v4051_v24 = vpop.f32.mrb[8].mxu1 }
 0x21d   : > { %v2944_v11 = vadd.f32 %v2943_v58, %v2913_v36  ;;  %v4163_v35 = vadd.f32 %v4162_v21, %v4051_v24  ;;  %v2632_v31 = vpop.f32.mrb[9].mxu1 }
 0x21e   : > { %v4183_v2 = vadd.f32 %v5393_v19, %v3882_v4  ;;  %v4166_v56 = vadd.f32 %v5510_v28, %v2632_v31  ;;  %v2877_v55 = vadd.f32 %v4157_v46, %v2876_v57  ;;  %v4052_v27 = vpop.f32.mrb[10].mxu1 }
 0x21f   : > { %v2945_v59 = vadd.f32 %v2944_v11, %v2914_v1  ;;  %v4169_v0 = vadd.f32 %v4168_v9, %v4052_v27  ;;  %v2635_v18 = vpop.f32.mrb[11].mxu1  ;;  %v2918_v21 = vmul.f32 %v4163_v35, %v4163_v35 }
 0x220   : > { %v3883_v48 = vpop.f32.mrb[140].mxu0  ;;  %v2878_v25 = vadd.f32 %v4166_v56, %v2877_v55  ;;  %v2916_v17 = vmul.f32 %v4166_v56, %v4166_v56  ;;  %v4172_v23 = vadd.f32 %v5515_v16, %v2635_v18 }
 0x221   : > { %v3884_v60 = vpop.f32.mrb[141].mxu0  ;;  %v2946_v45 = vadd.f32 %v2945_v59, %v2915_v52  ;;  %v3477_v5 = vpack.c.bf16 %v4169_v0, %v4163_v35  ;;  %v2919_v26 = vmul.f32 %v4169_v0, %v4169_v0 }
 0x222   : > { %v3886_v50 = vpop.f32.mrb[142].mxu0  ;;  %v3885_v19 = vadd.f32 %v3884_v60, %v3883_v48  ;;  %v3472_v38 = vpack.c.bf16 %v4172_v23, %v4166_v56  ;;  %v2879_v28 = vadd.f32 %v4172_v23, %v2878_v25  ;;  %v2917_v8 = vmul.f32 %v4172_v23, %v4172_v23 }
 0x223   : > { %v3887_v15 = vpop.f32.mrb[143].mxu0  ;;  %v2947_v42 = vadd.f32 %v2946_v45, %v2916_v17  ;;  %3502 = vst [vmem:[%s5469_s14 + $0x68] sm:$0xff] %v3477_v5  }
 0x224   : > { %v4174_v62 = vadd.f32 %v5406_v10, %v3885_v19  ;;  %v3888_v32 = vadd.f32 %v3887_v15, %v3886_v50  ;;  %3501 = vst [vmem:[%s5469_s14 + $0x60] sm:$0xff] %v3472_v38   ;;  %v2880_v39 = vadd.f32 %v4163_v35, %v2879_v28  ;;  %v4055_v22 = vpop.f32.mrb[12].mxu1 }
 0x225   : > { %v2948_v30 = vadd.f32 %v2947_v42, %v2917_v8  ;;  %v2648_v12 = vpop.f32.mrb[13].mxu1 }
 0x226   : > { %v4175_v61 = vadd.f32 %v4174_v62, %v4055_v22  ;;  %v4180_v16 = vadd.f32 %v5409_v37, %v3888_v32  ;;  %v4178_v54 = vadd.f32 %v4177_v3, %v2648_v12  ;;  %v2881_v34 = vadd.f32 %v4169_v0, %v2880_v39  ;;  %v4056_v20 = vpop.f32.mrb[14].mxu1 }
 0x227   : > { %v2949_v9 = vadd.f32 %v2948_v30, %v2918_v21  ;;  %v2651_v43 = vpop.f32.mrb[15].mxu1 }
 0x228   : > { %v4181_v47 = vadd.f32 %v4180_v16, %v4056_v20  ;;  %v2882_v10 = vadd.f32 %v4178_v54, %v2881_v34  ;;  %v2920_v41 = vmul.f32 %v4178_v54, %v4178_v54  ;;  %v4184_v29 = vadd.f32 %v4183_v2, %v2651_v43 }
 0x229   : > { %v2950_v46 = vadd.f32 %v2949_v9, %v2919_v26  ;;  %v2922_v63 = vmul.f32 %v4175_v61, %v4175_v61 }
 0x22a   : > { %v3487_v7 = vpack.c.bf16 %v4181_v47, %v4175_v61  ;;  %v3482_v53 = vpack.c.bf16 %v4184_v29, %v4178_v54  ;;  %v2883_v33 = vadd.f32 %v4184_v29, %v2882_v10  ;;  %v2921_v49 = vmul.f32 %v4184_v29, %v4184_v29 }
 0x22b   : > { %v2951_v13 = vadd.f32 %v2950_v46, %v2920_v41  ;;  %v2923_v37 = vmul.f32 %v4181_v47, %v4181_v47 }
 0x22c   : > { %3504 = vst [vmem:[%s5469_s14 + $0x78] sm:$0xff] %v3487_v7   ;;  %3503 = vst [vmem:[%s5469_s14 + $0x70] sm:$0xff] %v3482_v53   ;;  %v2884_v6 = vadd.f32 %v4175_v61, %v2883_v33 }
 0x22d   : > { %v2952_v44 = vadd.f32 %v2951_v13, %v2921_v49 }
 0x22e   : > { %v2885_v40 = vadd.f32 %v4181_v47, %v2884_v6 }
 0x22f   : > { %v2953_v58 = vadd.f32 %v2952_v44, %v2922_v63 }
 0x230   : > { %v2886_v51 = vrot.slane %v2885_v40, 4 }
 0x231   : > { %v2954_v14 = vadd.f32 %v2953_v58, %v2923_v37 }
 0x232   : > { %v2887_v36 = vadd.f32 %v2886_v51, %v2885_v40 }
 0x233   : > { %v2955_v4 = vrot.slane %v2954_v14, 4 }
 0x234   : > { %v2888_v3 = vrot.slane %v2887_v36, 2 }
 0x235   : > { %v2956_v1 = vadd.f32 %v2955_v4, %v2954_v14 }
 0x236   : > { %v2889_v57 = vadd.f32 %v2888_v3, %v2887_v36 }
 0x237   : > { %v2957_v11 = vrot.slane %v2956_v1, 2 }
 0x238   : > { %v2890_v24 = vrot.slane %v2889_v57, 1 }
 0x239   : > { %v2958_v35 = vadd.f32 %v2957_v11, %v2956_v1 }
 0x23a   : > { %v2891_v2 = vadd.f32 %v2890_v24, %v2889_v57 }
 0x23b   : > { %v2959_v31 = vrot.slane %v2958_v35, 1 }
 0x23d   : > { %v2960_v52 = vadd.f32 %v2959_v31, %v2958_v35 }
 0x23f   : > { %v2962_v59 = vsel %vm736_vm0, %v2891_v2, %v2960_v52 }
 0x240   : > { %v2964_v56 = vsel %vm2963_vm5, %v2962_v59, 0.0 }
 0x241   : > { %2965 = vst [vmem:[%s407_s17] sm:$0xff] %v2964_v56 }
 0x242 PF: > { %s16_s20 = sadd.s32 1, %s4367_s20   ;;  %s5571_s18 = smov %s4363_s19 }
 0x243   : > { %p13_p5 = scmp.ge.s32.totalorder %s16_s20, 4   ;;  %s5572_s19 = smov %s5574_s21 }
 0x245   :  { %15 = sbr.rel (!%p13_p5) target bundleno = 2 (0x2), region = 86 }

// kernel: resnet_block_forward.4
= control target key start
LH: loop header
LB: loop body
LE: loop exit
PB: predicated region body
PF: predicated region fallthrough
CT: control target
= control target key end

     0   :  { %s4317_s24 = smov 0   ;;  %s4319_s25 = smov 0   ;;  %s5570_s0 = inlined_call_operand.vmem [shape: bf16[2,16,16,128], index: 0, kind: input, shape index: {}, may-alias: {0,1,2}]   ;;  %s5571_s1 = inlined_call_operand.vmem [shape: bf16[2,16,16,128], index: 1, kind: input, shape index: {}, may-alias: {0,1,2}]   ;;  %s5572_s2 = inlined_call_operand.vmem [shape: bf16[2,16,16,128], index: 2, kind: input, shape index: {}, may-alias: {0,1,2}]   ;;  %s5573_s3 = inlined_call_operand.vmem [shape: bf16[3,384,128], index: 3, kind: input, shape index: {}]   ;;  %s5574_s4 = inlined_call_operand.vmem [shape: f32[1,128], index: 4, kind: input, shape index: {}]   ;;  %s5575_s5 = inlined_call_operand.vmem [shape: f32[1,128], index: 5, kind: input, shape index: {}]   ;;  %s5576_s6 = inlined_call_operand.vmem [shape: f32[2,16,16,128], index: 6, kind: output, shape index: {0}]   ;;  %s5577_s7 = inlined_call_operand.vmem [shape: f32[16,128], index: 7, kind: output, shape index: {1}]  }
   0x1   :  { %s4321_s26 = smov 0  }
   0x2 LB: > { %s30_s27 = sadd.s32 1, %s4271_s25  ;;  %p3152_p0 = scmp.ge.s32.totalorder %s4275_s26, 1  ;;  %s4275_s26 = sphi %s4321_s26, %s18_s26   ;;  %s4271_s25 = sphi %s4319_s25, %s5592_s25   ;;  %s4267_s24 = sphi %s4317_s24, %s5591_s24  }
   0x3   : > { %p32_p1 = scmp.ge.s32.totalorder %s30_s27, 2  ;;  %p328_p2 = scmp.lt.s32.totalorder %s4275_s26, 3 }
   0x5   : > { %s5594_s27 = smov (%p32_p1, %s30_s27), 0  ;;  %p329_p3 = pnand %p3152_p0, %p328_p2 }
   0x7   : > { %332 = sbr.rel (%p329_p3) target bundleno = 596 (0x254), region = 44 }
   0xe   : > { %v4179_v0 = vld [vmem:[%s5573_s3 + $0x100] sm:$0xff]   ;;  %v4182_v3 = vld [vmem:[%s5573_s3 + $0x108] sm:$0xff]   ;;  %v4185_v6 = vld [vmem:[%s5573_s3 + $0x110] sm:$0xff]   ;;  %p402_p4 = scmp.lt.s32.totalorder %s4267_s24, 1  ;;  %vm874_vm0 = vcmask 1040384   ;;  %vm1184_vm2 = vcmask 1046528  }
   0xf   : > { %v4343_v1 = vld [vmem:[%s5573_s3 + $0x140] sm:$0xff]   ;;  %3427 = vmatprep.subr.bf16.mxu0 %v4179_v0  ;;  %v4356_v4 = vld [vmem:[%s5573_s3 + $0x148] sm:$0xff]   ;;  %v4368_v7 = vld [vmem:[%s5573_s3 + $0x150] sm:$0xff]   ;;  %vm875_vm1 = vsmask.f32 256  ;;  %vm2973_vm5 = vcmask 1041408  }
  0x10   : > { %v4181_v2 = vld [vmem:[%s5573_s3 + $0xc0] sm:$0xff]   ;;  %3979 = vmatprep.subr.bf16.mxu1 %v4343_v1  ;;  %v4184_v5 = vld [vmem:[%s5573_s3 + $0xc8] sm:$0xff]   ;;  %v4187_v8 = vld [vmem:[%s5573_s3 + $0xd0] sm:$0xff]   ;;  %s5596_s24 = smov (!%p402_p4, %s4267_s24), 1  ;;  %vm913_vm3 = vsmask.f32 7424 }
  0x11   : > { %3428 = vmatpush3.bf16.msra.mxu0 %v4181_v2  ;;  %3987 = vmatpush3.bf16.msra.mxu1 %v4343_v1  ;;  %v4188_v9 = vld [vmem:[%s5573_s3 + $0x118] sm:$0xff]   ;;  %v4191_v12 = vld [vmem:[%s5573_s3 + $0x120] sm:$0xff]   ;;  %v4194_v15 = vld [vmem:[%s5573_s3 + $0x128] sm:$0xff]   ;;  %s4414_s20 = sshll.u32 %s5596_s24, 7  ;;  %s3338_s28 = sshll.u32 %s5596_s24, 8 }
  0x12   : > { %3429 = vmatprep.subr.bf16.mxu0 %v4182_v3  ;;  %3980 = vmatprep.subr.bf16.mxu1 %v4356_v4  ;;  %v4381_v10 = vld [vmem:[%s5573_s3 + $0x158] sm:$0xff]   ;;  %v4395_v13 = vld [vmem:[%s5573_s3 + $0x160] sm:$0xff]   ;;  %v4411_v16 = vld [vmem:[%s5573_s3 + $0x168] sm:$0xff]   ;;  %s4433_s10 = scalar_lea.vmem %s5570_s0, %s4414_s20  ;;  %s424_s30 = scalar_lea.vmem %s5571_s1, %s4414_s20 }
  0x13   : > { %v4190_v11 = vld [vmem:[%s5573_s3 + $0xd8] sm:$0xff]   ;;  %v4193_v14 = vld [vmem:[%s5573_s3 + $0xe0] sm:$0xff]   ;;  %v4196_v17 = vld [vmem:[%s5573_s3 + $0xe8] sm:$0xff]   ;;  %s3337_s16 = sadd.s32 120, %s4414_s20  ;;  %s5461_s8 = scalar_lea.vmem %s5576_s6, %s3338_s28 }
  0x14   : > { %v4197_v18 = vld [vmem:[%s5573_s3 + $0x130] sm:$0xff]   ;;  %v4200_v21 = vld [vmem:[%s5573_s3 + $0x138] sm:$0xff]   ;;  %v3340_v22 = vld [vmem:[%s4433_s10] sm:$0xff]   ;;  %s441_s19 = scalar_lea.vmem %s5572_s2, %s3337_s16  ;;  %s3161_s9 = sshll.u32 %s5596_s24, 3 }
  0x15   : > { %3430 = vmatpush3.bf16.msra.mxu0 %v4184_v5  ;;  %3988 = vmatpush3.bf16.msra.mxu1 %v4356_v4  ;;  %v4427_v19 = vld [vmem:[%s5573_s3 + $0x170] sm:$0xff]   ;;  %v4446_v23 = vld [vmem:[%s5574_s4] ss:$0 sm:$0xff]  ;;  %v4452_v24 = vld [vmem:[%s5573_s3 + $0x178] sm:$0xff]   ;;  %v3341_v25 = vunpack.c.l.bf16 %v3340_v22  ;;  %v3342_v26 = vunpack.c.h.bf16 %v3340_v22  ;;  %s461_s12 = scalar_lea.vmem %s5577_s7, %s3161_s9 }
  0x16   : > { %3431 = vmatprep.subr.bf16.mxu0 %v4185_v6  ;;  %3981 = vmatprep.subr.bf16.mxu1 %v4368_v7  ;;  %v4199_v20 = vld [vmem:[%s5573_s3 + $0xf0] sm:$0xff]   ;;  %v3419_v27 = vld [vmem:[%s4433_s10 + $0x40] sm:$0xff]   ;;  %v3420_v28 = vld [vmem:[%s4433_s10 + $0x48] sm:$0xff]  }
  0x17   : > { %v4459_v29 = vld [vmem:[%s5575_s5] ss:$0 sm:$0xff]  ;;  %v3373_v30 = vunpack.c.l.bf16 %v3419_v27  ;;  %v3374_v31 = vunpack.c.h.bf16 %v3419_v27  ;;  %v3377_v32 = vunpack.c.l.bf16 %v3420_v28  ;;  %v3378_v33 = vunpack.c.h.bf16 %v3420_v28  ;;  %v4202_v36 = vld [vmem:[%s5573_s3 + $0xf8] sm:$0xff]   ;;  %v3412_v47 = vld [vmem:[%s4433_s10 + $0x8] sm:$0xff]  }
  0x18   : > { %v535_v34 = vmul.f32 %v3341_v25, %v4446_v23  ;;  %v536_v35 = vmul.f32 %v3342_v26, %v4446_v23  ;;  %v4203_v43 = vld [vmem:[%s5573_s3 + $0x40] sm:$0xff]   ;;  %v3421_v48 = vld [vmem:[%s4433_s10 + $0x50] sm:$0xff]   ;;  %v3345_v52 = vunpack.c.l.bf16 %v3412_v47  ;;  %v4484_v53 = vld [vmem:[%s4433_s10 + $0x58] sm:$0xff]   ;;  %v3346_v57 = vunpack.c.h.bf16 %v3412_v47 }
  0x19   : > { %3432 = vmatpush3.bf16.msra.mxu0 %v4187_v8  ;;  %3989 = vmatpush3.bf16.msra.mxu1 %v4368_v7  ;;  %v551_v37 = vmul.f32 %v3373_v30, %v4446_v23  ;;  %v552_v38 = vmul.f32 %v3374_v31, %v4446_v23  ;;  %v553_v39 = vmul.f32 %v3377_v32, %v4446_v23  ;;  %v3381_v61 = vunpack.c.l.bf16 %v3421_v48  ;;  %vm4496_vm4 = vmand %vm874_vm0, %vm875_vm1 }
  0x1a   : > { %3433 = vmatprep.subr.bf16.mxu0 %v4188_v9  ;;  %3982 = vmatprep.subr.bf16.mxu1 %v4381_v10  ;;  %v574_v40 = vadd.f32 %v4459_v29, %v535_v34  ;;  %v575_v41 = vadd.f32 %v4459_v29, %v536_v35  ;;  %v554_v42 = vmul.f32 %v3378_v33, %v4446_v23  ;;  %v3382_v0 = vunpack.c.h.bf16 %v3421_v48  ;;  %v4204_v48 = vld [vmem:[%s5573_s3] sm:$0xff]  }
  0x1b   : > { %v590_v44 = vadd.f32 %v4459_v29, %v551_v37  ;;  %v591_v45 = vadd.f32 %v4459_v29, %v552_v38  ;;  %v592_v46 = vadd.f32 %v4459_v29, %v553_v39  ;;  %v537_v60 = vmul.f32 %v3345_v52, %v4446_v23 }
  0x1c   : > { %v606_v49 = vmax.f32 %v574_v40, 0.0  ;;  %v607_v50 = vmax.f32 %v575_v41, 0.0  ;;  %v593_v51 = vadd.f32 %v4459_v29, %v554_v42  ;;  %v538_v63 = vmul.f32 %v3346_v57, %v4446_v23 }
  0x1d   : > { %3434 = vmatpush3.bf16.msra.mxu0 %v4190_v11  ;;  %3990 = vmatpush3.bf16.msra.mxu1 %v4381_v10  ;;  %v622_v54 = vmax.f32 %v590_v44, 0.0  ;;  %v623_v55 = vmax.f32 %v591_v45, 0.0  ;;  %v624_v56 = vmax.f32 %v592_v46, 0.0  ;;  %v3385_v2 = vunpack.c.l.bf16 %v4484_v53 }
  0x1e   : > { %3435 = vmatprep.subr.bf16.mxu0 %v4191_v12  ;;  %3983 = vmatprep.subr.bf16.mxu1 %v4395_v13  ;;  %v638_v58 = vpack.c.bf16 %v607_v50, %v606_v49  ;;  %v625_v59 = vmax.f32 %v593_v51, 0.0  ;;  %v576_v8 = vadd.f32 %v4459_v29, %v537_v60  ;;  %v577_v12 = vadd.f32 %v4459_v29, %v538_v63  ;;  %v4205_v49 = vld [vmem:[%s5573_s3 + $0x48] sm:$0xff]  }
  0x1f   : > { %v646_v62 = vpack.c.bf16 %v623_v55, %v622_v54  ;;  %v556_v26 = vmul.f32 %v3382_v0, %v4446_v23  ;;  %v3386_v32 = vunpack.c.h.bf16 %v4484_v53  ;;  %v3413_v55 = vld [vmem:[%s4433_s10 + $0x10] sm:$0xff]  }
  0x20   : > { %v720_v3 = vshrl.u32 %v638_v58, 16  ;;  %v723_v5 = vshll.u32 %v638_v58, 16  ;;  %v647_v6 = vpack.c.bf16 %v625_v59, %v624_v56  ;;  %v609_v25 = vmax.f32 %v577_v12, 0.0  ;;  %v4207_v12 = vld [vmem:[%s5573_s3 + $0x50] sm:$0xff]  }
  0x21   : > { %3436 = vmatpush3.bf16.msra.mxu0 %v4193_v14  ;;  %3991 = vmatpush3.bf16.msra.mxu1 %v4395_v13  ;;  %v776_v9 = vshrl.u32 %v646_v62, 16  ;;  %v779_v11 = vshll.u32 %v646_v62, 16  ;;  %v555_v14 = vmul.f32 %v3381_v61, %v4446_v23  ;;  %v595_v54 = vadd.f32 %v4459_v29, %v556_v26 }
  0x22   : > { %3437 = vmatprep.subr.bf16.mxu0 %v4194_v15  ;;  %3984 = vmatprep.subr.bf16.mxu1 %v4411_v16  ;;  %v722_v15 = vrot.slane %v720_v3, 7  ;;  %v557_v59 = vmul.f32 %v3385_v2, %v4446_v23  ;;  %v558_v63 = vmul.f32 %v3386_v32, %v4446_v23 }
  0x23   : > { %v778_v22 = vrot.slane %v776_v9, 7  ;;  %v594_v27 = vadd.f32 %v4459_v29, %v555_v14  ;;  %v627_v62 = vmax.f32 %v595_v54, 0.0 }
  0x24   : > { %v725_v28 = vor.u32 %v723_v5, %v722_v15  ;;  %v4504_v30 = vsel %vm4496_vm4, %v722_v15, 0  ;;  %v596_v2 = vadd.f32 %v4459_v29, %v557_v59  ;;  %v3349_v5 = vunpack.c.l.bf16 %v3413_v55 }
  0x25   : > { %3438 = vmatpush3.bf16.msra.mxu0 %v4196_v17  ;;  %3992 = vmatpush3.bf16.msra.mxu1 %v4411_v16  ;;  %v783_v17 = vshrl.u32 %v647_v6, 16  ;;  %v934_v33 = vshll.u32 %v4504_v30, 16  ;;  %v781_v34 = vor.u32 %v779_v11, %v778_v22  ;;  %v4510_v35 = vsel %vm4496_vm4, %v778_v22, 0  ;;  %v4575_v22 = vld [vmem:[%s4433_s10 + $0x68] sm:$0xff]  }
  0x26   : > { %3439 = vmatprep.subr.bf16.mxu0 %v4197_v18  ;;  %3985 = vmatprep.subr.bf16.mxu1 %v4427_v19  ;;  %v786_v18 = vshll.u32 %v647_v6, 16  ;;  %v4514_v37 = vsel %vm4496_vm4, 0, %v725_v28  ;;  %v1213_v38 = vrot.slane %v4510_v35, 1  ;;  %v626_v58 = vmax.f32 %v594_v27, 0.0 }
  0x27   : > { %v785_v31 = vrot.slane %v783_v17, 7  ;;  %v927_v41 = vshrl.u32 %v4514_v37, 16  ;;  %v929_v42 = vshll.u32 %v4514_v37, 16  ;;  %v4525_v44 = vsel %vm4496_vm4, 0, %v781_v34 }
  0x28   : > { %v1212_v45 = vrot.slane %v4525_v44, 1  ;;  %v648_v11 = vpack.c.bf16 %v627_v62, %v626_v58  ;;  %v597_v15 = vadd.f32 %v4459_v29, %v558_v63  ;;  %v628_v17 = vmax.f32 %v596_v2, 0.0  ;;  %v4210_v62 = vld [vmem:[%s5573_s3 + $0x18] sm:$0xff]  }
  0x29   : > { %3440 = vmatpush3.bf16.msra.mxu0 %v4199_v20  ;;  %3993 = vmatpush3.bf16.msra.mxu1 %v4427_v19  ;;  %v608_v20 = vmax.f32 %v576_v8, 0.0  ;;  %v788_v39 = vor.u32 %v786_v18, %v785_v31  ;;  %v4519_v40 = vsel %vm4496_vm4, %v785_v31, 0  ;;  %v931_v51 = vrot.slane %v929_v42, 1  ;;  %v4206_v8 = vld [vmem:[%s5573_s3 + $0x8] sm:$0xff]  }
  0x2a   : > { %3441 = vmatprep.subr.bf16.mxu0 %v4200_v21  ;;  %3986 = vmatprep.subr.bf16.mxu1 %v4452_v24  ;;  %v1216_v47 = vrot.slane %v4519_v40, 1  ;;  %v4543_v56 = vsel %vm1184_vm2, %v1212_v45, %v1213_v38  ;;  %v3350_v18 = vunpack.c.h.bf16 %v3413_v55  ;;  %v790_v28 = vshrl.u32 %v648_v11, 16 }
  0x2b   : > { %v4530_v46 = vsel %vm4496_vm4, 0, %v788_v39  ;;  %v932_v60 = vor.u32 %v931_v51, %v927_v41  ;;  %3867 = vmatprep.mubr.bf16.mxu1 %v4543_v56  ;;  %v793_v31 = vshll.u32 %v648_v11, 16  ;;  %v629_v32 = vmax.f32 %v597_v15, 0.0  ;;  %v4208_v39 = vld [vmem:[%s5573_s3 + $0x10] sm:$0xff]  }
  0x2c   : > { %v1215_v52 = vrot.slane %v4530_v46, 1  ;;  %v540_v34 = vmul.f32 %v3350_v18, %v4446_v23  ;;  %v792_v38 = vrot.slane %v790_v28, 7 }
  0x2d   : > { %3442 = vmatpush3.bf16.msra.mxu0 %v4202_v36  ;;  %3994 = vmatpush3.bf16.msra.mxu1 %v4452_v24  ;;  %v639_v36 = vpack.c.bf16 %v609_v25, %v608_v20  ;;  %v3423_v20 = vld [vmem:[%s4433_s10 + $0x60] sm:$0xff]  }
  0x2e   : > { %3835 = vmatprep.subr.bf16.mxu0 %v4343_v1  ;;  %3563 = vmatprep.subr.bf16.mxu1 %v4203_v43  ;;  %v936_v43 = vrot.slane %v934_v33, 1  ;;  %v4548_v61 = vsel %vm1184_vm2, %v1215_v52, %v1216_v47  ;;  %v539_v33 = vmul.f32 %v3349_v5, %v4446_v23  ;;  %v3389_v41 = vunpack.c.l.bf16 %v3423_v20 }
  0x2f   : > { %v727_v50 = vshrl.u32 %v639_v36, 16  ;;  %v730_v53 = vshll.u32 %v639_v36, 16  ;;  %v3390_v42 = vunpack.c.h.bf16 %v3423_v20  ;;  %v579_v47 = vadd.f32 %v4459_v29, %v540_v34  ;;  %v4627_v20 = vld [vmem:[%s4433_s10 + $0x70] sm:$0xff]  }
  0x30   : > { %3868 = vmatmul.mubr.bf16.vlgmr.msra.gmra.mrb[0].mxu1 %v4548_v61  ;;  %v4558_v6 = vsel %vm913_vm3, %v932_v60, %v936_v43  ;;  %v649_v43 = vpack.c.bf16 %v629_v32, %v628_v17  ;;  %v578_v45 = vadd.f32 %v4459_v29, %v539_v33  ;;  %v4595_v51 = vsel %vm4496_vm4, %v792_v38, 0  ;;  %v4212_v17 = vld [vmem:[%s5573_s3 + $0x20] sm:$0xff]  }
  0x31   : > { %v729_v57 = vrot.slane %v727_v50, 7  ;;  %3564 = vmatpush3.bf16.msra.mxu1 %v4204_v48  ;;  %1530 = vmatprep.mubr.bf16.mxu0 %v4558_v6  ;;  %v3393_v48 = vunpack.c.l.bf16 %v4575_v22  ;;  %v795_v50 = vor.u32 %v793_v31, %v792_v38  ;;  %v559_v52 = vmul.f32 %v3389_v41, %v4446_v23 }
  0x32   : > { %3565 = vmatprep.subr.bf16.mxu1 %v4205_v49  ;;  %1531 = vmatmul.mubr.bf16.vlgmr.msra.gmra.mrb[0].mxu0 %v4514_v37  ;;  %v1219_v54 = vrot.slane %v4595_v51, 1  ;;  %v797_v55 = vshrl.u32 %v649_v43, 16  ;;  %v610_v58 = vmax.f32 %v578_v45, 0.0  ;;  %v611_v63 = vmax.f32 %v579_v47, 0.0 }
  0x33   : > { %v732_v0 = vor.u32 %v730_v53, %v729_v57  ;;  %v4554_v3 = vsel %vm4496_vm4, %v729_v57, 0  ;;  %3836 = vmatpush3.bf16.msra.mxu0 %v4343_v1  ;;  %v4209_v1 = vld [vmem:[%s5573_s3 + $0x58] sm:$0xff]   ;;  %v800_v57 = vshll.u32 %v649_v43, 16  ;;  %v4606_v60 = vsel %vm4496_vm4, 0, %v795_v50 }
  0x34   : > { %v946_v9 = vshll.u32 %v4554_v3, 16  ;;  %3837 = vmatprep.subr.bf16.mxu0 %v4356_v4  ;;  %v3414_v53 = vld [vmem:[%s4433_s10 + $0x18] sm:$0xff]   ;;  %v1218_v2 = vrot.slane %v4606_v60, 1  ;;  %v799_v5 = vrot.slane %v797_v55, 7  ;;  %v640_v11 = vpack.c.bf16 %v611_v63, %v610_v58  ;;  %v4215_v63 = vld [vmem:[%s5573_s3 + $0x70] sm:$0xff]  }
  0x35   : > { %v4570_v14 = vsel %vm4496_vm4, 0, %v732_v0  ;;  %3566 = vmatpush3.bf16.msra.mxu1 %v4206_v8  ;;  %v560_v0 = vmul.f32 %v3390_v42, %v4446_v23  ;;  %v598_v8 = vadd.f32 %v4459_v29, %v559_v52  ;;  %v561_v15 = vmul.f32 %v3393_v48, %v4446_v23  ;;  %v4214_v48 = vld [vmem:[%s5573_s3 + $0x28] sm:$0xff]  }
  0x36   : > { %v939_v25 = vshrl.u32 %v4570_v14, 16  ;;  %v941_v26 = vshll.u32 %v4570_v14, 16  ;;  %v948_v27 = vrot.slane %v946_v9, 1  ;;  %3567 = vmatprep.subr.bf16.mxu1 %v4207_v12  ;;  %v3394_v9 = vunpack.c.h.bf16 %v4575_v22 }
  0x37   : > { %3838 = vmatpush3.bf16.msra.mxu0 %v4356_v4  ;;  %v4211_v4 = vld [vmem:[%s5573_s3 + $0x60] sm:$0xff]   ;;  %v599_v12 = vadd.f32 %v4459_v29, %v560_v0  ;;  %v3353_v18 = vunpack.c.l.bf16 %v3414_v53  ;;  %v4634_v22 = vsel %vm4496_vm4, %v799_v5, 0  ;;  %v734_v31 = vshrl.u32 %v640_v11, 16 }
  0x38   : > { %v943_v36 = vrot.slane %v941_v26, 1  ;;  %3839 = vmatprep.subr.bf16.mxu0 %v4368_v7  ;;  %v802_v26 = vor.u32 %v800_v57, %v799_v5  ;;  %v1222_v28 = vrot.slane %v4634_v22, 1  ;;  %v737_v32 = vshll.u32 %v640_v11, 16 }
  0x39   : > { %3568 = vmatpush3.bf16.msra.mxu1 %v4208_v39  ;;  %v631_v33 = vmax.f32 %v599_v12, 0.0  ;;  %v600_v38 = vadd.f32 %v4459_v29, %v561_v15  ;;  %v3354_v39 = vunpack.c.h.bf16 %v3414_v53  ;;  %v736_v42 = vrot.slane %v734_v31, 7 }
  0x3a   : > { %v944_v49 = vor.u32 %v943_v36, %v939_v25  ;;  %3569 = vmatprep.subr.bf16.mxu1 %v4209_v1  ;;  %v4630_v25 = vsel %vm1184_vm2, %v1218_v2, %v1219_v54  ;;  %v4641_v34 = vsel %vm4496_vm4, 0, %v802_v26  ;;  %v562_v36 = vmul.f32 %v3394_v9, %v4446_v23 }
  0x3b   : > { %3840 = vmatpush3.bf16.msra.mxu0 %v4368_v7  ;;  %3871 = vmatprep.mubr.bf16.mxu1 %v4630_v25  ;;  %v4213_v7 = vld [vmem:[%s5573_s3 + $0x68] sm:$0xff]   ;;  %v1221_v41 = vrot.slane %v4641_v34, 1  ;;  %v541_v1 = vmul.f32 %v3353_v18, %v4446_v23  ;;  %v632_v47 = vmax.f32 %v600_v38, 0.0  ;;  %v3397_v50 = vunpack.c.l.bf16 %v4627_v20 }
  0x3c   : > { %v4602_v59 = vsel %vm913_vm3, %v944_v49, %v948_v27  ;;  %v630_v27 = vmax.f32 %v598_v8, 0.0  ;;  %3841 = vmatprep.subr.bf16.mxu0 %v4381_v10  ;;  %v601_v45 = vadd.f32 %v4459_v29, %v562_v36  ;;  %v542_v49 = vmul.f32 %v3354_v39, %v4446_v23  ;;  %v3426_v8 = vld [vmem:[%s4433_s10 + $0x78] sm:$0xff]  }
  0x3d   : > { %1538 = vmatprep.mubr.bf16.mxu0 %v4602_v59  ;;  %3570 = vmatpush3.bf16.msra.mxu1 %v4210_v62  ;;  %v4659_v52 = vsel %vm1184_vm2, %v1221_v41, %v1222_v28  ;;  %v739_v53 = vor.u32 %v737_v32, %v736_v42  ;;  %v4663_v54 = vsel %vm4496_vm4, %v736_v42, 0  ;;  %v3398_v5 = vunpack.c.h.bf16 %v4627_v20  ;;  %v4217_v28 = vld [vmem:[%s5573_s3 + $0x78] sm:$0xff]   ;;  %v3415_v42 = vld [vmem:[%s4433_s10 + $0x20] sm:$0xff]  }
  0x3e   : > { %1539 = vmatmul.mubr.bf16.gmra.mrb[4].mxu0 %v4570_v14  ;;  %3571 = vmatprep.subr.bf16.mxu1 %v4211_v4  ;;  %v650_v43 = vpack.c.bf16 %v631_v33, %v630_v27  ;;  %v958_v57 = vshll.u32 %v4663_v54, 16  ;;  %v633_v62 = vmax.f32 %v601_v45, 0.0  ;;  %v581_v2 = vadd.f32 %v4459_v29, %v542_v49  ;;  %v4218_v41 = vld [vmem:[%s5573_s3 + $0x38] sm:$0xff]  }
  0x3f   : > { %3842 = vmatpush3.bf16.msra.mxu0 %v4381_v10  ;;  %3872 = vmatmul.mubr.bf16.gmra.mrb[4].mxu1 %v4659_v52  ;;  %v580_v10 = vadd.f32 %v4459_v29, %v541_v1  ;;  %v4674_v0 = vsel %vm4496_vm4, 0, %v739_v53  ;;  %v564_v39 = vmul.f32 %v3398_v5, %v4446_v23 }
  0x40   : > { %v804_v55 = vshrl.u32 %v650_v43, 16  ;;  %3843 = vmatprep.subr.bf16.mxu0 %v4395_v13  ;;  %v807_v58 = vshll.u32 %v650_v43, 16  ;;  %v951_v9 = vshrl.u32 %v4674_v0, 16  ;;  %v953_v11 = vshll.u32 %v4674_v0, 16 }
  0x41   : > { %3572 = vmatpush3.bf16.msra.mxu1 %v4212_v17  ;;  %v960_v12 = vrot.slane %v958_v57, 1  ;;  %v651_v15 = vpack.c.bf16 %v633_v62, %v632_v47  ;;  %v4216_v17 = vld [vmem:[%s5573_s3 + $0x30] sm:$0xff]   ;;  %v612_v20 = vmax.f32 %v580_v10, 0.0  ;;  %v613_v27 = vmax.f32 %v581_v2, 0.0  ;;  %v4722_v62 = vld [vmem:[%s5573_s3 + $0x80] sm:$0xff]  }
  0x42   : > { %3573 = vmatprep.subr.bf16.mxu1 %v4213_v7  ;;  %v806_v4 = vrot.slane %v804_v55, 7  ;;  %v955_v31 = vrot.slane %v953_v11, 1  ;;  %v563_v7 = vmul.f32 %v3397_v50, %v4446_v23  ;;  %v3401_v47 = vunpack.c.l.bf16 %v3426_v8 }
  0x43   : > { %3844 = vmatpush3.bf16.msra.mxu0 %v4395_v13  ;;  %v811_v33 = vshrl.u32 %v651_v15, 16  ;;  %v814_v13 = vshll.u32 %v651_v15, 16  ;;  %v641_v38 = vpack.c.bf16 %v613_v27, %v612_v20  ;;  %v603_v50 = vadd.f32 %v4459_v29, %v564_v39 }
  0x44   : > { %v809_v18 = vor.u32 %v807_v58, %v806_v4  ;;  %v4687_v26 = vsel %vm4496_vm4, %v806_v4, 0  ;;  %3845 = vmatprep.subr.bf16.mxu0 %v4411_v16  ;;  %v956_v43 = vor.u32 %v955_v31, %v951_v9  ;;  %v602_v53 = vadd.f32 %v4459_v29, %v563_v7  ;;  %v3404_v7 = vld [vmem:[%s424_s30] sm:$0xff]  }
  0x45   : > { %3574 = vmatpush3.bf16.msra.mxu1 %v4214_v48  ;;  %v1225_v32 = vrot.slane %v4687_v26, 1  ;;  %v813_v45 = vrot.slane %v811_v33, 7  ;;  %v741_v48 = vshrl.u32 %v641_v38, 16  ;;  %v744_v49 = vshll.u32 %v641_v38, 16 }
  0x46   : > { %3575 = vmatprep.subr.bf16.mxu1 %v4215_v63  ;;  %v4696_v36 = vsel %vm4496_vm4, 0, %v809_v18  ;;  %v4710_v55 = vsel %vm913_vm3, %v956_v43, %v960_v12  ;;  %v634_v4 = vmax.f32 %v602_v53, 0.0  ;;  %v635_v2 = vmax.f32 %v603_v50, 0.0 }
  0x47   : > { %v1224_v1 = vrot.slane %v4696_v36, 1  ;;  %3846 = vmatpush3.bf16.msra.mxu0 %v4411_v16  ;;  %v816_v58 = vor.u32 %v814_v13, %v813_v45  ;;  %v4717_v16 = vsel %vm4496_vm4, %v813_v45, 0  ;;  %1546 = vmatprep.mubr.bf16.mxu0 %v4710_v55  ;;  %v743_v63 = vrot.slane %v741_v48, 7 }
  0x48   : > { %3847 = vmatprep.subr.bf16.mxu0 %v4427_v19  ;;  %v1228_v10 = vrot.slane %v4717_v16, 1  ;;  %1547 = vmatmul.mubr.bf16.gmra.mrb[8].mxu0 %v4674_v0  ;;  %v3402_v9 = vunpack.c.h.bf16 %v3426_v8  ;;  %v565_v11 = vmul.f32 %v3401_v47, %v4446_v23  ;;  %v3357_v12 = vunpack.c.l.bf16 %v3415_v42 }
  0x49   : > { %3576 = vmatpush3.bf16.msra.mxu1 %v4216_v17  ;;  %v4713_v57 = vsel %vm1184_vm2, %v1224_v1, %v1225_v32  ;;  %v4730_v5 = vsel %vm4496_vm4, 0, %v816_v58  ;;  %v746_v17 = vor.u32 %v744_v49, %v743_v63  ;;  %v4740_v18 = vsel %vm4496_vm4, %v743_v63, 0  ;;  %v4226_v32 = vld [vmem:[%s5573_s3 + $0x1c0] sm:$0xff]  }
  0x4a   : > { %3577 = vmatprep.subr.bf16.mxu1 %v4217_v28  ;;  %3875 = vmatprep.mubr.bf16.mxu1 %v4713_v57  ;;  %v1227_v15 = vrot.slane %v4730_v5, 1  ;;  %v652_v20 = vpack.c.bf16 %v635_v2, %v634_v4  ;;  %v970_v8 = vshll.u32 %v4740_v18, 16  ;;  %v566_v27 = vmul.f32 %v3402_v9, %v4446_v23 }
  0x4b   : > { %3848 = vmatpush3.bf16.msra.mxu0 %v4427_v19  ;;  %v604_v28 = vadd.f32 %v4459_v29, %v565_v11  ;;  %v3358_v31 = vunpack.c.h.bf16 %v3415_v42  ;;  %v4756_v19 = vsel %vm4496_vm4, 0, %v746_v17  ;;  %v543_v47 = vmul.f32 %v3357_v12, %v4446_v23 }
  0x4c   : > { %3849 = vmatprep.subr.bf16.mxu0 %v4452_v24  ;;  %v4752_v33 = vsel %vm1184_vm2, %v1227_v15, %v1228_v10  ;;  %v818_v13 = vshrl.u32 %v652_v20, 16  ;;  %v821_v38 = vshll.u32 %v652_v20, 16  ;;  %v963_v39 = vshrl.u32 %v4756_v19, 16  ;;  %v3416_v15 = vld [vmem:[%s4433_s10 + $0x28] sm:$0xff]  }
  0x4d   : > { %3578 = vmatpush3.bf16.msra.mxu1 %v4218_v41  ;;  %5585 = vst [vmem:[#allocation2_spill] sm:$0xff] %v4752_v33  ;;  %v965_v41 = vshll.u32 %v4756_v19, 16  ;;  %v972_v42 = vrot.slane %v970_v8, 1  ;;  %v605_v43 = vadd.f32 %v4459_v29, %v566_v27  ;;  %v636_v45 = vmax.f32 %v604_v28, 0.0  ;;  %v3417_v28 = vld [vmem:[%s4433_s10 + $0x30] sm:$0xff]  }
  0x4e   : > { %3883 = vmatprep.subr.bf16.mxu1 %v4722_v62  ;;  %3876 = vmatmul.mubr.bf16.gmra.mrb[8].mxu1 %v4752_v33  ;;  %v820_v1 = vrot.slane %v818_v13, 7  ;;  %v544_v48 = vmul.f32 %v3358_v31, %v4446_v23  ;;  %v3405_v50 = vunpack.c.l.bf16 %v3404_v7  ;;  %v3406_v58 = vunpack.c.h.bf16 %v3404_v7 }
  0x4f   : > { %3850 = vmatpush3.bf16.msra.mxu0 %v4452_v24  ;;  %v967_v49 = vrot.slane %v965_v41, 1  ;;  %v637_v53 = vmax.f32 %v605_v43, 0.0  ;;  %v582_v4 = vadd.f32 %v4459_v29, %v543_v47  ;;  %v3361_v43 = vunpack.c.l.bf16 %v3416_v15 }
  0x50   : > { %3699 = vmatprep.subr.bf16.mxu0 %v4226_v32  ;;  %v823_v10 = vor.u32 %v821_v38, %v820_v1  ;;  %v4767_v63 = vsel %vm4496_vm4, %v820_v1, 0  ;;  %v583_v2 = vadd.f32 %v4459_v29, %v544_v48  ;;  %v658_v24 = vmul.f32 %v3405_v50, %v4446_v23 }
  0x51   : > { %v968_v9 = vor.u32 %v967_v49, %v963_v39  ;;  %v1231_v11 = vrot.slane %v4767_v63, 1  ;;  %v653_v12 = vpack.c.bf16 %v637_v53, %v636_v45  ;;  %v614_v20 = vmax.f32 %v582_v4, 0.0 }
  0x52   : > { %v4776_v17 = vsel %vm4496_vm4, 0, %v823_v10  ;;  %v615_v8 = vmax.f32 %v583_v2, 0.0  ;;  %v659_v27 = vmul.f32 %v3406_v58, %v4446_v23  ;;  %v660_v39 = vadd.f32 %v4459_v29, %v658_v24 }
  0x53   : > { %v4781_v31 = vsel %vm913_vm3, %v968_v9, %v972_v42  ;;  %v1230_v32 = vrot.slane %v4776_v17, 1  ;;  %v825_v13 = vshrl.u32 %v653_v12, 16  ;;  %v828_v38 = vshll.u32 %v653_v12, 16 }
  0x54   : > { %1554 = vmatprep.mubr.bf16.mxu0 %v4781_v31  ;;  %v642_v7 = vpack.c.bf16 %v615_v8, %v614_v20  ;;  %v661_v41 = vadd.f32 %v4459_v29, %v659_v27  ;;  %v3362_v42 = vunpack.c.h.bf16 %v3416_v15  ;;  %v3365_v47 = vunpack.c.l.bf16 %v3417_v28 }
  0x55   : > { %v4788_v1 = vsel %vm1184_vm2, %v1230_v32, %v1231_v11  ;;  %1555 = vmatmul.mubr.bf16.gmra.mrb[12].mxu0 %v4756_v19  ;;  %v827_v45 = vrot.slane %v825_v13, 7  ;;  %v662_v53 = vmax.f32 %v660_v39, 0.0  ;;  %v545_v4 = vmul.f32 %v3361_v43, %v4446_v23 }
  0x56   : > { %5586 = vst [vmem:[#allocation3_spill] sm:$0xff] %v4788_v1  ;;  %3879 = vmatprep.mubr.bf16.mxu1 %v4788_v1  ;;  %v748_v48 = vshrl.u32 %v642_v7, 16  ;;  %v751_v49 = vshll.u32 %v642_v7, 16  ;;  %v663_v50 = vmax.f32 %v661_v41, 0.0  ;;  %v546_v2 = vmul.f32 %v3362_v42, %v4446_v23 }
  0x57   : > { %v830_v58 = vor.u32 %v828_v38, %v827_v45  ;;  %v4794_v10 = vsel %vm4496_vm4, %v827_v45, 0  ;;  %v3366_v24 = vunpack.c.h.bf16 %v3417_v28  ;;  %v584_v20 = vadd.f32 %v4459_v29, %v545_v4  ;;  %v3418_v45 = vld [vmem:[%s4433_s10 + $0x38] sm:$0xff]  }
  0x58   : > { %v1234_v9 = vrot.slane %v4794_v10, 1  ;;  %v750_v11 = vrot.slane %v748_v48, 7  ;;  %v664_v12 = vpack.c.bf16 %v663_v50, %v662_v53  ;;  %v585_v8 = vadd.f32 %v4459_v29, %v546_v2 }
  0x59   : > { %v4801_v15 = vsel %vm4496_vm4, 0, %v830_v58  ;;  %v547_v27 = vmul.f32 %v3365_v47, %v4446_v23  ;;  %v616_v39 = vmax.f32 %v584_v20, 0.0  ;;  %v548_v43 = vmul.f32 %v3366_v24, %v4446_v23 }
  0x5a   : > { %v1233_v32 = vrot.slane %v4801_v15, 1  ;;  %v753_v13 = vor.u32 %v751_v49, %v750_v11  ;;  %v4809_v38 = vsel %vm4496_vm4, %v750_v11, 0  ;;  %v682_v7 = vmul.bf16 0.0, %v664_v12 }
  0x5b   : > { %v982_v28 = vshll.u32 %v4809_v38, 16  ;;  %v617_v41 = vmax.f32 %v585_v8, 0.0  ;;  %v586_v11 = vadd.f32 %v4459_v29, %v547_v27  ;;  %v3369_v12 = vunpack.c.l.bf16 %v3418_v45 }
  0x5c   : > { %v4815_v42 = vsel %vm1184_vm2, %v1233_v32, %v1234_v9  ;;  %v4819_v47 = vsel %vm4496_vm4, 0, %v753_v13  ;;  %v713_v48 = vshrl.u32 %v682_v7, 16  ;;  %v716_v49 = vshll.u32 %v682_v7, 16 }
  0x5d   : > { %5587 = vst [vmem:[#allocation4_spill] sm:$0xff] %v4815_v42  ;;  %3880 = vmatmul.mubr.bf16.gmra.mrb[12].mxu1 %v4815_v42  ;;  %v975_v53 = vshrl.u32 %v4819_v47, 16  ;;  %v977_v50 = vshll.u32 %v4819_v47, 16  ;;  %v984_v58 = vrot.slane %v982_v28, 1  ;;  %v643_v4 = vpack.c.bf16 %v617_v41, %v616_v39 }
  0x5e   : > { %v715_v2 = vrot.slane %v713_v48, 7  ;;  %v587_v9 = vadd.f32 %v4459_v29, %v548_v43  ;;  %v3370_v32 = vunpack.c.h.bf16 %v3418_v45  ;;  %v618_v42 = vmax.f32 %v586_v11, 0.0 }
  0x5f   : > { %v979_v24 = vrot.slane %v977_v50, 1  ;;  %v755_v20 = vshrl.u32 %v643_v4, 16  ;;  %v758_v8 = vshll.u32 %v643_v4, 16  ;;  %v549_v27 = vmul.f32 %v3369_v12, %v4446_v23 }
  0x60   : > { %v718_v13 = vor.u32 %v716_v49, %v715_v2  ;;  %v4828_v7 = vsel %vm4496_vm4, %v715_v2, 0  ;;  %v619_v1 = vmax.f32 %v587_v9, 0.0  ;;  %v550_v45 = vmul.f32 %v3370_v32, %v4446_v23 }
  0x61   : > { %v980_v33 = vor.u32 %v979_v24, %v975_v53  ;;  %v922_v28 = vshll.u32 %v4828_v7, 16  ;;  %v757_v39 = vrot.slane %v755_v20, 7 }
  0x62   : > { %v4834_v41 = vsel %vm4496_vm4, 0, %v718_v13  ;;  %v644_v43 = vpack.c.bf16 %v619_v1, %v618_v42  ;;  %v589_v42 = vadd.f32 %v4459_v29, %v550_v45 }
  0x63   : > { %v4838_v48 = vsel %vm913_vm3, %v980_v33, %v984_v58  ;;  %v915_v49 = vshrl.u32 %v4834_v41, 16  ;;  %v917_v50 = vshll.u32 %v4834_v41, 16  ;;  %v924_v53 = vrot.slane %v922_v28, 1 }
  0x64   : > { %1562 = vmatprep.mubr.bf16.mxu0 %v4838_v48  ;;  %v760_v4 = vor.u32 %v758_v8, %v757_v39  ;;  %v4845_v2 = vsel %vm4496_vm4, %v757_v39, 0  ;;  %v762_v11 = vshrl.u32 %v644_v43, 16  ;;  %v765_v9 = vshll.u32 %v644_v43, 16 }
  0x65   : > { %v919_v1 = vrot.slane %v917_v50, 1  ;;  %1563 = vmatmul.mubr.bf16.gmra.mrb[16].mxu0 %v4819_v47  ;;  %v994_v23 = vshll.u32 %v4845_v2, 16  ;;  %v588_v33 = vadd.f32 %v4459_v29, %v549_v27  ;;  %v621_v39 = vmax.f32 %v589_v42, 0.0 }
  0x66   : > { %v4853_v58 = vsel %vm4496_vm4, 0, %v760_v4  ;;  %v764_v12 = vrot.slane %v762_v11, 7 }
  0x67   : > { %v920_v24 = vor.u32 %v919_v1, %v915_v49  ;;  %v987_v20 = vshrl.u32 %v4853_v58, 16  ;;  %v989_v8 = vshll.u32 %v4853_v58, 16  ;;  %v620_v28 = vmax.f32 %v588_v33, 0.0  ;;  %v4220_v49 = vld [vmem:[%s5573_s3 + $0x88] sm:$0xff]  }
  0x68   : > { %v767_v32 = vor.u32 %v765_v9, %v764_v12  ;;  %v4859_v13 = vsel %vm4496_vm4, %v764_v12, 0  ;;  %v996_v43 = vrot.slane %v994_v23, 1 }
  0x69   : > { %v925_v27 = vsel %vm913_vm3, %v920_v24, %v924_v53  ;;  %v991_v29 = vrot.slane %v989_v8, 1  ;;  %v1006_v45 = vshll.u32 %v4859_v13, 16  ;;  %v645_v4 = vpack.c.bf16 %v621_v39, %v620_v28  ;;  %v4221_v24 = vld [vmem:[%s5573_s3 + $0x90] sm:$0xff]  }
  0x6a   : > { %1996 = vmatprep.mubr.bf16.mxu1 %v925_v27  ;;  %v4868_v50 = vsel %vm4496_vm4, 0, %v767_v32  ;;  %v1025_v39 = vshll.u32 %v4525_v44, 16  ;;  %v4222_v27 = vld [vmem:[%s5573_s3 + $0x98] sm:$0xff]  }
  0x6b   : > { %1997 = vmatmul.mubr.bf16.vlgmr.msra.gmra.mrb[16].mxu1 %v4834_v41  ;;  %v992_v11 = vor.u32 %v991_v29, %v987_v20  ;;  %v999_v9 = vshrl.u32 %v4868_v50, 16  ;;  %v1001_v53 = vshll.u32 %v4868_v50, 16  ;;  %v769_v1 = vshrl.u32 %v645_v4, 16 }
  0x6c   : > { %3884 = vmatpush3.bf16.msra.mxu1 %v4722_v62  ;;  %2004 = vmatprep.mubr.bf16.mxu1 %v4558_v6  ;;  %v772_v23 = vshll.u32 %v645_v4, 16  ;;  %v1008_v12 = vrot.slane %v1006_v45, 1 }
  0x6d   : > { %v4876_v33 = vsel %vm913_vm3, %v992_v11, %v996_v43  ;;  %v1003_v42 = vrot.slane %v1001_v53, 1  ;;  %3885 = vmatprep.subr.bf16.mxu1 %v4220_v49  ;;  %v771_v20 = vrot.slane %v769_v1, 7  ;;  %v1030_v53 = vshll.u32 %v4510_v35, 16  ;;  %v4223_v1 = vld [vmem:[%s5573_s3 + $0xa0] sm:$0xff]   ;;  %v4224_v35 = vld [vmem:[%s5573_s3 + $0xa8] sm:$0xff]  }
  0x6e   : > { %1570 = vmatprep.mubr.bf16.mxu0 %v4876_v33 }
  0x6f   : > { %1571 = vmatmul.mubr.bf16.gmra.mrb[20].mxu0 %v4853_v58  ;;  %v1004_v62 = vor.u32 %v1003_v42, %v999_v9  ;;  %v774_v6 = vor.u32 %v772_v23, %v771_v20  ;;  %v4885_v8 = vsel %vm4496_vm4, %v771_v20, 0  ;;  %v1027_v9 = vrot.slane %v1025_v39, 1 }
  0x70   : > { %3886 = vmatpush3.bf16.msra.mxu1 %v4220_v49  ;;  %v1018_v28 = vshll.u32 %v4885_v8, 16  ;;  %v1023_v49 = vshrl.u32 %v4525_v44, 16  ;;  %v1032_v20 = vrot.slane %v1030_v53, 1  ;;  %v1042_v39 = vshll.u32 %v4519_v40, 16 }
  0x71   : > { %v4888_v32 = vsel %vm913_vm3, %v1004_v62, %v1008_v12  ;;  %3887 = vmatprep.subr.bf16.mxu1 %v4221_v24  ;;  %v4898_v29 = vsel %vm4496_vm4, 0, %v774_v6  ;;  %v1035_v6 = vshrl.u32 %v4530_v46, 16  ;;  %v1185_v40 = vrot.slane %v4834_v41, 1 }
  0x72   : > { %1578 = vmatprep.mubr.bf16.mxu0 %v4888_v32  ;;  %v1011_v43 = vshrl.u32 %v4898_v29, 16  ;;  %v1013_v45 = vshll.u32 %v4898_v29, 16  ;;  %v1020_v11 = vrot.slane %v1018_v28, 1  ;;  %v1028_v12 = vor.u32 %v1027_v9, %v1023_v49 }
  0x73   : > { %2005 = vmatmul.mubr.bf16.gmra.mrb[20].mxu1 %v4514_v37  ;;  %v1049_v49 = vshll.u32 %v4606_v60, 16 }
  0x74   : > { %2012 = vmatprep.mubr.bf16.mxu1 %v4602_v59  ;;  %3888 = vmatpush3.bf16.msra.mxu1 %v4221_v24  ;;  %v1015_v4 = vrot.slane %v1013_v45, 1  ;;  %v1037_v24 = vshll.u32 %v4530_v46, 16  ;;  %v4921_v62 = vsel %vm913_vm3, %v1028_v12, %v1032_v20  ;;  %v1044_v45 = vrot.slane %v1042_v39, 1 }
  0x75   : > { %3889 = vmatprep.subr.bf16.mxu1 %v4222_v27  ;;  %v1054_v12 = vshll.u32 %v4595_v51, 16 }
  0x76   : > { %v1016_v23 = vor.u32 %v1015_v4, %v1011_v43  ;;  %v1039_v28 = vrot.slane %v1037_v24, 1  ;;  %v4234_v4 = vld [vmem:[%s5573_s3 + $0xb8] sm:$0xff]   ;;  %v1061_v24 = vshll.u32 %v4641_v34, 16 }
  0x77   : > { %1579 = vmatmul.mubr.bf16.gmra.mrb[24].mxu0 %v4868_v50  ;;  %v1056_v20 = vrot.slane %v1054_v12, 1  ;;  %v1083_v12 = vshrl.u32 %v4730_v5, 16 }
  0x78   : > { %3890 = vmatpush3.bf16.msra.mxu1 %v4222_v27  ;;  %v4911_v42 = vsel %vm913_vm3, %v1016_v23, %v1020_v11  ;;  %v4225_v27 = vld [vmem:[%s5573_s3 + $0xb0] sm:$0xff]   ;;  %v1040_v43 = vor.u32 %v1039_v28, %v1035_v6  ;;  %v1186_v11 = vrot.slane %v4828_v7, 1  ;;  %v1051_v23 = vrot.slane %v1049_v49, 1  ;;  %v4949_v7 = vld [vmem:[%s5573_s3 + $0x200] sm:$0xff]  }
  0x79   : > { %3891 = vmatprep.subr.bf16.mxu1 %v4223_v1  ;;  %1586 = vmatprep.mubr.bf16.mxu0 %v4911_v42  ;;  %v1063_v6 = vrot.slane %v1061_v24, 1  ;;  %v1066_v28 = vshll.u32 %v4634_v22, 16  ;;  %v1071_v49 = vshrl.u32 %v4696_v36, 16  ;;  %v1078_v22 = vshll.u32 %v4687_v26, 16 }
  0x7a   : > { %v4939_v9 = vsel %vm1184_vm2, %v1185_v40, %v1186_v11  ;;  %v4942_v53 = vsel %vm913_vm3, %v1040_v43, %v1044_v45  ;;  %v1073_v43 = vshll.u32 %v4696_v36, 16  ;;  %v1090_v26 = vshll.u32 %v4717_v16, 16 }
  0x7b   : > { %2013 = vmatmul.mubr.bf16.gmra.mrb[24].mxu1 %v4570_v14  ;;  %v1080_v11 = vrot.slane %v1078_v22, 1  ;;  %v1102_v16 = vshll.u32 %v4767_v63, 16  ;;  %v1107_v22 = vshrl.u32 %v4801_v15, 16  ;;  %v1114_v63 = vshll.u32 %v4794_v10, 16 }
  0x7c   : > { %2020 = vmatprep.mubr.bf16.mxu1 %v4710_v55  ;;  %3892 = vmatpush3.bf16.msra.mxu1 %v4223_v1  ;;  %v1047_v1 = vshrl.u32 %v4606_v60, 16  ;;  %v1092_v24 = vrot.slane %v1090_v26, 1  ;;  %v1189_v10 = vrot.slane %v4504_v30, 1 }
  0x7d   : > { %3893 = vmatprep.subr.bf16.mxu1 %v4224_v35 }
  0x7e   : > { %v1052_v41 = vor.u32 %v1051_v23, %v1047_v1  ;;  %v1085_v1 = vshll.u32 %v4730_v5, 16 }
  0x7f   : > { %1587 = vmatmul.mubr.bf16.gmra.mrb[28].mxu0 %v4898_v29 }
  0x80   : > { %1594 = vmatprep.mubr.bf16.mxu0 %v4921_v62  ;;  %3894 = vmatpush3.bf16.msra.mxu1 %v4224_v35  ;;  %v4958_v51 = vsel %vm913_vm3, %v1052_v41, %v1056_v20  ;;  %v1059_v35 = vshrl.u32 %v4641_v34, 16  ;;  %v1087_v41 = vrot.slane %v1085_v1, 1  ;;  %v1116_v1 = vrot.slane %v1114_v63, 1  ;;  %v4232_v63 = vld [vmem:[%s5573_s3 + $0x1d8] sm:$0xff]  }
  0x81   : > { %3895 = vmatprep.subr.bf16.mxu1 %v4225_v27 }
  0x82   : > { %v1064_v39 = vor.u32 %v1063_v6, %v1059_v35  ;;  %v1088_v20 = vor.u32 %v1087_v41, %v1083_v12  ;;  %v1097_v35 = vshll.u32 %v4776_v17, 16  ;;  %v1188_v41 = vrot.slane %v4514_v37, 1 }
  0x83   : > { %2021 = vmatmul.mubr.bf16.gmra.mrb[28].mxu1 %v4674_v0  ;;  %v1195_v37 = vrot.slane %v4663_v54, 1  ;;  %v4229_v54 = vld [vmem:[%s5573_s3 + $0x188] sm:$0xff]  }
  0x84   : > { %2028 = vmatprep.mubr.bf16.mxu1 %v4781_v31  ;;  %3896 = vmatpush3.bf16.msra.mxu1 %v4225_v27  ;;  %v1068_v27 = vrot.slane %v1066_v28, 1  ;;  %v4988_v6 = vsel %vm913_vm3, %v1088_v20, %v1092_v24  ;;  %v1095_v28 = vshrl.u32 %v4776_v17, 16  ;;  %v5016_v26 = vsel %vm1184_vm2, %v1188_v41, %v1189_v10  ;;  %v4235_v10 = vld [vmem:[%s5573_s3 + $0x1e0] sm:$0xff]  }
  0x85   : > { %3897 = vmatprep.subr.bf16.mxu1 %v4234_v4  ;;  %v1192_v20 = vrot.slane %v4554_v3, 1  ;;  %v1191_v24 = vrot.slane %v4570_v14, 1  ;;  %v4228_v3 = vld [vmem:[%s5573_s3 + $0x1c8] sm:$0xff]   ;;  %v1204_v41 = vrot.slane %v4845_v2, 1  ;;  %v4236_v2 = vld [vmem:[%s5573_s3 + $0x1a0] sm:$0xff]  }
  0x86   : > { %v4968_v45 = vsel %vm913_vm3, %v1064_v39, %v1068_v27  ;;  %v1099_v39 = vrot.slane %v1097_v35, 1  ;;  %v1194_v35 = vrot.slane %v4674_v0, 1 }
  0x87   : > { %1595 = vmatmul.mubr.bf16.gmra.mrb[32].mxu0 %v4525_v44  ;;  %v5027_v30 = vsel %vm1184_vm2, %v1191_v24, %v1192_v20  ;;  %v1206_v20 = vrot.slane %v4868_v50, 1  ;;  %v1207_v24 = vrot.slane %v4859_v13, 1  ;;  %v4238_v13 = vld [vmem:[%s5573_s3 + $0x1a8] sm:$0xff]  }
  0x88   : > { %1602 = vmatprep.mubr.bf16.mxu0 %v4942_v53  ;;  %3898 = vmatpush3.bf16.msra.mxu1 %v4234_v4  ;;  %v1075_v4 = vrot.slane %v1073_v43, 1  ;;  %v1100_v27 = vor.u32 %v1099_v39, %v1095_v28  ;;  %v1104_v43 = vrot.slane %v1102_v16, 1  ;;  %v4227_v28 = vld [vmem:[%s5573_s3 + $0x180] sm:$0xff]   ;;  %v5036_v39 = vsel %vm1184_vm2, %v1194_v35, %v1195_v37  ;;  %v4237_v37 = vld [vmem:[%s5573_s3 + $0x1e8] sm:$0xff]  }
  0x89   : > { %3931 = vmatprep.subr.bf16.mxu1 %v4949_v7  ;;  %v1197_v16 = vrot.slane %v4756_v19, 1 }
  0x8a   : > { %v1076_v40 = vor.u32 %v1075_v4, %v1071_v49  ;;  %v1109_v49 = vshll.u32 %v4801_v15, 16  ;;  %v4998_v4 = vsel %vm913_vm3, %v1100_v27, %v1104_v43  ;;  %v1198_v27 = vrot.slane %v4740_v18, 1  ;;  %v4230_v43 = vld [vmem:[%s5573_s3 + $0x1d0] sm:$0xff]  }
  0x8b   : > { %2029 = vmatmul.mubr.bf16.gmra.mrb[32].mxu1 %v4756_v19  ;;  %v4231_v18 = vld [vmem:[%s5573_s3 + $0x190] sm:$0xff]  }
  0x8c   : > { %2036 = vmatprep.mubr.bf16.mxu1 %v4838_v48  ;;  %v4978_v23 = vsel %vm913_vm3, %v1076_v40, %v1080_v11  ;;  %v1111_v40 = vrot.slane %v1109_v49, 1  ;;  %v1200_v49 = vrot.slane %v4819_v47, 1 }
  0x8e   : > { %v1112_v11 = vor.u32 %v1111_v40, %v1107_v22  ;;  %v1201_v22 = vrot.slane %v4809_v38, 1  ;;  %v5053_v40 = vsel %vm1184_vm2, %v1197_v16, %v1198_v27  ;;  %v4233_v38 = vld [vmem:[%s5573_s3 + $0x198] sm:$0xff]   ;;  %v4239_v16 = vld [vmem:[%s5573_s3 + $0x1f0] sm:$0xff]  }
  0x8f   : > { %1603 = vmatmul.mubr.bf16.gmra.mrb[36].mxu0 %v4530_v46 }
  0x90   : > { %1610 = vmatprep.mubr.bf16.mxu0 %v4958_v51  ;;  %v5007_v12 = vsel %vm913_vm3, %v1112_v11, %v1116_v1  ;;  %v5062_v11 = vsel %vm1184_vm2, %v1200_v49, %v1201_v22  ;;  %v1203_v1 = vrot.slane %v4853_v58, 1  ;;  %v4242_v49 = vld [vmem:[%s5573_s3 + $0x1b8] sm:$0xff]   ;;  %v4244_v22 = vld [vmem:[%s5573_s3 + $0x208] sm:$0xff]  }
  0x92   : > { %v5079_v35 = vsel %vm1184_vm2, %v1203_v1, %v1204_v41 }
  0x93   : > { %2037 = vmatmul.mubr.bf16.gmra.mrb[36].mxu1 %v4819_v47 }
  0x94   : > { %2044 = vmatprep.mubr.bf16.mxu1 %v4876_v33 }
  0x97   : > { %1611 = vmatmul.mubr.bf16.gmra.mrb[40].mxu0 %v4606_v60 }
  0x98   : > { %1618 = vmatprep.mubr.bf16.mxu0 %v4968_v45 }
  0x9b   : > { %2045 = vmatmul.mubr.bf16.gmra.mrb[40].mxu1 %v4853_v58 }
  0x9c   : > { %2052 = vmatprep.mubr.bf16.mxu1 %v4888_v32 }
  0x9f   : > { %1619 = vmatmul.mubr.bf16.gmra.mrb[44].mxu0 %v4641_v34 }
  0xa0   : > { %1626 = vmatprep.mubr.bf16.mxu0 %v4978_v23 }
  0xa3   : > { %2053 = vmatmul.mubr.bf16.gmra.mrb[44].mxu1 %v4868_v50 }
  0xa4   : > { %2060 = vmatprep.mubr.bf16.mxu1 %v4911_v42 }
  0xa7   : > { %1627 = vmatmul.mubr.bf16.gmra.mrb[48].mxu0 %v4696_v36 }
  0xa8   : > { %1634 = vmatprep.mubr.bf16.mxu0 %v4988_v6 }
  0xab   : > { %2061 = vmatmul.mubr.bf16.gmra.mrb[48].mxu1 %v4898_v29 }
  0xac   : > { %2068 = vmatprep.mubr.bf16.mxu1 %v4921_v62 }
  0xaf   : > { %1635 = vmatmul.mubr.bf16.gmra.mrb[52].mxu0 %v4730_v5 }
  0xb0   : > { %1642 = vmatprep.mubr.bf16.mxu0 %v4998_v4 }
  0xb3   : > { %2069 = vmatmul.mubr.bf16.gmra.mrb[52].mxu1 %v4525_v44 }
  0xb4   : > { %2076 = vmatprep.mubr.bf16.mxu1 %v4942_v53 }
  0xb7   : > { %1643 = vmatmul.mubr.bf16.gmra.mrb[56].mxu0 %v4776_v17 }
  0xb8   : > { %1650 = vmatprep.mubr.bf16.mxu0 %v5007_v12 }
  0xbb   : > { %2077 = vmatmul.mubr.bf16.gmra.mrb[56].mxu1 %v4530_v46 }
  0xbc   : > { %2084 = vmatprep.mubr.bf16.mxu1 %v4958_v51 }
  0xbf   : > { %1651 = vmatmul.mubr.bf16.gmra.mrb[60].mxu0 %v4801_v15 }
  0xc0   : > { %3851 = vmatprep.mubr.bf16.mxu0 %v5016_v26 }
  0xc3   : > { %2085 = vmatmul.mubr.bf16.gmra.mrb[60].mxu1 %v4606_v60 }
  0xc4   : > { %2092 = vmatprep.mubr.bf16.mxu1 %v4968_v45 }
  0xc7   : > { %3852 = vmatmul.mubr.bf16.vlgmr.msra.gmra.mrb[64].mxu0 %v5027_v30 }
  0xc8   : > { %3700 = vmatpush3.bf16.msra.mxu0 %v4227_v28  ;;  %3855 = vmatprep.mubr.bf16.mxu0 %v5036_v39  ;;  %v5088_v28 = vsel %vm1184_vm2, %v1206_v20, %v1207_v24 }
  0xc9   : > { %3701 = vmatprep.subr.bf16.mxu0 %v4228_v3  ;;  %v1209_v3 = vrot.slane %v4898_v29, 1 }
  0xcb   : > { %2093 = vmatmul.mubr.bf16.gmra.mrb[64].mxu1 %v4641_v34 }
  0xcc   : > { %3702 = vmatpush3.bf16.msra.mxu0 %v4229_v54  ;;  %2100 = vmatprep.mubr.bf16.mxu1 %v4978_v23  ;;  %v1210_v54 = vrot.slane %v4885_v8, 1  ;;  %v4241_v8 = vld [vmem:[%s5573_s3 + $0x1f8] sm:$0xff]  }
  0xcd   : > { %3703 = vmatprep.subr.bf16.mxu0 %v4230_v43  ;;  %v4240_v43 = vld [vmem:[%s5573_s3 + $0x1b0] sm:$0xff]  }
  0xce   : > { %v5103_v27 = vsel %vm1184_vm2, %v1209_v3, %v1210_v54  ;;  %v4251_v3 = vld [vmem:[%s5574_s4] ss:$0 sm:$0xff] }
  0xcf   : > { %3856 = vmatmul.mubr.bf16.gmra.mrb[68].mxu0 %v5053_v40 }
  0xd0   : > { %3704 = vmatpush3.bf16.msra.mxu0 %v4231_v18  ;;  %3859 = vmatprep.mubr.bf16.mxu0 %v5062_v11 }
  0xd1   : > { %3705 = vmatprep.subr.bf16.mxu0 %v4232_v63 }
  0xd3   : > { %2101 = vmatmul.mubr.bf16.gmra.mrb[68].mxu1 %v4696_v36 }
  0xd4   : > { %3706 = vmatpush3.bf16.msra.mxu0 %v4233_v38  ;;  %2108 = vmatprep.mubr.bf16.mxu1 %v4988_v6 }
  0xd5   : > { %3707 = vmatprep.subr.bf16.mxu0 %v4235_v10 }
  0xd7   : > { %3860 = vmatmul.mubr.bf16.gmra.mrb[72].mxu0 %v5079_v35 }
  0xd8   : > { %3708 = vmatpush3.bf16.msra.mxu0 %v4236_v2  ;;  %3863 = vmatprep.mubr.bf16.mxu0 %v5088_v28 }
  0xd9   : > { %3709 = vmatprep.subr.bf16.mxu0 %v4237_v37 }
  0xdb   : > { %2109 = vmatmul.mubr.bf16.gmra.mrb[72].mxu1 %v4730_v5 }
  0xdc   : > { %3710 = vmatpush3.bf16.msra.mxu0 %v4238_v13  ;;  %2116 = vmatprep.mubr.bf16.mxu1 %v4998_v4  ;;  %v5589_v13 = vld [vmem:[#allocation3_spill] sm:$0xff] }
  0xdd   : > { %3711 = vmatprep.subr.bf16.mxu0 %v4239_v16 }
  0xdf   : > { %3864 = vmatmul.mubr.bf16.gmra.mrb[76].mxu0 %v5103_v27 }
  0xe0   : > { %3712 = vmatpush3.bf16.msra.mxu0 %v4240_v43  ;;  %2511 = vmatprep.mubr.bf16.mxu0 %v4602_v59  ;;  %v4245_v59 = vld [vmem:[%s5573_s3 + $0x210] sm:$0xff]  }
  0xe1   : > { %3713 = vmatprep.subr.bf16.mxu0 %v4241_v8 }
  0xe3   : > { %2117 = vmatmul.mubr.bf16.gmra.mrb[76].mxu1 %v4776_v17 }
  0xe4   : > { %3714 = vmatpush3.bf16.msra.mxu0 %v4242_v49  ;;  %3899 = vmatprep.mubr.bf16.mxu1 %v4939_v9  ;;  %v4252_v49 = vld [vmem:[%s5575_s5] ss:$0 sm:$0xff] }
  0xe7   : > { %2512 = vmatmul.mubr.bf16.vlgmr.msra.gmra.mrb[80].mxu0 %v4570_v14  ;;  %v4246_v14 = vld [vmem:[%s5573_s3 + $0x218] sm:$0xff]  }
  0xe8   : > { %2519 = vmatprep.mubr.bf16.mxu0 %v4710_v55  ;;  %v4247_v55 = vld [vmem:[%s5573_s3 + $0x220] sm:$0xff]  }
  0xeb   : > { %3900 = vmatmul.mubr.bf16.vlgmr.msra.gmra.mrb[80].mxu1 %v5016_v26 }
  0xec   : > { %3932 = vmatpush3.bf16.msra.mxu1 %v4949_v7  ;;  %3903 = vmatprep.mubr.bf16.mxu1 %v5027_v30 }
  0xed   : > { %3933 = vmatprep.subr.bf16.mxu1 %v4244_v22 }
  0xef   : > { %2520 = vmatmul.mubr.bf16.gmra.mrb[84].mxu0 %v4674_v0  ;;  %v4248_v0 = vld [vmem:[%s5573_s3 + $0x228] sm:$0xff]  }
  0xf0   : > { %3934 = vmatpush3.bf16.msra.mxu1 %v4244_v22  ;;  %2527 = vmatprep.mubr.bf16.mxu0 %v4781_v31  ;;  %v4249_v31 = vld [vmem:[%s5573_s3 + $0x230] sm:$0xff]  }
  0xf1   : > { %3935 = vmatprep.subr.bf16.mxu1 %v4245_v59 }
  0xf3   : > { %3904 = vmatmul.mubr.bf16.gmra.mrb[84].mxu1 %v5036_v39 }
  0xf4   : > { %3907 = vmatprep.mubr.bf16.mxu1 %v5053_v40  ;;  %3936 = vmatpush3.bf16.msra.mxu1 %v4245_v59 }
  0xf5   : > { %3937 = vmatprep.subr.bf16.mxu1 %v4246_v14 }
  0xf7   : > { %2528 = vmatmul.mubr.bf16.gmra.mrb[88].mxu0 %v4756_v19  ;;  %v4250_v19 = vld [vmem:[%s5573_s3 + $0x238] sm:$0xff]  }
  0xf8   : > { %2535 = vmatprep.mubr.bf16.mxu0 %v4838_v48  ;;  %3938 = vmatpush3.bf16.msra.mxu1 %v4246_v14 }
  0xf9   : > { %3939 = vmatprep.subr.bf16.mxu1 %v4247_v55 }
  0xfb   : > { %3908 = vmatmul.mubr.bf16.gmra.mrb[88].mxu1 %v5062_v11 }
  0xfc   : > { %3911 = vmatprep.mubr.bf16.mxu1 %v5079_v35  ;;  %3940 = vmatpush3.bf16.msra.mxu1 %v4247_v55 }
  0xfd   : > { %3941 = vmatprep.subr.bf16.mxu1 %v4248_v0 }
  0xff   : > { %2536 = vmatmul.mubr.bf16.gmra.mrb[92].mxu0 %v4819_v47 }
 0x100   : > { %2543 = vmatprep.mubr.bf16.mxu0 %v4876_v33  ;;  %3942 = vmatpush3.bf16.msra.mxu1 %v4248_v0 }
 0x101   : > { %3943 = vmatprep.subr.bf16.mxu1 %v4249_v31 }
 0x103   : > { %3912 = vmatmul.mubr.bf16.gmra.mrb[92].mxu1 %v5088_v28 }
 0x104   : > { %3915 = vmatprep.mubr.bf16.mxu1 %v5103_v27  ;;  %3944 = vmatpush3.bf16.msra.mxu1 %v4249_v31 }
 0x105   : > { %v3443_v48 = vpop.f32.mrb[0].mxu0  ;;  %3945 = vmatprep.subr.bf16.mxu1 %v4250_v19 }
 0x106   : > { %v3444_v9 = vpop.f32.mrb[1].mxu0 }
 0x107   : > { %v5156_v7 = vadd.f32 %v3444_v9, %v3443_v48  ;;  %v3446_v26 = vpop.f32.mrb[2].mxu0  ;;  %2544 = vmatmul.mubr.bf16.gmra.mrb[96].mxu0 %v4853_v58  ;;  %v5588_v58 = vld [vmem:[#allocation2_spill] sm:$0xff] }
 0x108   : > { %v3447_v47 = vpop.f32.mrb[3].mxu0  ;;  %2551 = vmatprep.mubr.bf16.mxu0 %v4888_v32  ;;  %3946 = vmatpush3.bf16.msra.mxu1 %v4250_v19 }
 0x109   : > { %v5159_v33 = vadd.f32 %v3447_v47, %v3446_v26 }
 0x10b   : > { %3916 = vmatmul.mubr.bf16.gmra.mrb[0].mxu1 %v4543_v56 }
 0x10c   : > { %3919 = vmatprep.mubr.bf16.mxu1 %v4548_v61 }
 0x10f   : > { %2552 = vmatmul.mubr.bf16.gmra.mrb[100].mxu0 %v4868_v50 }
 0x110   : > { %2559 = vmatprep.mubr.bf16.mxu0 %v4911_v42 }
 0x111   : > { %v3449_v18 = vpop.f32.mrb[4].mxu0 }
 0x112   : > { %v3450_v63 = vpop.f32.mrb[5].mxu0 }
 0x113   : > { %v5164_v38 = vadd.f32 %v3450_v63, %v3449_v18  ;;  %v3452_v1 = vpop.f32.mrb[6].mxu0  ;;  %3920 = vmatmul.mubr.bf16.gmra.mrb[4].mxu1 %v4630_v25 }
 0x114   : > { %v3453_v41 = vpop.f32.mrb[7].mxu0  ;;  %3923 = vmatprep.mubr.bf16.mxu1 %v4659_v52 }
 0x115   : > { %v5167_v10 = vadd.f32 %v3453_v41, %v3452_v1 }
 0x117   : > { %2560 = vmatmul.mubr.bf16.gmra.mrb[104].mxu0 %v4898_v29  ;;  %v3408_v29 = vld [vmem:[%s441_s19] sm:$0xff]  }
 0x118   : > { %2567 = vmatprep.mubr.bf16.mxu0 %v4921_v62  ;;  %v3409_v2 = vunpack.c.l.bf16 %v3408_v29  ;;  %v3410_v37 = vunpack.c.h.bf16 %v3408_v29 }
 0x11a   : > { %v687_v54 = vmul.f32 %v4251_v3, %v3409_v2  ;;  %v688_v16 = vmul.f32 %v4251_v3, %v3410_v37 }
 0x11b   : > { %3924 = vmatmul.mubr.bf16.gmra.mrb[8].mxu1 %v4713_v57  ;;  %v3455_v32 = vpop.f32.mrb[8].mxu0 }
 0x11c   : > { %3927 = vmatprep.mubr.bf16.mxu1 %v5588_v58  ;;  %v3456_v50 = vpop.f32.mrb[9].mxu0  ;;  %v690_v22 = vadd.f32 %v4252_v49, %v688_v16 }
 0x11d   : > { %v5180_v42 = vadd.f32 %v3456_v50, %v3455_v32  ;;  %v3458_v20 = vpop.f32.mrb[10].mxu0 }
 0x11e   : > { %v3459_v24 = vpop.f32.mrb[11].mxu0 }
 0x11f   : > { %2568 = vmatmul.mubr.bf16.gmra.mrb[108].mxu0 %v4525_v44  ;;  %v5184_v62 = vadd.f32 %v3459_v24, %v3458_v20 }
 0x120   : > { %2575 = vmatprep.mubr.bf16.mxu0 %v4942_v53 }
 0x123   : > { %3928 = vmatmul.mubr.bf16.gmra.mrb[12].mxu1 %v5589_v13 }
 0x124   : > { %3947 = vmatprep.mubr.bf16.mxu1 %v5027_v30  ;;  %v689_v30 = vadd.f32 %v4252_v49, %v687_v54 }
 0x127   : > { %2576 = vmatmul.mubr.bf16.gmra.mrb[112].mxu0 %v4530_v46  ;;  %v691_v46 = vmax.f32 %v689_v30, 0.0 }
 0x128   : > { %2583 = vmatprep.mubr.bf16.mxu0 %v4958_v51  ;;  %v3461_v44 = vpop.f32.mrb[12].mxu0  ;;  %v692_v51 = vmax.f32 %v690_v22, 0.0 }
 0x129   : > { %v3462_v53 = vpop.f32.mrb[13].mxu0 }
 0x12a   : > { %v5193_v43 = vadd.f32 %v3462_v53, %v3461_v44  ;;  %v3464_v8 = vpop.f32.mrb[14].mxu0  ;;  %v693_v55 = vpack.c.bf16 %v692_v51, %v691_v46 }
 0x12b   : > { %3948 = vmatmul.mubr.bf16.vlgmr.msra.gmra.mrb[80].mxu1 %v5036_v39  ;;  %v3465_v59 = vpop.f32.mrb[15].mxu0 }
 0x12c   : > { %3951 = vmatprep.mubr.bf16.mxu1 %v5053_v40  ;;  %v5200_v14 = vadd.f32 %v3465_v59, %v3464_v8  ;;  %v711_v0 = vmul.bf16 0.0, %v693_v55 }
 0x12e   : > { %v832_v48 = vshrl.u32 %v711_v0, 16  ;;  %v835_v9 = vshll.u32 %v711_v0, 16 }
 0x12f   : > { %2584 = vmatmul.mubr.bf16.gmra.mrb[116].mxu0 %v4606_v60 }
 0x130   : > { %2591 = vmatprep.mubr.bf16.mxu0 %v4968_v45 }
 0x133   : > { %3952 = vmatmul.mubr.bf16.gmra.mrb[84].mxu1 %v5062_v11 }
 0x134   : > { %3955 = vmatprep.mubr.bf16.mxu1 %v5079_v35  ;;  %v834_v35 = vrot.slane %v832_v48, 7 }
 0x136   : > { %v837_v63 = vor.u32 %v835_v9, %v834_v35  ;;  %v912_v3 = vsel %vm4496_vm4, %v834_v35, 0 }
 0x137   : > { %2592 = vmatmul.mubr.bf16.gmra.mrb[120].mxu0 %v4641_v34  ;;  %v1126_v8 = vshll.u32 %v912_v3, 16 }
 0x138   : > { %v3467_v39 = vpop.f32.mrb[16].mxu0  ;;  %2599 = vmatprep.mubr.bf16.mxu0 %v4978_v23 }
 0x139   : > { %v3468_v40 = vpop.f32.mrb[17].mxu0  ;;  %v1128_v51 = vrot.slane %v1126_v8, 1 }
 0x13a   : > { %v5208_v31 = vadd.f32 %v3468_v40, %v3467_v39  ;;  %v3470_v19 = vpop.f32.mrb[18].mxu0 }
 0x13b   : > { %3956 = vmatmul.mubr.bf16.gmra.mrb[88].mxu1 %v5088_v28  ;;  %v3471_v60 = vpop.f32.mrb[19].mxu0 }
 0x13c   : > { %v5211_v45 = vadd.f32 %v3471_v60, %v3470_v19  ;;  %3959 = vmatprep.mubr.bf16.mxu1 %v5103_v27 }
 0x13e   : > { %v3579_v11 = vpop.f32.mrb[16].mxu1 }
 0x13f   : > { %v3580_v26 = vpop.f32.mrb[17].mxu1  ;;  %2600 = vmatmul.mubr.bf16.gmra.mrb[124].mxu0 %v4696_v36 }
 0x140   : > { %v5215_v34 = vadd.f32 %v3580_v26, %v3579_v11  ;;  %v3582_v23 = vpop.f32.mrb[18].mxu1  ;;  %2607 = vmatprep.mubr.bf16.mxu0 %v4988_v6  ;;  %v5228_v6 = vsel %vm4496_vm4, 0, %v837_v63 }
 0x141   : > { %v3583_v47 = vpop.f32.mrb[19].mxu1  ;;  %v1121_v2 = vshll.u32 %v5228_v6, 16  ;;  %v1236_v63 = vrot.slane %v5228_v6, 1 }
 0x142   : > { %v5218_v18 = vadd.f32 %v3583_v47, %v3582_v23  ;;  %v3473_v28 = vpop.f32.mrb[20].mxu0 }
 0x143   : > { %3960 = vmatmul.mubr.bf16.gmra.mrb[92].mxu1 %v4543_v56  ;;  %v3474_v1 = vpop.f32.mrb[21].mxu0  ;;  %v1123_v53 = vrot.slane %v1121_v2, 1 }
 0x144   : > { %v5221_v27 = vadd.f32 %v3474_v1, %v3473_v28  ;;  %v3476_v41 = vpop.f32.mrb[22].mxu0  ;;  %3963 = vmatprep.mubr.bf16.mxu1 %v4548_v61  ;;  %v5590_v28 = vld [vmem:[#allocation4_spill] sm:$0xff]  ;;  %v1237_v1 = vrot.slane %v912_v3, 1 }
 0x145   : > { %v3477_v32 = vpop.f32.mrb[23].mxu0 }
 0x146   : > { %v3585_v36 = vpop.f32.mrb[20].mxu1  ;;  %v5224_v50 = vadd.f32 %v3477_v32, %v3476_v41 }
 0x147   : > { %v3586_v20 = vpop.f32.mrb[21].mxu1  ;;  %2608 = vmatmul.mubr.bf16.gmra.mrb[128].mxu0 %v4730_v5 }
 0x148   : > { %v5231_v24 = vadd.f32 %v3586_v20, %v3585_v36  ;;  %v3588_v56 = vpop.f32.mrb[22].mxu1  ;;  %2615 = vmatprep.mubr.bf16.mxu0 %v4998_v4  ;;  %v1119_v4 = vshrl.u32 %v5228_v6, 16 }
 0x149   : > { %v3589_v29 = vpop.f32.mrb[23].mxu1 }
 0x14a   : > { %v5235_v61 = vadd.f32 %v3589_v29, %v3588_v56  ;;  %v3479_v37 = vpop.f32.mrb[24].mxu0  ;;  %v1124_v46 = vor.u32 %v1123_v53, %v1119_v4 }
 0x14b   : > { %3964 = vmatmul.mubr.bf16.gmra.mrb[0].mxu1 %v4630_v25  ;;  %v3480_v54 = vpop.f32.mrb[25].mxu0 }
 0x14c   : > { %v5240_v16 = vadd.f32 %v3480_v54, %v3479_v37  ;;  %v3482_v5 = vpop.f32.mrb[26].mxu0  ;;  %3967 = vmatprep.mubr.bf16.mxu1 %v4659_v52  ;;  %v1129_v19 = vsel %vm913_vm3, %v1124_v46, %v1128_v51 }
 0x14d   : > { %v3483_v44 = vpop.f32.mrb[27].mxu0 }
 0x14e   : > { %v3591_v49 = vpop.f32.mrb[24].mxu1  ;;  %v5244_v30 = vadd.f32 %v3483_v44, %v3482_v5 }
 0x14f   : > { %v3592_v22 = vpop.f32.mrb[25].mxu1  ;;  %2616 = vmatmul.mubr.bf16.gmra.mrb[132].mxu0 %v4776_v17 }
 0x150   : > { %v5247_v21 = vadd.f32 %v3592_v22, %v3591_v49  ;;  %v3594_v25 = vpop.f32.mrb[26].mxu1  ;;  %2623 = vmatprep.mubr.bf16.mxu0 %v5007_v12 }
 0x151   : > { %v3595_v59 = vpop.f32.mrb[27].mxu1 }
 0x152   : > { %v5250_v52 = vadd.f32 %v3595_v59, %v3594_v25  ;;  %v3485_v55 = vpop.f32.mrb[28].mxu0 }
 0x153   : > { %3968 = vmatmul.mubr.bf16.gmra.mrb[4].mxu1 %v4713_v57  ;;  %v3486_v0 = vpop.f32.mrb[29].mxu0 }
 0x154   : > { %v5253_v39 = vadd.f32 %v3486_v0, %v3485_v55  ;;  %v3488_v40 = vpop.f32.mrb[30].mxu0  ;;  %3971 = vmatprep.mubr.bf16.mxu1 %v5588_v58 }
 0x155   : > { %v3489_v17 = vpop.f32.mrb[31].mxu0 }
 0x156   : > { %v3597_v48 = vpop.f32.mrb[28].mxu1  ;;  %v5257_v60 = vadd.f32 %v3489_v17, %v3488_v40 }
 0x157   : > { %v3598_v12 = vpop.f32.mrb[29].mxu1  ;;  %2624 = vmatmul.mubr.bf16.gmra.mrb[136].mxu0 %v4801_v15 }
 0x158   : > { %v5260_v11 = vadd.f32 %v3598_v12, %v3597_v48  ;;  %v3600_v35 = vpop.f32.mrb[30].mxu1  ;;  %2631 = vmatprep.mubr.bf16.mxu0 %v1129_v19 }
 0x159   : > { %v3601_v57 = vpop.f32.mrb[31].mxu1 }
 0x15a   : > { %v5262_v9 = vadd.f32 %v3601_v57, %v3600_v35  ;;  %v3491_v26 = vpop.f32.mrb[32].mxu0 }
 0x15b   : > { %3972 = vmatmul.mubr.bf16.gmra.mrb[8].mxu1 %v5589_v13  ;;  %v3492_v58 = vpop.f32.mrb[33].mxu0  ;;  %v1238_v13 = vsel %vm1184_vm2, %v1236_v63, %v1237_v1 }
 0x15c   : > { %v5265_v23 = vadd.f32 %v3492_v58, %v3491_v26  ;;  %v3494_v47 = vpop.f32.mrb[34].mxu0  ;;  %3975 = vmatprep.mubr.bf16.mxu1 %v5590_v28 }
 0x15d   : > { %v3495_v15 = vpop.f32.mrb[35].mxu0 }
 0x15e   : > { %v3603_v41 = vpop.f32.mrb[32].mxu1  ;;  %v3496_v32 = vadd.f32 %v3495_v15, %v3494_v47 }
 0x15f   : > { %v3604_v36 = vpop.f32.mrb[33].mxu1  ;;  %2632 = vmatmul.mubr.bf16.gmra.mrb[140].mxu0 %v5228_v6 }
 0x160   : > { %v5270_v20 = vadd.f32 %v3604_v36, %v3603_v41  ;;  %v3606_v56 = vpop.f32.mrb[34].mxu1 }
 0x161   : > { %v3607_v29 = vpop.f32.mrb[35].mxu1 }
 0x162   : > { %v5273_v2 = vadd.f32 %v3607_v29, %v3606_v56  ;;  %v3497_v37 = vpop.f32.mrb[36].mxu0 }
 0x163   : > { %3976 = vmatmul.mubr.bf16.gmra.mrb[12].mxu1 %v1238_v13  ;;  %v3498_v54 = vpop.f32.mrb[37].mxu0 }
 0x164   : > { %v3499_v5 = vadd.f32 %v3498_v54, %v3497_v37  ;;  %v3500_v44 = vpop.f32.mrb[38].mxu0 }
 0x165   : > { %v3501_v3 = vpop.f32.mrb[39].mxu0 }
 0x166   : > { %v3609_v4 = vpop.f32.mrb[36].mxu1  ;;  %v3502_v53 = vadd.f32 %v3501_v3, %v3500_v44 }
 0x167   : > { %v3610_v8 = vpop.f32.mrb[37].mxu1 }
 0x168   : > { %v5275_v49 = vadd.f32 %v3610_v8, %v3609_v4  ;;  %v3612_v6 = vpop.f32.mrb[38].mxu1 }
 0x169   : > { %v3613_v22 = vpop.f32.mrb[39].mxu1 }
 0x16a   : > { %v5277_v25 = vadd.f32 %v3613_v22, %v3612_v6  ;;  %v3503_v59 = vpop.f32.mrb[40].mxu0 }
 0x16b   : > { %v3504_v46 = vpop.f32.mrb[41].mxu0 }
 0x16c   : > { %v3505_v51 = vadd.f32 %v3504_v46, %v3503_v59  ;;  %v3506_v55 = vpop.f32.mrb[42].mxu0 }
 0x16d   : > { %v3507_v0 = vpop.f32.mrb[43].mxu0 }
 0x16e   : > { %v3615_v40 = vpop.f32.mrb[40].mxu1  ;;  %v3508_v17 = vadd.f32 %v3507_v0, %v3506_v55 }
 0x16f   : > { %v3616_v19 = vpop.f32.mrb[41].mxu1 }
 0x170   : > { %v5279_v48 = vadd.f32 %v3616_v19, %v3615_v40  ;;  %v3618_v12 = vpop.f32.mrb[42].mxu1 }
 0x171   : > { %v3619_v35 = vpop.f32.mrb[43].mxu1 }
 0x172   : > { %v5281_v57 = vadd.f32 %v3619_v35, %v3618_v12  ;;  %v3509_v26 = vpop.f32.mrb[44].mxu0 }
 0x173   : > { %v3510_v58 = vpop.f32.mrb[45].mxu0 }
 0x174   : > { %v5283_v47 = vadd.f32 %v3510_v58, %v3509_v26  ;;  %v3512_v28 = vpop.f32.mrb[46].mxu0 }
 0x175   : > { %v3513_v63 = vpop.f32.mrb[47].mxu0 }
 0x176   : > { %v3621_v1 = vpop.f32.mrb[44].mxu1  ;;  %v5285_v15 = vadd.f32 %v3513_v63, %v3512_v28 }
 0x177   : > { %v3622_v41 = vpop.f32.mrb[45].mxu1 }
 0x178   : > { %v5287_v36 = vadd.f32 %v3622_v41, %v3621_v1  ;;  %v3624_v56 = vpop.f32.mrb[46].mxu1 }
 0x179   : > { %v3625_v13 = vpop.f32.mrb[47].mxu1 }
 0x17a   : > { %v5289_v29 = vadd.f32 %v3625_v13, %v3624_v56  ;;  %v3515_v37 = vpop.f32.mrb[48].mxu0 }
 0x17b   : > { %v3516_v54 = vpop.f32.mrb[49].mxu0 }
 0x17c   : > { %v5291_v44 = vadd.f32 %v3516_v54, %v3515_v37  ;;  %v3518_v3 = vpop.f32.mrb[50].mxu0 }
 0x17d   : > { %v3519_v4 = vpop.f32.mrb[51].mxu0 }
 0x17e   : > { %v3627_v8 = vpop.f32.mrb[48].mxu1  ;;  %v5293_v6 = vadd.f32 %v3519_v4, %v3518_v3 }
 0x17f   : > { %v3628_v22 = vpop.f32.mrb[49].mxu1 }
 0x180   : > { %v3629_v59 = vadd.f32 %v3628_v22, %v3627_v8  ;;  %v3630_v46 = vpop.f32.mrb[50].mxu1 }
 0x181   : > { %v3631_v55 = vpop.f32.mrb[51].mxu1 }
 0x182   : > { %v5296_v0 = vadd.f32 %v3629_v59, %v5265_v23  ;;  %v3632_v40 = vadd.f32 %v3631_v55, %v3630_v46  ;;  %v3521_v19 = vpop.f32.mrb[52].mxu0 }
 0x183   : > { %v3522_v12 = vpop.f32.mrb[53].mxu0 }
 0x184   : > { %v5298_v35 = vadd.f32 %v3632_v40, %v3496_v32  ;;  %v5300_v26 = vadd.f32 %v3522_v12, %v3521_v19  ;;  %v3524_v58 = vpop.f32.mrb[54].mxu0 }
 0x185   : > { %v3525_v28 = vpop.f32.mrb[55].mxu0 }
 0x186   : > { %v3633_v63 = vpop.f32.mrb[52].mxu1  ;;  %v5302_v1 = vadd.f32 %v3525_v28, %v3524_v58 }
 0x187   : > { %v3634_v41 = vpop.f32.mrb[53].mxu1 }
 0x188   : > { %v3635_v56 = vadd.f32 %v3634_v41, %v3633_v63  ;;  %v3636_v13 = vpop.f32.mrb[54].mxu1 }
 0x189   : > { %v3637_v37 = vpop.f32.mrb[55].mxu1 }
 0x18a   : > { %v5304_v54 = vadd.f32 %v3635_v56, %v3499_v5  ;;  %v3638_v23 = vadd.f32 %v3637_v37, %v3636_v13  ;;  %v3527_v3 = vpop.f32.mrb[56].mxu0 }
 0x18b   : > { %v3528_v4 = vpop.f32.mrb[57].mxu0 }
 0x18c   : > { %v5306_v8 = vadd.f32 %v3638_v23, %v3502_v53  ;;  %v5308_v32 = vadd.f32 %v3528_v4, %v3527_v3  ;;  %v3530_v22 = vpop.f32.mrb[58].mxu0 }
 0x18d   : > { %v3531_v59 = vpop.f32.mrb[59].mxu0 }
 0x18e   : > { %v3639_v46 = vpop.f32.mrb[56].mxu1  ;;  %v5310_v55 = vadd.f32 %v3531_v59, %v3530_v22 }
 0x18f   : > { %v3640_v40 = vpop.f32.mrb[57].mxu1 }
 0x190   : > { %v3641_v19 = vadd.f32 %v3640_v40, %v3639_v46  ;;  %v3642_v12 = vpop.f32.mrb[58].mxu1 }
 0x191   : > { %v3643_v58 = vpop.f32.mrb[59].mxu1 }
 0x192   : > { %v5312_v28 = vadd.f32 %v3641_v19, %v3505_v51  ;;  %v3644_v5 = vadd.f32 %v3643_v58, %v3642_v12  ;;  %v3533_v63 = vpop.f32.mrb[60].mxu0 }
 0x193   : > { %v3534_v41 = vpop.f32.mrb[61].mxu0 }
 0x194   : > { %v5314_v56 = vadd.f32 %v3644_v5, %v3508_v17  ;;  %v5316_v53 = vadd.f32 %v3534_v41, %v3533_v63  ;;  %v3536_v13 = vpop.f32.mrb[62].mxu0 }
 0x195   : > { %v3537_v37 = vpop.f32.mrb[63].mxu0 }
 0x196   : > { %v3645_v23 = vpop.f32.mrb[60].mxu1  ;;  %v5318_v3 = vadd.f32 %v3537_v37, %v3536_v13 }
 0x197   : > { %v3646_v4 = vpop.f32.mrb[61].mxu1 }
 0x198   : > { %v3647_v22 = vadd.f32 %v3646_v4, %v3645_v23  ;;  %v3648_v59 = vpop.f32.mrb[62].mxu1 }
 0x199   : > { %v3649_v46 = vpop.f32.mrb[63].mxu1 }
 0x19a   : > { %v5321_v40 = vadd.f32 %v3647_v22, %v5283_v47  ;;  %v3650_v51 = vadd.f32 %v3649_v46, %v3648_v59  ;;  %v3853_v19 = vpop.f32.mrb[64].mxu0 }
 0x19b   : > { %v1702_v12 = vadd.f32 %v3853_v19, %v5164_v38  ;;  %v1693_v17 = vpop.f32.mrb[65].mxu0 }
 0x19c   : > { %v5325_v58 = vadd.f32 %v3650_v51, %v5285_v15  ;;  %v1694_v5 = vadd.f32 %v5156_v7, %v1693_v17  ;;  %v3854_v63 = vpop.f32.mrb[66].mxu0 }
 0x19d   : > { %v5329_v41 = vadd.f32 %v5231_v24, %v1702_v12  ;;  %v1705_v13 = vadd.f32 %v3854_v63, %v5167_v10  ;;  %v1696_v37 = vpop.f32.mrb[67].mxu0 }
 0x19e   : > { %v3651_v23 = vpop.f32.mrb[64].mxu1  ;;  %v5333_v47 = vadd.f32 %v5215_v34, %v1694_v5  ;;  %v1697_v4 = vadd.f32 %v5159_v33, %v1696_v37 }
 0x19f   : > { %v3652_v38 = vpop.f32.mrb[65].mxu1  ;;  %v5337_v22 = vadd.f32 %v5235_v61, %v1705_v13 }
 0x1a0   : > { %v3653_v15 = vadd.f32 %v3652_v38, %v3651_v23  ;;  %v3654_v59 = vpop.f32.mrb[66].mxu1  ;;  %v5340_v7 = vadd.f32 %v5218_v18, %v1697_v4 }
 0x1a1   : > { %v3655_v24 = vpop.f32.mrb[67].mxu1 }
 0x1a2   : > { %v5343_v46 = vadd.f32 %v3653_v15, %v5291_v44  ;;  %v3656_v10 = vadd.f32 %v3655_v24, %v3654_v59  ;;  %v3857_v51 = vpop.f32.mrb[68].mxu0 }
 0x1a3   : > { %v1718_v34 = vadd.f32 %v3857_v51, %v5193_v43  ;;  %v1709_v19 = vpop.f32.mrb[69].mxu0 }
 0x1a4   : > { %v5347_v33 = vadd.f32 %v3656_v10, %v5293_v6  ;;  %v1710_v61 = vadd.f32 %v5180_v42, %v1709_v19  ;;  %v3858_v12 = vpop.f32.mrb[70].mxu0 }
 0x1a5   : > { %v5351_v17 = vadd.f32 %v5260_v11, %v1718_v34  ;;  %v1721_v18 = vadd.f32 %v3858_v12, %v5200_v14  ;;  %v1712_v5 = vpop.f32.mrb[71].mxu0 }
 0x1a6   : > { %v3657_v63 = vpop.f32.mrb[68].mxu1  ;;  %v5355_v44 = vadd.f32 %v5247_v21, %v1710_v61  ;;  %v1713_v13 = vadd.f32 %v5184_v62, %v1712_v5 }
 0x1a7   : > { %v3658_v43 = vpop.f32.mrb[69].mxu1  ;;  %v5359_v37 = vadd.f32 %v5262_v9, %v1721_v18 }
 0x1a8   : > { %v3659_v6 = vadd.f32 %v3658_v43, %v3657_v63  ;;  %v3660_v23 = vpop.f32.mrb[70].mxu1  ;;  %v5362_v42 = vadd.f32 %v5250_v52, %v1713_v13 }
 0x1a9   : > { %v3661_v11 = vpop.f32.mrb[71].mxu1 }
 0x1aa   : > { %v5365_v4 = vadd.f32 %v3659_v6, %v5300_v26  ;;  %v3662_v14 = vadd.f32 %v3661_v11, %v3660_v23  ;;  %v3861_v38 = vpop.f32.mrb[72].mxu0 }
 0x1ab   : > { %v1734_v21 = vadd.f32 %v3861_v38, %v5221_v27  ;;  %v1725_v15 = vpop.f32.mrb[73].mxu0 }
 0x1ac   : > { %v5369_v62 = vadd.f32 %v3662_v14, %v5302_v1  ;;  %v1726_v9 = vadd.f32 %v5208_v31, %v1725_v15  ;;  %v3862_v59 = vpop.f32.mrb[74].mxu0 }
 0x1ad   : > { %v5373_v24 = vadd.f32 %v5275_v49, %v1734_v21  ;;  %v1737_v52 = vadd.f32 %v3862_v59, %v5224_v50  ;;  %v1728_v10 = vpop.f32.mrb[75].mxu0 }
 0x1ae   : > { %v3663_v51 = vpop.f32.mrb[72].mxu1  ;;  %v5377_v26 = vadd.f32 %v5270_v20, %v1726_v9  ;;  %v1729_v34 = vadd.f32 %v5211_v45, %v1728_v10 }
 0x1af   : > { %v3664_v27 = vpop.f32.mrb[73].mxu1  ;;  %v5381_v19 = vadd.f32 %v5277_v25, %v1737_v52 }
 0x1b0   : > { %v3665_v1 = vadd.f32 %v3664_v27, %v3663_v51  ;;  %v3666_v61 = vpop.f32.mrb[74].mxu1  ;;  %v5384_v31 = vadd.f32 %v5273_v2, %v1729_v34 }
 0x1b1   : > { %v3667_v49 = vpop.f32.mrb[75].mxu1 }
 0x1b2   : > { %v5387_v12 = vadd.f32 %v3665_v1, %v5308_v32  ;;  %v3668_v50 = vadd.f32 %v3667_v49, %v3666_v61  ;;  %v3865_v18 = vpop.f32.mrb[76].mxu0 }
 0x1b3   : > { %v1750_v20 = vadd.f32 %v3865_v18, %v5253_v39  ;;  %v1741_v5 = vpop.f32.mrb[77].mxu0 }
 0x1b4   : > { %v5391_v45 = vadd.f32 %v3668_v50, %v5310_v55  ;;  %v1742_v25 = vadd.f32 %v5240_v16, %v1741_v5  ;;  %v3866_v63 = vpop.f32.mrb[78].mxu0 }
 0x1b5   : > { %v5395_v13 = vadd.f32 %v5287_v36, %v1750_v20  ;;  %v1753_v2 = vadd.f32 %v3866_v63, %v5257_v60  ;;  %v1744_v43 = vpop.f32.mrb[79].mxu0 }
 0x1b6   : > { %v3669_v6 = vpop.f32.mrb[76].mxu1  ;;  %v5399_v32 = vadd.f32 %v5279_v48, %v1742_v25  ;;  %v1745_v23 = vadd.f32 %v5244_v30, %v1744_v43 }
 0x1b7   : > { %v3670_v39 = vpop.f32.mrb[77].mxu1  ;;  %v5403_v11 = vadd.f32 %v5289_v29, %v1753_v2 }
 0x1b8   : > { %v3671_v55 = vadd.f32 %v3670_v39, %v3669_v6  ;;  %v3672_v14 = vpop.f32.mrb[78].mxu1  ;;  %v2050_v16 = vadd.f32 %v5281_v57, %v1745_v23 }
 0x1b9   : > { %v3673_v38 = vpop.f32.mrb[79].mxu1 }
 0x1ba   : > { %v5407_v36 = vadd.f32 %v3671_v55, %v5316_v53  ;;  %v3674_v60 = vadd.f32 %v3673_v38, %v3672_v14  ;;  %v3715_v21 = vpop.f32.mrb[80].mxu0 }
 0x1bb   : > { %v3716_v15 = vpop.f32.mrb[81].mxu0 }
 0x1bc   : > { %v5410_v48 = vadd.f32 %v3674_v60, %v5318_v3  ;;  %v3717_v9 = vadd.f32 %v3716_v15, %v3715_v21  ;;  %v3718_v30 = vpop.f32.mrb[82].mxu0 }
 0x1bd   : > { %v3719_v59 = vpop.f32.mrb[83].mxu0 }
 0x1be   : > { %v3720_v52 = vadd.f32 %v3719_v59, %v3718_v30  ;;  %v5413_v29 = vadd.f32 %v3717_v9, %v5333_v47 }
 0x1c0   : > { %v5416_v10 = vadd.f32 %v3720_v52, %v5340_v7 }
 0x1c2   : > { %v3721_v57 = vpop.f32.mrb[84].mxu0 }
 0x1c3   : > { %v3722_v51 = vpop.f32.mrb[85].mxu0 }
 0x1c4   : > { %v3723_v53 = vadd.f32 %v3722_v51, %v3721_v57  ;;  %v3724_v34 = vpop.f32.mrb[86].mxu0 }
 0x1c5   : > { %v3725_v27 = vpop.f32.mrb[87].mxu0 }
 0x1c6   : > { %v3726_v1 = vadd.f32 %v3725_v27, %v3724_v34  ;;  %v3997_v61 = vadd.f32 %v3723_v53, %v5329_v41 }
 0x1c8   : > { %v5420_v3 = vadd.f32 %v3726_v1, %v5337_v22 }
 0x1ca   : > { %v3727_v49 = vpop.f32.mrb[88].mxu0 }
 0x1cb   : > { %v3728_v50 = vpop.f32.mrb[89].mxu0 }
 0x1cc   : > { %v3729_v18 = vadd.f32 %v3728_v50, %v3727_v49  ;;  %v3730_v20 = vpop.f32.mrb[90].mxu0 }
 0x1cd   : > { %v3731_v47 = vpop.f32.mrb[91].mxu0 }
 0x1ce   : > { %v3732_v5 = vadd.f32 %v3731_v47, %v3730_v20  ;;  %v5423_v7 = vadd.f32 %v3729_v18, %v5355_v44 }
 0x1d0   : > { %v5426_v25 = vadd.f32 %v3732_v5, %v5362_v42 }
 0x1d2   : > { %v3733_v63 = vpop.f32.mrb[92].mxu0 }
 0x1d3   : > { %v3734_v2 = vpop.f32.mrb[93].mxu0 }
 0x1d4   : > { %v3735_v43 = vadd.f32 %v3734_v2, %v3733_v63  ;;  %v3736_v6 = vpop.f32.mrb[94].mxu0 }
 0x1d5   : > { %v3737_v41 = vpop.f32.mrb[95].mxu0 }
 0x1d6   : > { %v3738_v23 = vadd.f32 %v3737_v41, %v3736_v6  ;;  %v5429_v22 = vadd.f32 %v3735_v43, %v5351_v17 }
 0x1d8   : > { %v5432_v39 = vadd.f32 %v3738_v23, %v5359_v37 }
 0x1da   : > { %v3739_v55 = vpop.f32.mrb[96].mxu0 }
 0x1db   : > { %v3740_v14 = vpop.f32.mrb[97].mxu0 }
 0x1dc   : > { %v3741_v38 = vadd.f32 %v3740_v14, %v3739_v55  ;;  %v3742_v44 = vpop.f32.mrb[98].mxu0 }
 0x1dd   : > { %v3743_v60 = vpop.f32.mrb[99].mxu0 }
 0x1de   : > { %v3744_v21 = vadd.f32 %v3743_v60, %v3742_v44  ;;  %v5435_v42 = vadd.f32 %v3741_v38, %v5377_v26 }
 0x1e0   : > { %v5438_v15 = vadd.f32 %v3744_v21, %v5384_v31 }
 0x1e2   : > { %v3745_v9 = vpop.f32.mrb[100].mxu0 }
 0x1e3   : > { %v3746_v30 = vpop.f32.mrb[101].mxu0 }
 0x1e4   : > { %v3747_v59 = vadd.f32 %v3746_v30, %v3745_v9  ;;  %v3748_v17 = vpop.f32.mrb[102].mxu0 }
 0x1e5   : > { %v3749_v52 = vpop.f32.mrb[103].mxu0 }
 0x1e6   : > { %v3750_v57 = vadd.f32 %v3749_v52, %v3748_v17  ;;  %v5441_v37 = vadd.f32 %v3747_v59, %v5373_v24 }
 0x1e8   : > { %v5444_v51 = vadd.f32 %v3750_v57, %v5381_v19 }
 0x1ea   : > { %v3751_v53 = vpop.f32.mrb[104].mxu0 }
 0x1eb   : > { %v3752_v34 = vpop.f32.mrb[105].mxu0 }
 0x1ec   : > { %v3753_v26 = vadd.f32 %v3752_v34, %v3751_v53  ;;  %v3754_v27 = vpop.f32.mrb[106].mxu0 }
 0x1ed   : > { %v3755_v1 = vpop.f32.mrb[107].mxu0 }
 0x1ee   : > { %v3756_v31 = vadd.f32 %v3755_v1, %v3754_v27  ;;  %v5447_v49 = vadd.f32 %v3753_v26, %v5399_v32 }
 0x1f0   : > { %v5449_v50 = vadd.f32 %v3756_v31, %v2050_v16 }
 0x1f2   : > { %v3757_v18 = vpop.f32.mrb[108].mxu0 }
 0x1f3   : > { %v3758_v20 = vpop.f32.mrb[109].mxu0 }
 0x1f4   : > { %v3759_v47 = vadd.f32 %v3758_v20, %v3757_v18  ;;  %v3760_v24 = vpop.f32.mrb[110].mxu0 }
 0x1f5   : > { %v3761_v5 = vpop.f32.mrb[111].mxu0 }
 0x1f6   : > { %v3762_v63 = vadd.f32 %v3761_v5, %v3760_v24  ;;  %v5452_v19 = vadd.f32 %v3759_v47, %v5395_v13 }
 0x1f8   : > { %v5455_v2 = vadd.f32 %v3762_v63, %v5403_v11 }
 0x1fa   : > { %v3763_v43 = vpop.f32.mrb[112].mxu0 }
 0x1fb   : > { %v3764_v6 = vpop.f32.mrb[113].mxu0 }
 0x1fc   : > { %v3765_v41 = vadd.f32 %v3764_v6, %v3763_v43  ;;  %v3766_v32 = vpop.f32.mrb[114].mxu0 }
 0x1fd   : > { %v3767_v23 = vpop.f32.mrb[115].mxu0 }
 0x1fe   : > { %v3949_v16 = vpop.f32.mrb[80].mxu1  ;;  %v3768_v13 = vadd.f32 %v3767_v23, %v3766_v32  ;;  %v5464_v11 = vadd.f32 %v5296_v0, %v3765_v41 }
 0x1ff   : > { %v3998_v55 = vadd.f32 %v3997_v61, %v3949_v16  ;;  %v2674_v14 = vpop.f32.mrb[81].mxu1 }
 0x200   : > { %v4002_v38 = vadd.f32 %v5413_v29, %v2674_v14  ;;  %v3950_v44 = vpop.f32.mrb[82].mxu1  ;;  %v5468_v60 = vadd.f32 %v5298_v35, %v3768_v13 }
 0x201   : > { %2835 = vst [vmem:[%s5461_s8 + $0x10] sm:$0xff] %v3998_v55  ;;  %v4006_v21 = vadd.f32 %v5420_v3, %v3950_v44  ;;  %v2677_v9 = vpop.f32.mrb[83].mxu1  ;;  %v2904_v53 = vmul.f32 %v3998_v55, %v3998_v55 }
 0x202   : > { %2833 = vst [vmem:[%s5461_s8] sm:$0xff] %v4002_v38  ;;  %v4010_v30 = vadd.f32 %v5416_v10, %v2677_v9  ;;  %v3769_v59 = vpop.f32.mrb[116].mxu0  ;;  %v2902_v0 = vmul.f32 %v4002_v38, %v4002_v38 }
 0x203   : > { %2836 = vst [vmem:[%s5461_s8 + $0x18] sm:$0xff] %v4006_v21  ;;  %v3770_v17 = vpop.f32.mrb[117].mxu0  ;;  %v2905_v10 = vmul.f32 %v4006_v21, %v4006_v21 }
 0x204   : > { %2834 = vst [vmem:[%s5461_s8 + $0x8] sm:$0xff] %v4010_v30  ;;  %v2865_v61 = vadd.f32 %v4010_v30, %v4002_v38  ;;  %v2903_v52 = vmul.f32 %v4010_v30, %v4010_v30  ;;  %v3771_v57 = vadd.f32 %v3770_v17, %v3769_v59  ;;  %v3772_v29 = vpop.f32.mrb[118].mxu0 }
 0x205   : > { %v3773_v35 = vpop.f32.mrb[119].mxu0 }
 0x206   : > { %v2866_v34 = vadd.f32 %v3998_v55, %v2865_v61  ;;  %v2934_v26 = vadd.f32 %v2903_v52, %v2902_v0  ;;  %v3953_v3 = vpop.f32.mrb[84].mxu1  ;;  %v3774_v27 = vadd.f32 %v3773_v35, %v3772_v29  ;;  %v5477_v1 = vadd.f32 %v5304_v54, %v3771_v57 }
 0x207   : > { %v4014_v31 = vadd.f32 %v5429_v22, %v3953_v3  ;;  %v2690_v18 = vpop.f32.mrb[85].mxu1 }
 0x208   : > { %v2935_v20 = vadd.f32 %v2934_v26, %v2904_v53  ;;  %v4018_v47 = vadd.f32 %v5423_v7, %v2690_v18  ;;  %v2867_v24 = vadd.f32 %v4006_v21, %v2866_v34  ;;  %v3954_v5 = vpop.f32.mrb[86].mxu1  ;;  %v5482_v63 = vadd.f32 %v5306_v8, %v3774_v27 }
 0x209   : > { %2839 = vst [vmem:[%s5461_s8 + $0x30] sm:$0xff] %v4014_v31  ;;  %v4022_v43 = vadd.f32 %v5432_v39, %v3954_v5  ;;  %v2693_v6 = vpop.f32.mrb[87].mxu1  ;;  %v2908_v38 = vmul.f32 %v4014_v31, %v4014_v31 }
 0x20a   : > { %2837 = vst [vmem:[%s5461_s8 + $0x20] sm:$0xff] %v4018_v47  ;;  %v2868_v54 = vadd.f32 %v4018_v47, %v2867_v24  ;;  %v2906_v41 = vmul.f32 %v4018_v47, %v4018_v47  ;;  %v2936_v32 = vadd.f32 %v2935_v20, %v2905_v10  ;;  %v4026_v22 = vadd.f32 %v5426_v25, %v2693_v6  ;;  %v3775_v23 = vpop.f32.mrb[120].mxu0 }
 0x20b   : > { %2840 = vst [vmem:[%s5461_s8 + $0x38] sm:$0xff] %v4022_v43  ;;  %v3776_v16 = vpop.f32.mrb[121].mxu0  ;;  %v2909_v25 = vmul.f32 %v4022_v43, %v4022_v43 }
 0x20c   : > { %v2937_v7 = vadd.f32 %v2936_v32, %v2906_v41  ;;  %2838 = vst [vmem:[%s5461_s8 + $0x28] sm:$0xff] %v4026_v22  ;;  %v2869_v13 = vadd.f32 %v4026_v22, %v2868_v54  ;;  %v2907_v55 = vmul.f32 %v4026_v22, %v4026_v22  ;;  %v3777_v14 = vadd.f32 %v3776_v16, %v3775_v23  ;;  %v3778_v8 = vpop.f32.mrb[122].mxu0 }
 0x20d   : > { %v3779_v44 = vpop.f32.mrb[123].mxu0 }
 0x20e   : > { %v2870_v39 = vadd.f32 %v4014_v31, %v2869_v13  ;;  %v2938_v21 = vadd.f32 %v2937_v7, %v2907_v55  ;;  %v3957_v9 = vpop.f32.mrb[88].mxu1  ;;  %v3780_v30 = vadd.f32 %v3779_v44, %v3778_v8  ;;  %v5491_v59 = vadd.f32 %v5312_v28, %v3777_v14 }
 0x20f   : > { %v4030_v17 = vadd.f32 %v5441_v37, %v3957_v9  ;;  %v2706_v0 = vpop.f32.mrb[89].mxu1 }
 0x210   : > { %v2939_v61 = vadd.f32 %v2938_v21, %v2908_v38  ;;  %v4034_v52 = vadd.f32 %v5435_v42, %v2706_v0  ;;  %v2871_v57 = vadd.f32 %v4022_v43, %v2870_v39  ;;  %v3958_v29 = vpop.f32.mrb[90].mxu1  ;;  %v5496_v53 = vadd.f32 %v5314_v56, %v3780_v30 }
 0x211   : > { %2843 = vst [vmem:[%s5461_s8 + $0x50] sm:$0xff] %v4030_v17  ;;  %v4038_v35 = vadd.f32 %v5444_v51, %v3958_v29  ;;  %v2709_v34 = vpop.f32.mrb[91].mxu1  ;;  %v2912_v47 = vmul.f32 %v4030_v17, %v4030_v17 }
 0x212   : > { %2841 = vst [vmem:[%s5461_s8 + $0x40] sm:$0xff] %v4034_v52  ;;  %v2872_v28 = vadd.f32 %v4034_v52, %v2871_v57  ;;  %v2910_v26 = vmul.f32 %v4034_v52, %v4034_v52  ;;  %v2940_v3 = vadd.f32 %v2939_v61, %v2909_v25  ;;  %v4042_v37 = vadd.f32 %v5438_v15, %v2709_v34  ;;  %v3781_v27 = vpop.f32.mrb[124].mxu0 }
 0x213   : > { %2844 = vst [vmem:[%s5461_s8 + $0x58] sm:$0xff] %v4038_v35  ;;  %v3782_v10 = vpop.f32.mrb[125].mxu0  ;;  %v2913_v15 = vmul.f32 %v4038_v35, %v4038_v35 }
 0x214   : > { %v2941_v42 = vadd.f32 %v2940_v3, %v2910_v26  ;;  %2842 = vst [vmem:[%s5461_s8 + $0x48] sm:$0xff] %v4042_v37  ;;  %v2873_v31 = vadd.f32 %v4042_v37, %v2872_v28  ;;  %v2911_v18 = vmul.f32 %v4042_v37, %v4042_v37  ;;  %v3783_v20 = vadd.f32 %v3782_v10, %v3781_v27  ;;  %v3784_v56 = vpop.f32.mrb[126].mxu0 }
 0x215   : > { %v3785_v24 = vpop.f32.mrb[127].mxu0 }
 0x216   : > { %v2874_v51 = vadd.f32 %v4030_v17, %v2873_v31  ;;  %v2942_v5 = vadd.f32 %v2941_v42, %v2911_v18  ;;  %v3961_v43 = vpop.f32.mrb[92].mxu1  ;;  %v3786_v6 = vadd.f32 %v3785_v24, %v3784_v56  ;;  %v5505_v54 = vadd.f32 %v5321_v40, %v3783_v20 }
 0x217   : > { %v4046_v41 = vadd.f32 %v5452_v19, %v3961_v43  ;;  %v2722_v32 = vpop.f32.mrb[93].mxu1 }
 0x218   : > { %v2943_v22 = vadd.f32 %v2942_v5, %v2912_v47  ;;  %v4050_v23 = vadd.f32 %v5447_v49, %v2722_v32  ;;  %v2875_v16 = vadd.f32 %v4038_v35, %v2874_v51  ;;  %v3962_v7 = vpop.f32.mrb[94].mxu1  ;;  %v5510_v13 = vadd.f32 %v5325_v58, %v3786_v6 }
 0x219   : > { %2847 = vst [vmem:[%s5461_s8 + $0x70] sm:$0xff] %v4046_v41  ;;  %v4054_v55 = vadd.f32 %v5455_v2, %v3962_v7  ;;  %v2725_v14 = vpop.f32.mrb[95].mxu1  ;;  %v2916_v25 = vmul.f32 %v4046_v41, %v4046_v41 }
 0x21a   : > { %2845 = vst [vmem:[%s5461_s8 + $0x60] sm:$0xff] %v4050_v23  ;;  %v2876_v40 = vadd.f32 %v4050_v23, %v2875_v16  ;;  %v2914_v8 = vmul.f32 %v4050_v23, %v4050_v23  ;;  %v2944_v38 = vadd.f32 %v2943_v22, %v2913_v15  ;;  %v4058_v19 = vadd.f32 %v5449_v50, %v2725_v14  ;;  %v3787_v44 = vpop.f32.mrb[128].mxu0 }
 0x21b   : > { %2848 = vst [vmem:[%s5461_s8 + $0x78] sm:$0xff] %v4054_v55  ;;  %v3788_v39 = vpop.f32.mrb[129].mxu0  ;;  %v2917_v50 = vmul.f32 %v4054_v55, %v4054_v55 }
 0x21c   : > { %v2945_v49 = vadd.f32 %v2944_v38, %v2914_v8  ;;  %2846 = vst [vmem:[%s5461_s8 + $0x68] sm:$0xff] %v4058_v19  ;;  %v2877_v21 = vadd.f32 %v4058_v19, %v2876_v40  ;;  %v2915_v9 = vmul.f32 %v4058_v19, %v4058_v19  ;;  %v3789_v30 = vadd.f32 %v3788_v39, %v3787_v44  ;;  %v3790_v58 = vpop.f32.mrb[130].mxu0 }
 0x21d   : > { %v3791_v17 = vpop.f32.mrb[131].mxu0 }
 0x21e   : > { %v2878_v2 = vadd.f32 %v4046_v41, %v2877_v21  ;;  %v2946_v0 = vadd.f32 %v2945_v49, %v2915_v9  ;;  %v3965_v61 = vpop.f32.mrb[0].mxu1  ;;  %v3792_v52 = vadd.f32 %v3791_v17, %v3790_v58  ;;  %v5519_v57 = vadd.f32 %v5343_v46, %v3789_v30 }
 0x21f   : > { %v4061_v29 = vadd.f32 %v5477_v1, %v3965_v61  ;;  %v2738_v35 = vpop.f32.mrb[1].mxu1 }
 0x220   : > { %v2947_v34 = vadd.f32 %v2946_v0, %v2916_v25  ;;  %v4064_v28 = vadd.f32 %v5464_v11, %v2738_v35  ;;  %v2879_v26 = vadd.f32 %v4054_v55, %v2878_v2  ;;  %v3966_v3 = vpop.f32.mrb[2].mxu1  ;;  %v5524_v37 = vadd.f32 %v5347_v33, %v3792_v52 }
 0x221   : > { %2851 = vst [vmem:[%s5461_s8 + $0x90] sm:$0xff] %v4061_v29  ;;  %v4067_v27 = vadd.f32 %v5482_v63, %v3966_v3  ;;  %v2741_v10 = vpop.f32.mrb[3].mxu1  ;;  %v2920_v51 = vmul.f32 %v4061_v29, %v4061_v29 }
 0x222   : > { %2849 = vst [vmem:[%s5461_s8 + $0x80] sm:$0xff] %v4064_v28  ;;  %v2880_v46 = vadd.f32 %v4064_v28, %v2879_v26  ;;  %v2918_v42 = vmul.f32 %v4064_v28, %v4064_v28  ;;  %v2948_v31 = vadd.f32 %v2947_v34, %v2917_v50  ;;  %v4070_v1 = vadd.f32 %v5468_v60, %v2741_v10  ;;  %v3793_v18 = vpop.f32.mrb[132].mxu0 }
 0x223   : > { %2852 = vst [vmem:[%s5461_s8 + $0x98] sm:$0xff] %v4067_v27  ;;  %v3794_v20 = vpop.f32.mrb[133].mxu0  ;;  %v2921_v60 = vmul.f32 %v4067_v27, %v4067_v27 }
 0x224   : > { %v2949_v11 = vadd.f32 %v2948_v31, %v2918_v42  ;;  %2850 = vst [vmem:[%s5461_s8 + $0x88] sm:$0xff] %v4070_v1  ;;  %v2881_v56 = vadd.f32 %v4070_v1, %v2880_v46  ;;  %v2919_v47 = vmul.f32 %v4070_v1, %v4070_v1  ;;  %v3795_v24 = vadd.f32 %v3794_v20, %v3793_v18  ;;  %v3796_v33 = vpop.f32.mrb[134].mxu0 }
 0x225   : > { %v3797_v5 = vpop.f32.mrb[135].mxu0 }
 0x226   : > { %v2882_v63 = vadd.f32 %v4061_v29, %v2881_v56  ;;  %v2950_v43 = vadd.f32 %v2949_v11, %v2919_v47  ;;  %v3969_v6 = vpop.f32.mrb[4].mxu1  ;;  %v3798_v15 = vadd.f32 %v3797_v5, %v3796_v33  ;;  %v4084_v41 = vadd.f32 %v5365_v4, %v3795_v24 }
 0x227   : > { %v4073_v32 = vadd.f32 %v5505_v54, %v3969_v6  ;;  %v2754_v22 = vpop.f32.mrb[5].mxu1 }
 0x228   : > { %v2951_v23 = vadd.f32 %v2950_v43, %v2920_v51  ;;  %v4076_v16 = vadd.f32 %v5491_v59, %v2754_v22  ;;  %v2883_v7 = vadd.f32 %v4067_v27, %v2882_v63  ;;  %v3970_v55 = vpop.f32.mrb[6].mxu1  ;;  %v4090_v14 = vadd.f32 %v5369_v62, %v3798_v15 }
 0x229   : > { %2855 = vst [vmem:[%s5461_s8 + $0xb0] sm:$0xff] %v4073_v32  ;;  %v4079_v40 = vadd.f32 %v5510_v13, %v3970_v55  ;;  %v2757_v8 = vpop.f32.mrb[7].mxu1  ;;  %v2924_v62 = vmul.f32 %v4073_v32, %v4073_v32 }
 0x22a   : > { %2853 = vst [vmem:[%s5461_s8 + $0xa0] sm:$0xff] %v4076_v16  ;;  %v2884_v38 = vadd.f32 %v4076_v16, %v2883_v7  ;;  %v2922_v4 = vmul.f32 %v4076_v16, %v4076_v16  ;;  %v2952_v19 = vadd.f32 %v2951_v23, %v2921_v60  ;;  %v4082_v54 = vadd.f32 %v5496_v53, %v2757_v8  ;;  %v3799_v44 = vpop.f32.mrb[136].mxu0 }
 0x22b   : > { %2856 = vst [vmem:[%s5461_s8 + $0xb8] sm:$0xff] %v4079_v40  ;;  %v3800_v39 = vpop.f32.mrb[137].mxu0  ;;  %v2925_v53 = vmul.f32 %v4079_v40, %v4079_v40 }
 0x22c   : > { %v2953_v49 = vadd.f32 %v2952_v19, %v2922_v4  ;;  %2854 = vst [vmem:[%s5461_s8 + $0xa8] sm:$0xff] %v4082_v54  ;;  %v2885_v59 = vadd.f32 %v4082_v54, %v2884_v38  ;;  %v2923_v21 = vmul.f32 %v4082_v54, %v4082_v54  ;;  %v3801_v9 = vadd.f32 %v3800_v39, %v3799_v44  ;;  %v3802_v30 = vpop.f32.mrb[138].mxu0 }
 0x22d   : > { %v3803_v58 = vpop.f32.mrb[139].mxu0 }
 0x22e   : > { %v2886_v13 = vadd.f32 %v4073_v32, %v2885_v59  ;;  %v2954_v25 = vadd.f32 %v2953_v49, %v2923_v21  ;;  %v3973_v17 = vpop.f32.mrb[8].mxu1  ;;  %v3804_v2 = vadd.f32 %v3803_v58, %v3802_v30  ;;  %v4099_v0 = vadd.f32 %v5387_v12, %v3801_v9 }
 0x22f   : > { %v4085_v61 = vadd.f32 %v4084_v41, %v3973_v17  ;;  %v2770_v52 = vpop.f32.mrb[9].mxu1 }
 0x230   : > { %v2955_v50 = vadd.f32 %v2954_v25, %v2924_v62  ;;  %v4088_v29 = vadd.f32 %v5519_v57, %v2770_v52  ;;  %v2887_v35 = vadd.f32 %v4079_v40, %v2886_v13  ;;  %v3974_v34 = vpop.f32.mrb[10].mxu1  ;;  %v4105_v28 = vadd.f32 %v5391_v45, %v3804_v2 }
 0x231   : > { %2859 = vst [vmem:[%s5461_s8 + $0xd0] sm:$0xff] %v4085_v61  ;;  %v4091_v26 = vadd.f32 %v4090_v14, %v3974_v34  ;;  %v2773_v3 = vpop.f32.mrb[11].mxu1  ;;  %v2928_v56 = vmul.f32 %v4085_v61, %v4085_v61 }
 0x232   : > { %2857 = vst [vmem:[%s5461_s8 + $0xc0] sm:$0xff] %v4088_v29  ;;  %v2888_v27 = vadd.f32 %v4088_v29, %v2887_v35  ;;  %v2926_v10 = vmul.f32 %v4088_v29, %v4088_v29  ;;  %v2956_v46 = vadd.f32 %v2955_v50, %v2925_v53  ;;  %v4094_v12 = vadd.f32 %v5524_v37, %v2773_v3  ;;  %v3805_v42 = vpop.f32.mrb[140].mxu0 }
 0x233   : > { %2860 = vst [vmem:[%s5461_s8 + $0xd8] sm:$0xff] %v4091_v26  ;;  %v3806_v31 = vpop.f32.mrb[141].mxu0  ;;  %v2929_v37 = vmul.f32 %v4091_v26, %v4091_v26 }
 0x234   : > { %v2957_v1 = vadd.f32 %v2956_v46, %v2926_v10  ;;  %2858 = vst [vmem:[%s5461_s8 + $0xc8] sm:$0xff] %v4094_v12  ;;  %v2889_v57 = vadd.f32 %v4094_v12, %v2888_v27  ;;  %v2927_v18 = vmul.f32 %v4094_v12, %v4094_v12  ;;  %v3807_v20 = vadd.f32 %v3806_v31, %v3805_v42  ;;  %v3808_v11 = vpop.f32.mrb[142].mxu0 }
 0x235   : > { %v3809_v45 = vpop.f32.mrb[143].mxu0 }
 0x236   : > { %v2890_v47 = vadd.f32 %v4085_v61, %v2889_v57  ;;  %v2958_v24 = vadd.f32 %v2957_v1, %v2927_v18  ;;  %v3977_v33 = vpop.f32.mrb[12].mxu1  ;;  %v4096_v51 = vadd.f32 %v5407_v36, %v3807_v20  ;;  %v3810_v5 = vadd.f32 %v3809_v45, %v3808_v11 }
 0x237   : > { %v2786_v63 = vpop.f32.mrb[13].mxu1 }
 0x238   : > { %v2959_v43 = vadd.f32 %v2958_v24, %v2928_v56  ;;  %v4097_v6 = vadd.f32 %v4096_v51, %v3977_v33  ;;  %v4100_v15 = vadd.f32 %v4099_v0, %v2786_v63  ;;  %v2891_v41 = vadd.f32 %v4091_v26, %v2890_v47  ;;  %v3978_v60 = vpop.f32.mrb[14].mxu1 }
 0x239   : > { %v4102_v32 = vadd.f32 %v5410_v48, %v3810_v5  ;;  %v2789_v22 = vpop.f32.mrb[15].mxu1 }
 0x23a   : > { %2863 = vst [vmem:[%s5461_s8 + $0xf0] sm:$0xff] %v4097_v6  ;;  %2861 = vst [vmem:[%s5461_s8 + $0xe0] sm:$0xff] %v4100_v15  ;;  %v2892_v23 = vadd.f32 %v4100_v15, %v2891_v41  ;;  %v2930_v16 = vmul.f32 %v4100_v15, %v4100_v15  ;;  %v2960_v7 = vadd.f32 %v2959_v43, %v2929_v37 }
 0x23b   : > { %v4103_v55 = vadd.f32 %v4102_v32, %v3978_v60  ;;  %v4106_v36 = vadd.f32 %v4105_v28, %v2789_v22  ;;  %v2932_v40 = vmul.f32 %v4097_v6, %v4097_v6 }
 0x23c   : > { %v2961_v14 = vadd.f32 %v2960_v7, %v2930_v16 }
 0x23d   : > { %2864 = vst [vmem:[%s5461_s8 + $0xf8] sm:$0xff] %v4103_v55  ;;  %2862 = vst [vmem:[%s5461_s8 + $0xe8] sm:$0xff] %v4106_v36  ;;  %v2893_v8 = vadd.f32 %v4106_v36, %v2892_v23  ;;  %v2931_v38 = vmul.f32 %v4106_v36, %v4106_v36  ;;  %v2933_v4 = vmul.f32 %v4103_v55, %v4103_v55 }
 0x23f   : > { %v2894_v19 = vadd.f32 %v4097_v6, %v2893_v8  ;;  %v2962_v54 = vadd.f32 %v2961_v14, %v2931_v38 }
 0x241   : > { %v2895_v44 = vadd.f32 %v4103_v55, %v2894_v19  ;;  %v2963_v48 = vadd.f32 %v2962_v54, %v2932_v40 }
 0x243   : > { %v2896_v39 = vrot.slane %v2895_v44, 4  ;;  %v2964_v49 = vadd.f32 %v2963_v48, %v2933_v4 }
 0x245   : > { %v2897_v59 = vadd.f32 %v2896_v39, %v2895_v44  ;;  %v2965_v21 = vrot.slane %v2964_v49, 4 }
 0x247   : > { %v2898_v9 = vrot.slane %v2897_v59, 2  ;;  %v2966_v30 = vadd.f32 %v2965_v21, %v2964_v49 }
 0x249   : > { %v2899_v62 = vadd.f32 %v2898_v9, %v2897_v59  ;;  %v2967_v58 = vrot.slane %v2966_v30, 2 }
 0x24b   : > { %v2900_v13 = vrot.slane %v2899_v62, 1  ;;  %v2968_v25 = vadd.f32 %v2967_v58, %v2966_v30 }
 0x24d   : > { %v2969_v17 = vrot.slane %v2968_v25, 1  ;;  %v2901_v2 = vadd.f32 %v2900_v13, %v2899_v62 }
 0x24f   : > { %v2970_v0 = vadd.f32 %v2969_v17, %v2968_v25 }
 0x251   : > { %v2972_v53 = vsel %vm874_vm0, %v2901_v2, %v2970_v0 }
 0x252   : > { %v2974_v61 = vsel %vm2973_vm5, %v2972_v53, 0.0 }
 0x253   : > { %2975 = vst [vmem:[%s461_s12] sm:$0xff] %v2974_v61 }
 0x254 PF: > { %s18_s26 = sadd.s32 1, %s4275_s26   ;;  %s5591_s24 = smov %s4271_s25 }
 0x255   : > { %p15_p5 = scmp.ge.s32.totalorder %s18_s26, 4   ;;  %s5592_s25 = smov %s5594_s27 }
 0x257   :  { %17 = sbr.rel (!%p15_p5) target bundleno = 2 (0x2), region = 94 }

</bundles_post_ra>
